<compile_context>
chip_gen: v5e
topology: v5e:2x2
jax: 0.10.0
libtpu: 0.0.40
codegen_flags: <defaults>
</compile_context>

<pallas_src>
import functools
import math

import jax
import jax.numpy as jnp
from jax import lax
from jax.experimental import pallas as pl
from jax.experimental.pallas import tpu as pltpu


# ----------------------------- Pallas kernel -------------------------------

def mha_kernel(xq_ref, xk_ref, xv_ref,
               wq_ref, bq_ref, wk_ref, bk_ref, wv_ref, bv_ref,
               wo_ref, bo_ref,
               o_ref,
               k_vmem, v_vmem, ctx_vmem,
               *, num_heads, scale):
    """Grid = (batch, query_tiles). xq: (1, TQ, D); xk/xv: (1, S, D)."""
    qi = pl.program_id(1)

    # ---- project K / V once per batch element; keep resident in VMEM scratch
    @pl.when(qi == 0)
    def _():
        xk = xk_ref[0]                                             # (S, D) bf16
        xv = xv_ref[0]
        k = jnp.dot(xk, wk_ref[...], preferred_element_type=jnp.float32) + bk_ref[...]
        v = jnp.dot(xv, wv_ref[...], preferred_element_type=jnp.float32) + bv_ref[...]
        k_vmem[...] = k.astype(k_vmem.dtype)
        v_vmem[...] = v.astype(v_vmem.dtype)

    # ---- project this query tile; fold 1/sqrt(d_k) into q (== scaling scores)
    xq = xq_ref[0]                                                 # (TQ, D) bf16
    q = (jnp.dot(xq, wq_ref[...], preferred_element_type=jnp.float32)
         + bq_ref[...]) * scale                                    # (TQ, D) f32
    q = q.astype(jnp.bfloat16)

    TQ, D = q.shape
    d_k = D // num_heads

    k = k_vmem[...]                                                # (S, D) bf16
    v = v_vmem[...]                                                # (S, D) bf16

    # ---- per-head attention; ctx written head-by-head into VMEM scratch so
    #      live ranges stay bounded and no lane concatenate is needed.
    for h in range(num_heads):                                     # small static loop
        lo = h * d_k
        qh = q[:, lo:lo + d_k]                                     # (TQ, d_k) bf16
        kh = k[:, lo:lo + d_k]                                     # (S,  d_k) bf16
        vh = v[:, lo:lo + d_k]                                     # (S,  d_k) bf16

        # scores[i, j] = sum_d qh[i, d] * kh[j, d]   (contract last dims,
        # no explicit K transpose / XLU op)
        scores = lax.dot_general(qh, kh, (((1,), (1,)), ((), ())),
                                 preferred_element_type=jnp.float32)   # (TQ, S)

        # numerically-stable softmax over keys, all in f32 (v5e: no bf16 VPU/EUP)
        m = jnp.max(scores, axis=-1, keepdims=True)
        e = jnp.exp(scores - m)
        denom = jnp.sum(e, axis=-1, keepdims=True)
        p = e * pl.reciprocal(denom, approx=True)                  # (TQ, S) f32

        ctx_h = jnp.dot(p.astype(jnp.bfloat16), vh,
                        preferred_element_type=jnp.float32)        # (TQ, d_k) f32
        ctx_vmem[:, lo:lo + d_k] = ctx_h.astype(ctx_vmem.dtype)

    # ---- output projection; single lane-dense (TQ, D) store
    out = (jnp.dot(ctx_vmem[...], wo_ref[...], preferred_element_type=jnp.float32)
           + bo_ref[...])
    o_ref[0] = out.astype(o_ref.dtype)


# ----------------------------- wrapper --------------------------------------

def _pick_q_tile(S):
    for t in (512, 256, 128):
        if S % t == 0:
            return t
    return S  # fall back to the whole (untiled) sequence


def _vmem_limit_bytes(S, TQ, D):
    bf16, f32 = 2, 4
    weights = 4 * D * D * bf16 + 4 * D * f32            # resident every step
    io = 2 * (TQ * D + 2 * S * D + TQ * D) * bf16       # double-buffered q/k/v/out
    scratch = (2 * S * D + TQ * D) * bf16                # projected K/V + ctx
    interim = 3 * TQ * S * f32 + 6 * TQ * D * f32 + 2 * S * D * f32
    est = weights + io + scratch + interim
    return int(min(max(2 * est, 32 << 20), 64 << 20))    # stay under v7x's 64 MiB


def multi_headed_attention(query, key, value, params, h,
                           compute_dtype=jnp.bfloat16):
    """Matches MultiHeadedAttention.forward (mask=None, eval-mode dropout).

    Weights are stored [D_in, D_out] (transposed vs torch.nn.Linear).
    """
    B, S, D = query.shape
    assert D % h == 0
    d_k = D // h
    scale = 1.0 / math.sqrt(d_k)
    TQ = _pick_q_tile(S)
    n_q = S // TQ

    cast = lambda a: a.astype(compute_dtype)       # MXU operands -> bf16
    f32 = lambda a: a.astype(jnp.float32)          # biases stay f32 (added post-acc)

    kernel = functools.partial(mha_kernel, num_heads=h, scale=scale)

    q_spec = pl.BlockSpec((1, TQ, D), lambda b, qi: (b, qi, 0))
    kv_spec = pl.BlockSpec((1, S, D), lambda b, qi: (b, 0, 0))
    w_spec = pl.BlockSpec((D, D), lambda b, qi: (0, 0))
    b_spec = pl.BlockSpec((1, D), lambda b, qi: (0, 0))

    return pl.pallas_call(
        kernel,
        out_shape=jax.ShapeDtypeStruct((B, S, D), compute_dtype),
        grid=(B, n_q),
        in_specs=[q_spec, kv_spec, kv_spec,
                  w_spec, b_spec,   # Wq, bq
                  w_spec, b_spec,   # Wk, bk
                  w_spec, b_spec,   # Wv, bv
                  w_spec, b_spec],  # Wo, bo
        out_specs=q_spec,
        scratch_shapes=[pltpu.VMEM((S, D), compute_dtype),   # projected K
                        pltpu.VMEM((S, D), compute_dtype),   # projected V
                        pltpu.VMEM((TQ, D), compute_dtype)], # merged per-head ctx
        compiler_params=pltpu.CompilerParams(
            dimension_semantics=("parallel", "arbitrary"),
            vmem_limit_bytes=_vmem_limit_bytes(S, TQ, D)),
    )(cast(query), cast(key), cast(value),
      cast(params["wq"]), f32(params["bq"]).reshape(1, D),
      cast(params["wk"]), f32(params["bk"]).reshape(1, D),
      cast(params["wv"]), f32(params["bv"]).reshape(1, D),
      cast(params["wo"]), f32(params["bo"]).reshape(1, D))


# ----------------------------- reference ------------------------------------

def reference(query, key, value, params, h):
    B, S, D = query.shape
    d_k = D // h

    def lin(x, w, b):
        return x @ w + b

    def split(y):
        return y.reshape(B, S, h, d_k).transpose(0, 2, 1, 3)

    q = split(lin(query, params["wq"], params["bq"]))
    k = split(lin(key, params["wk"], params["bk"]))
    v = split(lin(value, params["wv"], params["bv"]))

    scores = jnp.einsum("bhqd,bhkd->bhqk", q, k) / math.sqrt(d_k)
    p = jax.nn.softmax(scores, axis=-1)
    x = jnp.einsum("bhqk,bhkd->bhqd", p, v)
    x = x.transpose(0, 2, 1, 3).reshape(B, S, D)
    return lin(x, params["wo"], params["bo"])


# ----------------------------- main ------------------------------------------

if __name__ == "__main__":
    # Small but lane-dense: D = 128 and TQ = 128 keep every load/store a full
    # (8,128)-aligned tile; batch = 2 gives both v7x TensorCores work.
    B, S, D, H = 2, 128, 128, 4          # d_k = 32

    key0 = jax.random.PRNGKey(0)
    keys = jax.random.split(key0, 11)

    def w_init(k):
        return jax.random.normal(k, (D, D), dtype=jnp.float32) * 0.05

    def b_init(k):
        return jax.random.normal(k, (D,), dtype=jnp.float32) * 0.01

    params = {
        "wq": w_init(keys[0]), "bq": b_init(keys[1]),
        "wk": w_init(keys[2]), "bk": b_init(keys[3]),
        "wv": w_init(keys[4]), "bv": b_init(keys[5]),
        "wo": w_init(keys[6]), "bo": b_init(keys[7]),
    }

    query = jax.random.normal(keys[8], (B, S, D), dtype=jnp.float32)
    key_in = jax.random.normal(keys[9], (B, S, D), dtype=jnp.float32)
    value = jax.random.normal(keys[10], (B, S, D), dtype=jnp.float32)

    out = multi_headed_attention(query, key_in, value, params, H)
    out = jax.block_until_ready(out)
    assert out.shape == (B, S, D)
    assert out.dtype == jnp.bfloat16

    # f32 reference on the same bf16-quantized operands the kernel consumes,
    # so the comparison isolates kernel-internal error (bf16 matmul rounding,
    # approx reciprocal, bf16 output cast).
    qz = lambda a: a.astype(jnp.bfloat16).astype(jnp.float32)
    params_q = {k: (qz(v) if v.ndim == 2 else v) for k, v in params.items()}
    ref = reference(qz(query), qz(key_in), qz(value), params_q, H)

    err = float(jnp.max(jnp.abs(out.astype(jnp.float32) - ref)))
    assert jnp.allclose(out.astype(jnp.float32), ref, atol=2e-2, rtol=2e-2), (
        f"mismatch vs reference, max abs err {err}")

    print("KERNEL_OK")
</pallas_src>

<mosaic_0001>
module attributes {stable_mosaic.version = 11 : i64} {
  func.func @mha_kernel(%arg0: i32, %arg1: i32, %arg2: memref<1x128x128xbf16, #tpu.memory_space<vmem>>, %arg3: memref<1x128x128xbf16, #tpu.memory_space<vmem>>, %arg4: memref<1x128x128xbf16, #tpu.memory_space<vmem>>, %arg5: memref<128x128xbf16, #tpu.memory_space<vmem>>, %arg6: memref<1x128xf32, #tpu.memory_space<vmem>>, %arg7: memref<128x128xbf16, #tpu.memory_space<vmem>>, %arg8: memref<1x128xf32, #tpu.memory_space<vmem>>, %arg9: memref<128x128xbf16, #tpu.memory_space<vmem>>, %arg10: memref<1x128xf32, #tpu.memory_space<vmem>>, %arg11: memref<128x128xbf16, #tpu.memory_space<vmem>>, %arg12: memref<1x128xf32, #tpu.memory_space<vmem>>, %arg13: memref<1x128x128xbf16, #tpu.memory_space<vmem>>, %arg14: memref<128x128xbf16, #tpu.memory_space<vmem>>, %arg15: memref<128x128xbf16, #tpu.memory_space<vmem>>, %arg16: memref<128x128xbf16, #tpu.memory_space<vmem>>) attributes {dimension_semantics = [#tpu.dimension_semantics<parallel>, #tpu.dimension_semantics<arbitrary>], iteration_bounds = array<i64: 2, 1>, scalar_prefetch = 0 : i64, scratch_operands = 3 : i64, tpu.core_type = #tpu.core_type<tc>, window_params = [{transform_indices = @transform_0, window_bounds = array<i64: 1, 128, 128>}, {transform_indices = @transform_1, window_bounds = array<i64: 1, 128, 128>}, {transform_indices = @transform_2, window_bounds = array<i64: 1, 128, 128>}, {pipeline_mode = #tpu.pipeline_mode<synchronous>, transform_indices = @transform_3, window_bounds = array<i64: 128, 128>}, {pipeline_mode = #tpu.pipeline_mode<synchronous>, transform_indices = @transform_4, window_bounds = array<i64: 1, 128>}, {pipeline_mode = #tpu.pipeline_mode<synchronous>, transform_indices = @transform_5, window_bounds = array<i64: 128, 128>}, {pipeline_mode = #tpu.pipeline_mode<synchronous>, transform_indices = @transform_6, window_bounds = array<i64: 1, 128>}, {pipeline_mode = #tpu.pipeline_mode<synchronous>, transform_indices = @transform_7, window_bounds = array<i64: 128, 128>}, {pipeline_mode = #tpu.pipeline_mode<synchronous>, transform_indices = @transform_8, window_bounds = array<i64: 1, 128>}, {pipeline_mode = #tpu.pipeline_mode<synchronous>, transform_indices = @transform_9, window_bounds = array<i64: 128, 128>}, {pipeline_mode = #tpu.pipeline_mode<synchronous>, transform_indices = @transform_10, window_bounds = array<i64: 1, 128>}, {transform_indices = @transform_11, window_bounds = array<i64: 1, 128, 128>}]} {
    %c0_i32 = arith.constant 0 : i32
    %0 = arith.cmpi eq, %arg1, %c0_i32 : i32
    %1 = arith.extui %0 : i1 to i32
    %c0_i32_0 = arith.constant 0 : i32
    %2 = arith.cmpi ne, %1, %c0_i32_0 : i32
    scf.if %2 {
      %c0_43 = arith.constant 0 : index
      %c0_44 = arith.constant 0 : index
      %c0_45 = arith.constant 0 : index
      %97 = vector.load %arg3[%c0_43, %c0_44, %c0_45] : memref<1x128x128xbf16, #tpu.memory_space<vmem>>, vector<1x128x128xbf16>
      %98 = vector.shape_cast %97 : vector<1x128x128xbf16> to vector<128x128xbf16>
      %c0_46 = arith.constant 0 : index
      %c0_47 = arith.constant 0 : index
      %c0_48 = arith.constant 0 : index
      %99 = vector.load %arg4[%c0_46, %c0_47, %c0_48] : memref<1x128x128xbf16, #tpu.memory_space<vmem>>, vector<1x128x128xbf16>
      %100 = vector.shape_cast %99 : vector<1x128x128xbf16> to vector<128x128xbf16>
      %c0_49 = arith.constant 0 : index
      %c0_50 = arith.constant 0 : index
      %101 = vector.load %arg7[%c0_49, %c0_50] : memref<128x128xbf16, #tpu.memory_space<vmem>>, vector<128x128xbf16>
      %cst_51 = arith.constant dense<0.000000e+00> : vector<128x128xf32>
      %102 = tpu.matmul %98, %101, %cst_51 {dimension_numbers = #tpu.dot_dimension_numbers<[1], [0], [0], [1], [0, 0, 1, 1], [], []>} : vector<128x128xbf16>, vector<128x128xbf16>, vector<128x128xf32> -> vector<128x128xf32>
      %c0_52 = arith.constant 0 : index
      %c0_53 = arith.constant 0 : index
      %103 = vector.load %arg8[%c0_52, %c0_53] : memref<1x128xf32, #tpu.memory_space<vmem>>, vector<1x128xf32>
      %104 = vector.broadcast %103 : vector<1x128xf32> to vector<128x128xf32>
      %105 = arith.addf %102, %104 : vector<128x128xf32>
      %c0_54 = arith.constant 0 : index
      %c0_55 = arith.constant 0 : index
      %106 = vector.load %arg9[%c0_54, %c0_55] : memref<128x128xbf16, #tpu.memory_space<vmem>>, vector<128x128xbf16>
      %cst_56 = arith.constant dense<0.000000e+00> : vector<128x128xf32>
      %107 = tpu.matmul %100, %106, %cst_56 {dimension_numbers = #tpu.dot_dimension_numbers<[1], [0], [0], [1], [0, 0, 1, 1], [], []>} : vector<128x128xbf16>, vector<128x128xbf16>, vector<128x128xf32> -> vector<128x128xf32>
      %c0_57 = arith.constant 0 : index
      %c0_58 = arith.constant 0 : index
      %108 = vector.load %arg10[%c0_57, %c0_58] : memref<1x128xf32, #tpu.memory_space<vmem>>, vector<1x128xf32>
      %109 = vector.broadcast %108 : vector<1x128xf32> to vector<128x128xf32>
      %110 = arith.addf %107, %109 : vector<128x128xf32>
      %111 = arith.truncf %105 : vector<128x128xf32> to vector<128x128xbf16>
      %c0_59 = arith.constant 0 : index
      %c0_60 = arith.constant 0 : index
      %112 = vector.load %arg14[%c0_59, %c0_60] : memref<128x128xbf16, #tpu.memory_space<vmem>>, vector<128x128xbf16>
      tpu.vector_store %arg14[%c0_59, %c0_60], %111 {strides = array<i32>} : memref<128x128xbf16, #tpu.memory_space<vmem>>, vector<128x128xbf16>,
      %113 = arith.truncf %110 : vector<128x128xf32> to vector<128x128xbf16>
      %c0_61 = arith.constant 0 : index
      %c0_62 = arith.constant 0 : index
      %114 = vector.load %arg15[%c0_61, %c0_62] : memref<128x128xbf16, #tpu.memory_space<vmem>>, vector<128x128xbf16>
      tpu.vector_store %arg15[%c0_61, %c0_62], %113 {strides = array<i32>} : memref<128x128xbf16, #tpu.memory_space<vmem>>, vector<128x128xbf16>,
    } else {
    }
    %c0 = arith.constant 0 : index
    %c0_1 = arith.constant 0 : index
    %c0_2 = arith.constant 0 : index
    %3 = vector.load %arg2[%c0, %c0_1, %c0_2] : memref<1x128x128xbf16, #tpu.memory_space<vmem>>, vector<1x128x128xbf16>
    %4 = vector.shape_cast %3 : vector<1x128x128xbf16> to vector<128x128xbf16>
    %c0_3 = arith.constant 0 : index
    %c0_4 = arith.constant 0 : index
    %5 = vector.load %arg5[%c0_3, %c0_4] : memref<128x128xbf16, #tpu.memory_space<vmem>>, vector<128x128xbf16>
    %cst = arith.constant dense<0.000000e+00> : vector<128x128xf32>
    %6 = tpu.matmul %4, %5, %cst {dimension_numbers = #tpu.dot_dimension_numbers<[1], [0], [0], [1], [0, 0, 1, 1], [], []>} : vector<128x128xbf16>, vector<128x128xbf16>, vector<128x128xf32> -> vector<128x128xf32>
    %c0_5 = arith.constant 0 : index
    %c0_6 = arith.constant 0 : index
    %7 = vector.load %arg6[%c0_5, %c0_6] : memref<1x128xf32, #tpu.memory_space<vmem>>, vector<1x128xf32>
    %8 = vector.broadcast %7 : vector<1x128xf32> to vector<128x128xf32>
    %9 = arith.addf %6, %8 : vector<128x128xf32>
    %cst_7 = arith.constant 0.176776692 : f32
    %10 = vector.broadcast %cst_7 : f32 to vector<128x128xf32>
    %11 = arith.mulf %9, %10 : vector<128x128xf32>
    %12 = arith.truncf %11 : vector<128x128xf32> to vector<128x128xbf16>
    %c0_8 = arith.constant 0 : index
    %c0_9 = arith.constant 0 : index
    %13 = vector.load %arg14[%c0_8, %c0_9] : memref<128x128xbf16, #tpu.memory_space<vmem>>, vector<128x128xbf16>
    %c0_10 = arith.constant 0 : index
    %c0_11 = arith.constant 0 : index
    %14 = vector.load %arg15[%c0_10, %c0_11] : memref<128x128xbf16, #tpu.memory_space<vmem>>, vector<128x128xbf16>
    %15 = vector.extract_strided_slice %12 {offsets = [0, 0], sizes = [128, 32], strides = [1, 1]} : vector<128x128xbf16> to vector<128x32xbf16>
    %16 = vector.extract_strided_slice %13 {offsets = [0, 0], sizes = [128, 32], strides = [1, 1]} : vector<128x128xbf16> to vector<128x32xbf16>
    %17 = vector.extract_strided_slice %14 {offsets = [0, 0], sizes = [128, 32], strides = [1, 1]} : vector<128x128xbf16> to vector<128x32xbf16>
    %cst_12 = arith.constant dense<0.000000e+00> : vector<128x128xf32>
    %18 = tpu.matmul %15, %16, %cst_12 {dimension_numbers = #tpu.dot_dimension_numbers<[1], [1], [0], [0], [0, 0, 1, 0], [], []>} : vector<128x32xbf16>, vector<128x32xbf16>, vector<128x128xf32> -> vector<128x128xf32>
    %cst_13 = arith.constant dense<0xFF800000> : vector<128xf32>
    %19 = vector.multi_reduction <maximumf>, %18, %cst_13 [1] : vector<128x128xf32> to vector<128xf32>
    %20 = vector.shape_cast %19 : vector<128xf32> to vector<128x1xf32>
    %21 = vector.broadcast %20 : vector<128x1xf32> to vector<128x128xf32>
    %22 = arith.subf %18, %21 : vector<128x128xf32>
    %23 = math.exp %22 : vector<128x128xf32>
    %cst_14 = arith.constant dense<0.000000e+00> : vector<128xf32>
    %24 = vector.multi_reduction <add>, %23, %cst_14 [1] : vector<128x128xf32> to vector<128xf32>
    %25 = vector.shape_cast %24 : vector<128xf32> to vector<128x1xf32>
    %26 = tpu.reciprocal %25 {approx = true} : vector<128x1xf32> -> vector<128x1xf32>
    %27 = vector.broadcast %26 : vector<128x1xf32> to vector<128x128xf32>
    %28 = arith.mulf %23, %27 : vector<128x128xf32>
    %29 = arith.truncf %28 : vector<128x128xf32> to vector<128x128xbf16>
    %cst_15 = arith.constant dense<0.000000e+00> : vector<128x32xf32>
    %30 = tpu.matmul %29, %17, %cst_15 {dimension_numbers = #tpu.dot_dimension_numbers<[1], [0], [0], [1], [0, 0, 1, 1], [], []>} : vector<128x128xbf16>, vector<128x32xbf16>, vector<128x32xf32> -> vector<128x32xf32>
    %31 = arith.truncf %30 : vector<128x32xf32> to vector<128x32xbf16>
    %c0_16 = arith.constant 0 : index
    %c0_17 = arith.constant 0 : index
    %32 = vector.load %arg16[%c0_16, %c0_17] : memref<128x128xbf16, #tpu.memory_space<vmem>>, vector<128x32xbf16>
    tpu.vector_store %arg16[%c0_16, %c0_17], %31 {strides = array<i32>} : memref<128x128xbf16, #tpu.memory_space<vmem>>, vector<128x32xbf16>,
    %33 = vector.extract_strided_slice %12 {offsets = [0, 32], sizes = [128, 32], strides = [1, 1]} : vector<128x128xbf16> to vector<128x32xbf16>
    %34 = vector.extract_strided_slice %13 {offsets = [0, 32], sizes = [128, 32], strides = [1, 1]} : vector<128x128xbf16> to vector<128x32xbf16>
    %35 = vector.extract_strided_slice %14 {offsets = [0, 32], sizes = [128, 32], strides = [1, 1]} : vector<128x128xbf16> to vector<128x32xbf16>
    %cst_18 = arith.constant dense<0.000000e+00> : vector<128x128xf32>
    %36 = tpu.matmul %33, %34, %cst_18 {dimension_numbers = #tpu.dot_dimension_numbers<[1], [1], [0], [0], [0, 0, 1, 0], [], []>} : vector<128x32xbf16>, vector<128x32xbf16>, vector<128x128xf32> -> vector<128x128xf32>
    %cst_19 = arith.constant dense<0xFF800000> : vector<128xf32>
    %37 = vector.multi_reduction <maximumf>, %36, %cst_19 [1] : vector<128x128xf32> to vector<128xf32>
    %38 = vector.shape_cast %37 : vector<128xf32> to vector<128x1xf32>
    %39 = vector.broadcast %38 : vector<128x1xf32> to vector<128x128xf32>
    %40 = arith.subf %36, %39 : vector<128x128xf32>
    %41 = math.exp %40 : vector<128x128xf32>
    %cst_20 = arith.constant dense<0.000000e+00> : vector<128xf32>
    %42 = vector.multi_reduction <add>, %41, %cst_20 [1] : vector<128x128xf32> to vector<128xf32>
    %43 = vector.shape_cast %42 : vector<128xf32> to vector<128x1xf32>
    %44 = tpu.reciprocal %43 {approx = true} : vector<128x1xf32> -> vector<128x1xf32>
    %45 = vector.broadcast %44 : vector<128x1xf32> to vector<128x128xf32>
    %46 = arith.mulf %41, %45 : vector<128x128xf32>
    %47 = arith.truncf %46 : vector<128x128xf32> to vector<128x128xbf16>
    %cst_21 = arith.constant dense<0.000000e+00> : vector<128x32xf32>
    %48 = tpu.matmul %47, %35, %cst_21 {dimension_numbers = #tpu.dot_dimension_numbers<[1], [0], [0], [1], [0, 0, 1, 1], [], []>} : vector<128x128xbf16>, vector<128x32xbf16>, vector<128x32xf32> -> vector<128x32xf32>
    %49 = arith.truncf %48 : vector<128x32xf32> to vector<128x32xbf16>
    %c0_22 = arith.constant 0 : index
    %c32 = arith.constant 32 : index
    %50 = vector.load %arg16[%c0_22, %c32] : memref<128x128xbf16, #tpu.memory_space<vmem>>, vector<128x32xbf16>
    tpu.vector_store %arg16[%c0_22, %c32], %49 {strides = array<i32>} : memref<128x128xbf16, #tpu.memory_space<vmem>>, vector<128x32xbf16>,
    %51 = vector.extract_strided_slice %12 {offsets = [0, 64], sizes = [128, 32], strides = [1, 1]} : vector<128x128xbf16> to vector<128x32xbf16>
    %52 = vector.extract_strided_slice %13 {offsets = [0, 64], sizes = [128, 32], strides = [1, 1]} : vector<128x128xbf16> to vector<128x32xbf16>
    %53 = vector.extract_strided_slice %14 {offsets = [0, 64], sizes = [128, 32], strides = [1, 1]} : vector<128x128xbf16> to vector<128x32xbf16>
    %cst_23 = arith.constant dense<0.000000e+00> : vector<128x128xf32>
    %54 = tpu.matmul %51, %52, %cst_23 {dimension_numbers = #tpu.dot_dimension_numbers<[1], [1], [0], [0], [0, 0, 1, 0], [], []>} : vector<128x32xbf16>, vector<128x32xbf16>, vector<128x128xf32> -> vector<128x128xf32>
    %cst_24 = arith.constant dense<0xFF800000> : vector<128xf32>
    %55 = vector.multi_reduction <maximumf>, %54, %cst_24 [1] : vector<128x128xf32> to vector<128xf32>
    %56 = vector.shape_cast %55 : vector<128xf32> to vector<128x1xf32>
    %57 = vector.broadcast %56 : vector<128x1xf32> to vector<128x128xf32>
    %58 = arith.subf %54, %57 : vector<128x128xf32>
    %59 = math.exp %58 : vector<128x128xf32>
    %cst_25 = arith.constant dense<0.000000e+00> : vector<128xf32>
    %60 = vector.multi_reduction <add>, %59, %cst_25 [1] : vector<128x128xf32> to vector<128xf32>
    %61 = vector.shape_cast %60 : vector<128xf32> to vector<128x1xf32>
    %62 = tpu.reciprocal %61 {approx = true} : vector<128x1xf32> -> vector<128x1xf32>
    %63 = vector.broadcast %62 : vector<128x1xf32> to vector<128x128xf32>
    %64 = arith.mulf %59, %63 : vector<128x128xf32>
    %65 = arith.truncf %64 : vector<128x128xf32> to vector<128x128xbf16>
    %cst_26 = arith.constant dense<0.000000e+00> : vector<128x32xf32>
    %66 = tpu.matmul %65, %53, %cst_26 {dimension_numbers = #tpu.dot_dimension_numbers<[1], [0], [0], [1], [0, 0, 1, 1], [], []>} : vector<128x128xbf16>, vector<128x32xbf16>, vector<128x32xf32> -> vector<128x32xf32>
    %67 = arith.truncf %66 : vector<128x32xf32> to vector<128x32xbf16>
    %c0_27 = arith.constant 0 : index
    %c64 = arith.constant 64 : index
    %68 = vector.load %arg16[%c0_27, %c64] : memref<128x128xbf16, #tpu.memory_space<vmem>>, vector<128x32xbf16>
    tpu.vector_store %arg16[%c0_27, %c64], %67 {strides = array<i32>} : memref<128x128xbf16, #tpu.memory_space<vmem>>, vector<128x32xbf16>,
    %69 = vector.extract_strided_slice %12 {offsets = [0, 96], sizes = [128, 32], strides = [1, 1]} : vector<128x128xbf16> to vector<128x32xbf16>
    %70 = vector.extract_strided_slice %13 {offsets = [0, 96], sizes = [128, 32], strides = [1, 1]} : vector<128x128xbf16> to vector<128x32xbf16>
    %71 = vector.extract_strided_slice %14 {offsets = [0, 96], sizes = [128, 32], strides = [1, 1]} : vector<128x128xbf16> to vector<128x32xbf16>
    %cst_28 = arith.constant dense<0.000000e+00> : vector<128x128xf32>
    %72 = tpu.matmul %69, %70, %cst_28 {dimension_numbers = #tpu.dot_dimension_numbers<[1], [1], [0], [0], [0, 0, 1, 0], [], []>} : vector<128x32xbf16>, vector<128x32xbf16>, vector<128x128xf32> -> vector<128x128xf32>
    %cst_29 = arith.constant dense<0xFF800000> : vector<128xf32>
    %73 = vector.multi_reduction <maximumf>, %72, %cst_29 [1] : vector<128x128xf32> to vector<128xf32>
    %74 = vector.shape_cast %73 : vector<128xf32> to vector<128x1xf32>
    %75 = vector.broadcast %74 : vector<128x1xf32> to vector<128x128xf32>
    %76 = arith.subf %72, %75 : vector<128x128xf32>
    %77 = math.exp %76 : vector<128x128xf32>
    %cst_30 = arith.constant dense<0.000000e+00> : vector<128xf32>
    %78 = vector.multi_reduction <add>, %77, %cst_30 [1] : vector<128x128xf32> to vector<128xf32>
    %79 = vector.shape_cast %78 : vector<128xf32> to vector<128x1xf32>
    %80 = tpu.reciprocal %79 {approx = true} : vector<128x1xf32> -> vector<128x1xf32>
    %81 = vector.broadcast %80 : vector<128x1xf32> to vector<128x128xf32>
    %82 = arith.mulf %77, %81 : vector<128x128xf32>
    %83 = arith.truncf %82 : vector<128x128xf32> to vector<128x128xbf16>
    %cst_31 = arith.constant dense<0.000000e+00> : vector<128x32xf32>
    %84 = tpu.matmul %83, %71, %cst_31 {dimension_numbers = #tpu.dot_dimension_numbers<[1], [0], [0], [1], [0, 0, 1, 1], [], []>} : vector<128x128xbf16>, vector<128x32xbf16>, vector<128x32xf32> -> vector<128x32xf32>
    %85 = arith.truncf %84 : vector<128x32xf32> to vector<128x32xbf16>
    %c0_32 = arith.constant 0 : index
    %c96 = arith.constant 96 : index
    %86 = vector.load %arg16[%c0_32, %c96] : memref<128x128xbf16, #tpu.memory_space<vmem>>, vector<128x32xbf16>
    tpu.vector_store %arg16[%c0_32, %c96], %85 {strides = array<i32>} : memref<128x128xbf16, #tpu.memory_space<vmem>>, vector<128x32xbf16>,
    %c0_33 = arith.constant 0 : index
    %c0_34 = arith.constant 0 : index
    %87 = vector.load %arg16[%c0_33, %c0_34] : memref<128x128xbf16, #tpu.memory_space<vmem>>, vector<128x128xbf16>
    %c0_35 = arith.constant 0 : index
    %c0_36 = arith.constant 0 : index
    %88 = vector.load %arg11[%c0_35, %c0_36] : memref<128x128xbf16, #tpu.memory_space<vmem>>, vector<128x128xbf16>
    %cst_37 = arith.constant dense<0.000000e+00> : vector<128x128xf32>
    %89 = tpu.matmul %87, %88, %cst_37 {dimension_numbers = #tpu.dot_dimension_numbers<[1], [0], [0], [1], [0, 0, 1, 1], [], []>} : vector<128x128xbf16>, vector<128x128xbf16>, vector<128x128xf32> -> vector<128x128xf32>
    %c0_38 = arith.constant 0 : index
    %c0_39 = arith.constant 0 : index
    %90 = vector.load %arg12[%c0_38, %c0_39] : memref<1x128xf32, #tpu.memory_space<vmem>>, vector<1x128xf32>
    %91 = vector.broadcast %90 : vector<1x128xf32> to vector<128x128xf32>
    %92 = arith.addf %89, %91 : vector<128x128xf32>
    %93 = arith.truncf %92 : vector<128x128xf32> to vector<128x128xbf16>
    %c0_40 = arith.constant 0 : index
    %c0_41 = arith.constant 0 : index
    %c0_42 = arith.constant 0 : index
    %94 = vector.load %arg13[%c0_40, %c0_41, %c0_42] : memref<1x128x128xbf16, #tpu.memory_space<vmem>>, vector<1x128x128xbf16>
    %95 = vector.shape_cast %94 : vector<1x128x128xbf16> to vector<128x128xbf16>
    %96 = vector.shape_cast %93 : vector<128x128xbf16> to vector<1x128x128xbf16>
    tpu.vector_store %arg13[%c0_40, %c0_41, %c0_42], %96 {strides = array<i32>} : memref<1x128x128xbf16, #tpu.memory_space<vmem>>, vector<1x128x128xbf16>,
    return
  }
  func.func @transform_0(%arg0: i32, %arg1: i32) -> (i32, i32, i32) {
    %c0_i32 = arith.constant 0 : i32
    %c0_i32_0 = arith.constant 0 : i32
    return %arg0, %arg1, %c0_i32 : i32, i32, i32
  }
  func.func @transform_1(%arg0: i32, %arg1: i32) -> (i32, i32, i32) {
    %c0_i32 = arith.constant 0 : i32
    %c0_i32_0 = arith.constant 0 : i32
    %c0_i32_1 = arith.constant 0 : i32
    return %arg0, %c0_i32, %c0_i32_0 : i32, i32, i32
  }
  func.func @transform_2(%arg0: i32, %arg1: i32) -> (i32, i32, i32) {
    %c0_i32 = arith.constant 0 : i32
    %c0_i32_0 = arith.constant 0 : i32
    %c0_i32_1 = arith.constant 0 : i32
    return %arg0, %c0_i32, %c0_i32_0 : i32, i32, i32
  }
  func.func @transform_3(%arg0: i32, %arg1: i32) -> (i32, i32) {
    %c0_i32 = arith.constant 0 : i32
    %c0_i32_0 = arith.constant 0 : i32
    %c0_i32_1 = arith.constant 0 : i32
    return %c0_i32, %c0_i32_0 : i32, i32
  }
  func.func @transform_4(%arg0: i32, %arg1: i32) -> (i32, i32) {
    %c0_i32 = arith.constant 0 : i32
    %c0_i32_0 = arith.constant 0 : i32
    %c0_i32_1 = arith.constant 0 : i32
    return %c0_i32, %c0_i32_0 : i32, i32
  }
  func.func @transform_5(%arg0: i32, %arg1: i32) -> (i32, i32) {
    %c0_i32 = arith.constant 0 : i32
    %c0_i32_0 = arith.constant 0 : i32
    %c0_i32_1 = arith.constant 0 : i32
    return %c0_i32, %c0_i32_0 : i32, i32
  }
  func.func @transform_6(%arg0: i32, %arg1: i32) -> (i32, i32) {
    %c0_i32 = arith.constant 0 : i32
    %c0_i32_0 = arith.constant 0 : i32
    %c0_i32_1 = arith.constant 0 : i32
    return %c0_i32, %c0_i32_0 : i32, i32
  }
  func.func @transform_7(%arg0: i32, %arg1: i32) -> (i32, i32) {
    %c0_i32 = arith.constant 0 : i32
    %c0_i32_0 = arith.constant 0 : i32
    %c0_i32_1 = arith.constant 0 : i32
    return %c0_i32, %c0_i32_0 : i32, i32
  }
  func.func @transform_8(%arg0: i32, %arg1: i32) -> (i32, i32) {
    %c0_i32 = arith.constant 0 : i32
    %c0_i32_0 = arith.constant 0 : i32
    %c0_i32_1 = arith.constant 0 : i32
    return %c0_i32, %c0_i32_0 : i32, i32
  }
  func.func @transform_9(%arg0: i32, %arg1: i32) -> (i32, i32) {
    %c0_i32 = arith.constant 0 : i32
    %c0_i32_0 = arith.constant 0 : i32
    %c0_i32_1 = arith.constant 0 : i32
    return %c0_i32, %c0_i32_0 : i32, i32
  }
  func.func @transform_10(%arg0: i32, %arg1: i32) -> (i32, i32) {
    %c0_i32 = arith.constant 0 : i32
    %c0_i32_0 = arith.constant 0 : i32
    %c0_i32_1 = arith.constant 0 : i32
    return %c0_i32, %c0_i32_0 : i32, i32
  }
  func.func @transform_11(%arg0: i32, %arg1: i32) -> (i32, i32, i32) {
    %c0_i32 = arith.constant 0 : i32
    %c0_i32_0 = arith.constant 0 : i32
    return %arg0, %arg1, %c0_i32 : i32, i32, i32
  }
}

</mosaic_0001>

<bundles_post_ra>
// kernel: tpu_custom_call.1
= control target key start
LH: loop header
LB: loop body
LE: loop exit
PB: predicated region body
PF: predicated region fallthrough
CT: control target
= control target key end

     0   :  { %s6381_s0 = inlined_call_operand.hbm [shape: bf16[2,128,128], index: 0, kind: input, shape index: {}]   ;;  %s6382_s1 = inlined_call_operand.hbm [shape: bf16[2,128,128], index: 1, kind: input, shape index: {}]   ;;  %s6383_s2 = inlined_call_operand.hbm [shape: bf16[2,128,128], index: 2, kind: input, shape index: {}]   ;;  %s6384_s3 = inlined_call_operand.hbm [shape: bf16[128,128], index: 3, kind: input, shape index: {}]   ;;  %s6385_s4 = inlined_call_operand.vmem [shape: f32[1,128], index: 4, kind: input, shape index: {}]   ;;  %s6386_s5 = inlined_call_operand.hbm [shape: bf16[128,128], index: 5, kind: input, shape index: {}]   ;;  %s6387_s6 = inlined_call_operand.vmem [shape: f32[1,128], index: 6, kind: input, shape index: {}]   ;;  %s6388_s7 = inlined_call_operand.hbm [shape: bf16[128,128], index: 7, kind: input, shape index: {}]   ;;  %s6389_s8 = inlined_call_operand.vmem [shape: f32[1,128], index: 8, kind: input, shape index: {}]   ;;  %s6390_s9 = inlined_call_operand.hbm [shape: bf16[128,128], index: 9, kind: input, shape index: {}]   ;;  %s6391_s10 = inlined_call_operand.vmem [shape: f32[1,128], index: 10, kind: input, shape index: {}]   ;;  %s6392_s11 = inlined_call_operand.hbm [shape: bf16[2,128,128], index: 11, kind: output, shape index: {}]  }
   0x1   :  { %6410 = sst [smem:[#allocation34_spill]] %s6381_s0 }
   0x2   :  { %6411 = sst [smem:[#allocation35_spill]] %s6382_s1 }
   0x3   :  { %6412 = sst [smem:[#allocation36_spill]] %s6384_s3 }
   0x4   :  { %6413 = sst [smem:[#allocation37_spill]] %s6386_s5 }
   0x5   :  { %6414 = sst [smem:[#allocation38_spill]] %s6388_s7 }
   0x6   :  { %6415 = sst [smem:[#allocation39_spill]] %s6392_s11 }
   0x7   :  { %16 = vsyncpa [#allocation6], 0 }
   0x8   :  { %18 = vsyncpa [#allocation6 + $0x1], 0 }
   0x9   :  { %19 = vsyncpa [#allocation9], 0 }
   0xa   :  { %21 = vsyncpa [#allocation9 + $0x1], 0 }
   0xb   :  { %22 = vsyncpa [#allocation12], 0 }
   0xc   :  { %23 = vsyncpa [#allocation15], 0 }
   0xd   :  { %24 = vsyncpa [#allocation7], 0 }
   0xe   :  { %26 = vsyncpa [#allocation7 + $0x1], 0  ;;  %s4835_s17 = smov 0   ;;  %s4837_s18 = smov 0  }
   0xf   :  { %s4839_s19 = smov 0   ;;  %s4841_s20 = smov 0  }
  0x10   :  { %s4843_s21 = smov 0   ;;  %s4845_s22 = smov 0  }
  0x11 LB: > { %6416 = sst [smem:[#allocation23_spill]] %s4743_s17  ;;  %s4866_s23 = sadd.s32 4294967295, %s4763_s22   ;;  %s4763_s22 = sphi %s4845_s22, %s32_s22   ;;  %s4759_s21 = sphi %s4843_s21, %s6453_s21   ;;  %s4755_s20 = sphi %s4841_s20, %s6452_s20   ;;  %s4751_s19 = sphi %s4839_s19, %s6456_s19   ;;  %s4747_s18 = sphi %s4837_s18, %s6455_s18   ;;  %s4743_s17 = sphi %s4835_s17, %s6454_s17  }
  0x12   : > { %6417 = sst [smem:[#allocation24_spill]] %s4755_s20  ;;  %s3462_s24 = sadd.s32 4294967294, %s4763_s22  }
  0x13   : > { %6418 = sst [smem:[#allocation25_spill]] %s4759_s21  ;;  %p66_p0 = scmp.ne.s32.totalorder %s4747_s18, %s4743_s17 }
  0x14   : > { %6419 = sst [smem:[#allocation26_spill]] %s4763_s22  ;;  %p67_p1 = scmp.eq.s32.totalorder %s4866_s23, 0 }
  0x15   : > { %p312_p2 = scmp.eq.s32.totalorder %s4866_s23, 1  ;;  %p318_p3 = scmp.eq.s32.totalorder %s3462_s24, 1 }
  0x16   : > { %p4875_p4 = por %p67_p1, %p66_p0  ;;  %p3463_p5 = scmp.ge.s32.totalorder %s4763_s22, 1 }
  0x17   : > { %p4880_p6 = por %p318_p3, %p66_p0  ;;  %p325_p7 = scmp.lt.s32.totalorder %s4763_s22, 3 }
  0x18   : > { %s6423_s3 = sld [smem:[#allocation36_spill]]  ;;  %s4765_s12 = smov [#allocation11]  }
  0x19   : > { %s6421_s26 = scalar_select %p4880_p6, 1, 0 }
  0x1a   : > { %p4888_p8 = pnand %p3463_p5, %p325_p7  ;;  %s338_s13 = sshll.u32 %s4765_s12, 4  ;;  %s339_s13 = int_to_ptr.vmem [resolvable:$true] %s338_s13 }
  0x1b   : > { %6422 = sst [smem:[#allocation27_spill]] %s6421_s26  ;;  %s6393_s27 = smov 64  }
  0x1c   : > { %p4101_p9 = pneg %p4888_p8  ;;  %s6426_s7 = sld [smem:[#allocation38_spill]] }
  0x1d   : > { %s6395_s28 = smov 4   ;;  %s4768_s12 = smov [#allocation14]  }
  0x1e   : > { %s336_s29 = sshll.u32 %s6423_s3, 4  ;;  %p4896_p10 = pnand %p4101_p9, %p67_p1  ;;  %s337_s29 = int_to_ptr.hbm [resolvable:$true] %s336_s29 }
  0x1f   : > { %s372_s3 = sshll.u32 %s4768_s12, 4  ;;  %s44_s15 = sadd.s32 1, %s4759_s21  ;;  %s373_s3 = int_to_ptr.vmem [resolvable:$true] %s372_s3 }
  0x20   : > { %4104 = dma.hbm_to_vmem [thread:$0]  (!%p4896_p10), %s337_s29, 1024, %s339_s13, [#allocation12], %s6393_s27, %s6393_s27, %s6395_s28  }
  0x21   : > { %s53_s16 = sadd.s32 1, %s4751_s19  ;;  %p46_p12 = scmp.ge.s32.totalorder %s44_s15, 2 }
  0x22   : > { %s370_s24 = sshll.u32 %s6426_s7, 4  ;;  %p60_p13 = scmp.ne.s32.totalorder %s4751_s19, %s4747_s18  ;;  %s371_s24 = int_to_ptr.hbm [resolvable:$true] %s370_s24 }
  0x23   : > { %4110 = dma.hbm_to_vmem [thread:$0]  (!%p4896_p10), %s371_s24, 1024, %s373_s3, [#allocation15], %s6393_s27, %s6393_s27, %s6395_s28  }
  0x24   : > { %p61_p0 = scmp.eq.s32.totalorder %s4763_s22, 0  ;;  %p4132_p3 = scmp.lt.s32.totalorder %s4763_s22, 2 }
  0x25   : > { %s6458_s15 = smov (%p46_p12, %s44_s15), 0  ;;  %p4924_p7 = por %p312_p2, %p60_p13 }
  0x26   : > { %6427 = sst [smem:[#allocation28_spill]] %s6458_s15  ;;  %p62_p5 = por %p61_p0, %p60_p13 }
  0x27   : > { %s6428_s29 = scalar_select %p4924_p7, 1, 0 }
  0x28   : > { %s48_s13 = ssub.s32 %s4759_s21, %s6458_s15  ;;  %s6400_s12 = sand.u32 1, %s4751_s19  }
  0x29   : > { %6429 = sst [smem:[#allocation29_spill]] %s6428_s29  ;;  %p51_p9 = scmp.eq.s32.totalorder %s48_s13, 0 }
  0x2a   : > { %s4933_s3 = sshll.u32 %s6400_s12, 6  ;;  %s4936_s24 = sshll.u32 %s4759_s21, 6 }
  0x2b   : > { %p4938_p11 = pnand %p4132_p3, %p62_p5  ;;  %s430_s7 = sand.u32 1, %s4763_s22  }
  0x2c   : > { %s4943_s28 = scalar_select %p51_p9, %s4751_s19, %s53_s16  }
  0x2d   : > { %s6432_s1 = sld [smem:[#allocation35_spill]]  ;;  %s434_s15 = scalar_lea.vmem [#allocation8], %s4933_s3 }
  0x2e   : > { %6431 = sst [smem:[#allocation30_spill]] %s4943_s28  ;;  %s442_s12 = sshll.u32 %s434_s15, 4  ;;  %s443_s12 = int_to_ptr.vmem [resolvable:$true] %s442_s12 }
  0x2f   : > { %s6433_s5 = sld [smem:[#allocation37_spill]]  ;;  %s4954_s16 = scalar_lea.sflag [#allocation9], %s430_s7 }
  0x30   : > { %s6434_s28 = smov 4   ;;  %s6435_s22 = smov 64  }
  0x31   : > { %s4769_s17 = smov [#allocation13]   ;;  %s4770_s7 = smov [#allocation16]  }
  0x32   : > { %s355_s26 = sshll.u32 %s4769_s17, 4  ;;  %s389_s11 = sshll.u32 %s4770_s7, 4  ;;  %s356_s26 = int_to_ptr.vmem [resolvable:$true] %s355_s26  ;;  %s390_s11 = int_to_ptr.vmem [resolvable:$true] %s389_s11 }
  0x33   : > { %s439_s13 = scalar_lea.hbm %s6432_s1, %s4936_s24  ;;  %s387_s1 = sshll.u32 %s6390_s9, 4  ;;  %s388_s1 = int_to_ptr.hbm [resolvable:$true] %s387_s1 }
  0x34   : > { %s440_s29 = sshll.u32 %s439_s13, 4  ;;  %s6436_s0 = sld [smem:[#allocation34_spill]]  ;;  %s441_s29 = int_to_ptr.hbm [resolvable:$true] %s440_s29 }
  0x35   : > { %s353_s20 = sshll.u32 %s6433_s5, 4  ;;  %s410_s15 = scalar_lea.vmem [#allocation5], %s4933_s3  ;;  %s354_s20 = int_to_ptr.hbm [resolvable:$true] %s353_s20 }
  0x36   : > { %4120 = dma.hbm_to_vmem [thread:$0]  (!%p4938_p11), %s441_s29, 1024, %s443_s12, %s4954_s16, %s6435_s22, %s6435_s22, %s6434_s28  }
  0x37   : > { %4107 = dma.hbm_to_vmem [thread:$0]  (!%p4896_p10), %s354_s20, 1024, %s356_s26, [#allocation12], %s6435_s22, %s6435_s22, %s6434_s28  }
  0x38   : > { %4113 = dma.hbm_to_vmem [thread:$0]  (!%p4896_p10), %s388_s1, 1024, %s390_s11, [#allocation15], %s6435_s22, %s6435_s22, %s6434_s28  }
  0x39   : > { %s420_s13 = sshll.u32 %s410_s15, 4  ;;  %s6437_s20 = sand.u32 1, %s4751_s19   ;;  %s421_s13 = int_to_ptr.vmem [resolvable:$true] %s420_s13 }
  0x3a   : > { %s417_s12 = scalar_lea.hbm %s6436_s0, %s4936_s24  ;;  %s407_s26 = scalar_lea.sflag [#allocation6], %s6437_s20 }
  0x3b   : > { %s418_s17 = sshll.u32 %s417_s12, 4  ;;  %s461_s14 = scalar_lea.hbm %s6383_s2, %s4936_s24  ;;  %s419_s17 = int_to_ptr.hbm [resolvable:$true] %s418_s17 }
  0x3c   : > { %4117 = dma.hbm_to_vmem [thread:$0]  (!%p4938_p11), %s419_s17, 1024, %s421_s13, %s407_s26, %s6435_s22, %s6435_s22, %s6434_s28  }
  0x3d   : > { %s462_s29 = sshll.u32 %s461_s14, 4  ;;  %s456_s0 = scalar_lea.vmem [#allocation10], %s4933_s3  ;;  %s463_s29 = int_to_ptr.hbm [resolvable:$true] %s462_s29 }
  0x3e   : > { %s464_s5 = sshll.u32 %s456_s0, 4  ;;  %476 = sbr.rel (%p4888_p8) target bundleno = 1888 (0x760), region = 64  ;;  %s465_s5 = int_to_ptr.vmem [resolvable:$true] %s464_s5 }
  0x3f   : > { %4123 = dma.hbm_to_vmem [thread:$0]  (!%p4938_p11), %s463_s29, 1024, %s465_s5, %s4954_s16, %s6435_s22, %s6435_s22, %s6434_s28  }
  0x43   : > { %s5001_s1 = sand.u32 1, %s4747_s18  }
  0x44   : > { %s5004_s24 = sshll.u32 %s5001_s1, 6  ;;  %s479_s0 = scalar_lea.sflag [#allocation6], %s5001_s1 }
  0x45   : > { %s5008_s3 = scalar_lea.vmem [#allocation5], %s5004_s24 }
  0x46   : > { %4722 = dma.done.wait (%p4875_p4), %s479_s0, 1024  }
  0x47   : > { %4724 = vsyncadd (%p4875_p4), %s479_s0, 4294966272  ;;  %s488_s5 = sand.u32 1, %s4866_s23   ;;  %s5016_s30 = scalar_lea.vmem [#allocation8], %s5004_s24 }
  0x48   : > { %s489_s22 = scalar_lea.sflag [#allocation9], %s488_s5 }
  0x49   : > { %4726 = dma.done.wait (%p4875_p4), %s489_s22, 2048  }
  0x4a   : > { %4728 = vsyncadd (%p4875_p4), %s489_s22, 4294965248  ;;  %s5023_s27 = scalar_lea.vmem [#allocation10], %s5004_s24 }
  0x4b   : > { %4730 = dma.done.wait (%p67_p1), [#allocation12], 2048  }
  0x4c   : > { %4732 = vsyncadd (%p67_p1), [#allocation12], 4294965248 }
  0x4d   : > { %4734 = dma.done.wait (%p67_p1), [#allocation15], 2048  }
  0x4e   : > { %4736 = vsyncadd (%p67_p1), [#allocation15], 4294965248  ;;  %v3870_v0 = vld [vmem:[#allocation13 + $0x38] sm:$0xff]  ;;  %v3869_v3 = vld [vmem:[#allocation13 + $0x30] sm:$0xff]  ;;  %s4771_s17 = smov 64   ;;  %s4772_s15 = smov 96  }
  0x4f   : > { %v3878_v1 = vld [vmem:[#allocation14 + $0x38] sm:$0xff]  ;;  %726 = vmatpush.bf16.msra.mxu0 %v3870_v0  ;;  %v3877_v4 = vld [vmem:[#allocation14 + $0x30] sm:$0xff]  ;;  %v3868_v6 = vld [vmem:[#allocation13 + $0x28] sm:$0xff]  ;;  %s4773_s13 = smov 32   ;;  %vm1329_vm0 = vcmask 261120   ;;  %vm1692_vm1 = vcmask 257024  }
  0x50   : > { %v3894_v2 = vld [vmem:[#allocation11 + $0x38] sm:$0xff]  ;;  %891 = vmatpush.bf16.msra.mxu1 %v3878_v1  ;;  %v3893_v5 = vld [vmem:[#allocation11 + $0x30] sm:$0xff]  ;;  %v3876_v7 = vld [vmem:[#allocation14 + $0x28] sm:$0xff]  ;;  %vm2143_vm2 = vcmask 519424   ;;  %vm2594_vm3 = vcmask 781824   ;;  %vm3045_vm4 = vcmask 1044224  }
  0x51   : > { %1136 = vmatpush.bf16.msra.mxu2 %v3894_v2  ;;  %v3892_v8 = vld [vmem:[#allocation11 + $0x28] sm:$0xff]  ;;  %v3867_v9 = vld [vmem:[#allocation13 + $0x20] sm:$0xff]  ;;  %v3866_v12 = vld [vmem:[#allocation13 + $0x18] sm:$0xff]  ;;  %s6305_s7 = scalar_lea.vmem [#allocation17], %s5004_s24  ;;  %s6444_s21 = sld [smem:[#allocation24_spill]] }
  0x52   : > { %v3875_v10 = vld [vmem:[#allocation14 + $0x20] sm:$0xff]  ;;  %v3874_v13 = vld [vmem:[#allocation14 + $0x18] sm:$0xff]  ;;  %v3865_v15 = vld [vmem:[#allocation13 + $0x10] sm:$0xff]  ;;  %s6445_s0 = sld [smem:[#allocation39_spill]]  ;;  %s3290_s5 = sshll.u32 %s6305_s7, 4  ;;  %s3291_s5 = int_to_ptr.vmem [resolvable:$true] %s3290_s5 }
  0x53   : > { %727 = vmatpush.bf16.msra.mxu0 %v3869_v3  ;;  %v3891_v11 = vld [vmem:[#allocation11 + $0x20] sm:$0xff]  ;;  %v3890_v14 = vld [vmem:[#allocation11 + $0x18] sm:$0xff]  ;;  %v3873_v16 = vld [vmem:[#allocation14 + $0x10] sm:$0xff] }
  0x54   : > { %892 = vmatpush.bf16.msra.mxu1 %v3877_v4  ;;  %v3889_v17 = vld [vmem:[#allocation11 + $0x10] sm:$0xff]  ;;  %v3864_v18 = vld [vmem:[#allocation13 + $0x8] sm:$0xff]  ;;  %v3863_v21 = vld [vmem:[#allocation13] sm:$0xff] }
  0x55   : > { %1137 = vmatpush.bf16.msra.mxu2 %v3893_v5  ;;  %v3872_v19 = vld [vmem:[#allocation14 + $0x8] sm:$0xff]  ;;  %v3871_v22 = vld [vmem:[#allocation14] sm:$0xff]  ;;  %v3849_v30 = vld [vmem:[%s5016_s30 + $0x10] sm:$0xff] }
  0x56   : > { %v3888_v20 = vld [vmem:[#allocation11 + $0x8] sm:$0xff]  ;;  %v3887_v23 = vld [vmem:[#allocation11] sm:$0xff]  ;;  %v3857_v31 = vld [vmem:[%s5023_s27 + $0x10] sm:$0xff] }
  0x57   : > { %728 = vmatpush.bf16.msra.mxu0 %v3868_v6  ;;  %v3847_v24 = vld [vmem:[%s5016_s30] sm:$0xff]  ;;  %v3848_v27 = vld [vmem:[%s5016_s30 + $0x8] sm:$0xff]  ;;  %v3881_v32 = vld [vmem:[%s5008_s3 + $0x10] sm:$0xff]  ;;  %s3927_s14 = sshll.u32 %s6444_s21, 6 }
  0x58   : > { %893 = vmatpush.bf16.msra.mxu1 %v3876_v7  ;;  %v3855_v25 = vld [vmem:[%s5023_s27] sm:$0xff]  ;;  %v3856_v28 = vld [vmem:[%s5023_s27 + $0x8] sm:$0xff]  ;;  %v3850_v33 = vld [vmem:[%s5016_s30 + $0x18] sm:$0xff]  ;;  %s4689_s11 = scalar_lea.hbm %s6445_s0, 128 }
  0x59   : > { %1138 = vmatpush.bf16.msra.mxu2 %v3892_v8  ;;  %v3879_v26 = vld [vmem:[%s5008_s3] sm:$0xff]  ;;  %v3880_v29 = vld [vmem:[%s5008_s3 + $0x8] sm:$0xff]  ;;  %v3858_v34 = vld [vmem:[%s5023_s27 + $0x18] sm:$0xff] }
  0x5a   : > { %v3882_v35 = vld [vmem:[%s5008_s3 + $0x18] sm:$0xff]  ;;  %v3851_v36 = vld [vmem:[%s5016_s30 + $0x20] sm:$0xff]  ;;  %v3852_v39 = vld [vmem:[%s5016_s30 + $0x28] sm:$0xff] }
  0x5b   : > { %729 = vmatpush.bf16.msra.mxu0 %v3867_v9  ;;  %v3859_v37 = vld [vmem:[%s5023_s27 + $0x20] sm:$0xff]  ;;  %v3860_v40 = vld [vmem:[%s5023_s27 + $0x28] sm:$0xff]  ;;  %v3853_v42 = vld [vmem:[%s5016_s30 + $0x30] sm:$0xff] }
  0x5c   : > { %894 = vmatpush.bf16.msra.mxu1 %v3875_v10  ;;  %v3883_v38 = vld [vmem:[%s5008_s3 + $0x20] sm:$0xff]  ;;  %v3884_v41 = vld [vmem:[%s5008_s3 + $0x28] sm:$0xff]  ;;  %v3861_v43 = vld [vmem:[%s5023_s27 + $0x30] sm:$0xff] }
  0x5d   : > { %1139 = vmatpush.bf16.msra.mxu2 %v3891_v11  ;;  %v3885_v44 = vld [vmem:[%s5008_s3 + $0x30] sm:$0xff]  ;;  %v3854_v45 = vld [vmem:[%s5016_s30 + $0x38] sm:$0xff]  ;;  %v5059_v49 = vld [vmem:[%s6389_s8] ss:$0 sm:$0xff] }
  0x5e   : > { %v3862_v46 = vld [vmem:[%s5023_s27 + $0x38] sm:$0xff]  ;;  %v5064_v50 = vld [vmem:[%s6387_s6] ss:$0 sm:$0xff]  ;;  %s3276_s27 = scalar_lea.sflag [#allocation7], %s5001_s1 }
  0x5f   : > { %730 = vmatpush.bf16.msra.mxu0 %v3866_v12  ;;  %v5069_v51 = vld [vmem:[%s6385_s4] ss:$0 sm:$0xff] }
  0x60   : > { %895 = vmatpush.bf16.msra.mxu1 %v3874_v13 }
  0x61   : > { %1140 = vmatpush.bf16.msra.mxu2 %v3890_v14 }
  0x63   : > { %731 = vmatpush.bf16.msra.mxu0 %v3865_v15 }
  0x64   : > { %896 = vmatpush.bf16.msra.mxu1 %v3873_v16 }
  0x65   : > { %1141 = vmatpush.bf16.msra.mxu2 %v3889_v17 }
  0x67   : > { %732 = vmatpush.bf16.msra.mxu0 %v3864_v18 }
  0x68   : > { %897 = vmatpush.bf16.msra.mxu1 %v3872_v19 }
  0x69   : > { %1142 = vmatpush.bf16.msra.mxu2 %v3888_v20 }
  0x6b   : > { %733 = vmatpush.bf16.msra.mxu0 %v3863_v21 }
  0x6c   : > { %898 = vmatpush.bf16.msra.mxu1 %v3871_v22 }
  0x6d   : > { %1143 = vmatpush.bf16.msra.mxu2 %v3887_v23 }
  0x6e   : > { %734 = vmatmul.bf16.vlgmr.msra.gmra.mxu0 %v3847_v24 }
  0x6f   : > { %899 = vmatmul.bf16.vlgmr.msra.gmra.mxu1 %v3855_v25 }
  0x70   : > { %1144 = vmatmul.bf16.vlgmr.msra.gmra.mxu2 %v3879_v26 }
  0x7e   : > { %739 = vmatmul.bf16.gmra.mxu0 %v3848_v27 }
  0x7f   : > { %904 = vmatmul.bf16.gmra.mxu1 %v3856_v28 }
  0x80   : > { %1149 = vmatmul.bf16.gmra.mxu2 %v3880_v29 }
  0x8e   : > { %744 = vmatmul.bf16.gmra.mxu0 %v3849_v30 }
  0x8f   : > { %909 = vmatmul.bf16.gmra.mxu1 %v3857_v31 }
  0x90   : > { %1154 = vmatmul.bf16.gmra.mxu2 %v3881_v32 }
  0x9e   : > { %749 = vmatmul.bf16.gmra.mxu0 %v3850_v33 }
  0x9f   : > { %914 = vmatmul.bf16.gmra.mxu1 %v3858_v34 }
  0xa0   : > { %1159 = vmatmul.bf16.gmra.mxu2 %v3882_v35 }
  0xae   : > { %754 = vmatmul.bf16.gmra.mxu0 %v3851_v36 }
  0xaf   : > { %919 = vmatmul.bf16.gmra.mxu1 %v3859_v37 }
  0xb0   : > { %1164 = vmatmul.bf16.gmra.mxu2 %v3883_v38 }
  0xbe   : > { %759 = vmatmul.bf16.gmra.mxu0 %v3852_v39 }
  0xbf   : > { %924 = vmatmul.bf16.gmra.mxu1 %v3860_v40 }
  0xc0   : > { %1169 = vmatmul.bf16.gmra.mxu2 %v3884_v41 }
  0xce   : > { %764 = vmatmul.bf16.gmra.mxu0 %v3853_v42 }
  0xcf   : > { %929 = vmatmul.bf16.gmra.mxu1 %v3861_v43 }
  0xd0   : > { %1174 = vmatmul.bf16.gmra.mxu2 %v3885_v44 }
  0xde   : > { %769 = vmatmul.bf16.gmra.mxu0 %v3854_v45 }
  0xdf   : > { %934 = vmatmul.bf16.gmra.mxu1 %v3862_v46 }
  0xeb   : > { %v735_v47 = vpop.f32.mrf.mxu0 }
  0xec   : > { %v900_v48 = vpop.f32.mrf.mxu1  ;;  %v736_v56 = vadd.f32 %v5064_v50, %v735_v47 }
  0xed   : > { %v901_v52 = vadd.f32 %v5059_v49, %v900_v48 }
  0xf3   : > { %v1145_v53 = vpop.f32.mrf.mxu2  ;;  %v737_v54 = vpop.f32.mrf.mxu0 }
  0xf4   : > { %v902_v55 = vpop.f32.mrf.mxu1  ;;  %v738_v57 = vadd.f32 %v5064_v50, %v737_v54  ;;  %v1146_v59 = vadd.f32 %v5069_v51, %v1145_v53 }
  0xf5   : > { %v903_v58 = vadd.f32 %v5059_v49, %v902_v55 }
  0xf6   : > { %v3931_v60 = vpack.c.bf16 %v738_v57, %v736_v56  ;;  %v1185_v62 = vmul.f32 0.17677669, %v1146_v59 }
  0xf7   : > { %v3971_v61 = vpack.c.bf16 %v903_v58, %v901_v52 }
  0xf8   : > { %3932 = vst [vmem:[#allocation2 + $0x30] sm:$0xff] %v3931_v60   ;;  %v1201_v3 = vpack.c.bf16 %v1185_v62, %v1185_v62 }
  0xf9   : > { %3972 = vst [vmem:[#allocation3] sm:$0xff] %v3971_v61  }
  0xfa   : > { %v1265_v7 = vunpack.c.l.b16 %v1201_v3 }
  0xfb   : > { %v1147_v63 = vpop.f32.mrf.mxu2  ;;  %v740_v1 = vpop.f32.mrf.mxu0 }
  0xfc   : > { %v1148_v0 = vadd.f32 %v5069_v51, %v1147_v63  ;;  %v905_v2 = vpop.f32.mrf.mxu1  ;;  %v741_v14 = vadd.f32 %v5064_v50, %v740_v1 }
  0xfd   : > { %v906_v9 = vadd.f32 %v5059_v49, %v905_v2 }
  0xfe   : > { %v1186_v4 = vmul.f32 0.17677669, %v1148_v0 }
  0xff   : > { %v5077_v6 = vld [vmem:[#allocation2 + $0x30] sm:$0xff] }
 0x100   : > { %v1202_v5 = vpack.c.bf16 %v1186_v4, %v1186_v4  ;;  %2176 = vrot.lane.b32.xlu0 %v5077_v6, %s4771_s17  ;;  %1725 = vrot.lane.b32.xlu1 %v5077_v6, %s4772_s15 }
 0x102   : > { %v1266_v8 = vunpack.c.l.b16 %v1202_v5 }
 0x103   : > { %v1150_v10 = vpop.f32.mrf.mxu2  ;;  %v742_v12 = vpop.f32.mrf.mxu0 }
 0x104   : > { %v5084_v11 = vpack.c.b16 %v1266_v8, %v1265_v7  ;;  %v907_v13 = vpop.f32.mrf.mxu1  ;;  %v743_v15 = vadd.f32 %v5064_v50, %v742_v12  ;;  %v1151_v17 = vadd.f32 %v5069_v51, %v1150_v10 }
 0x105   : > { %v908_v16 = vadd.f32 %v5059_v49, %v907_v13 }
 0x106   : > { %1709 = vrot.lane.b32.xlu2 %v5084_v11, %s4772_s15  ;;  %v3936_v18 = vpack.c.bf16 %v743_v15, %v741_v14  ;;  %v1187_v20 = vmul.f32 0.17677669, %v1151_v17 }
 0x107   : > { %v3976_v19 = vpack.c.bf16 %v908_v16, %v906_v9 }
 0x108   : > { %4048 = vst [vmem:[#allocation2] sm:$0xff] %v3936_v18   ;;  %2611 = vrot.lane.b32.xlu0 %v5084_v11, %s4773_s13  ;;  %2627 = vrot.lane.b32.xlu1 %v5077_v6, %s4773_s13  ;;  %v1203_v25 = vpack.c.bf16 %v1187_v20, %v1187_v20 }
 0x109   : > { %4055 = vst [vmem:[#allocation3 + $0x18] sm:$0xff] %v3976_v19  }
 0x10a   : > { %v1267_v29 = vunpack.c.l.b16 %v1203_v25 }
 0x10b   : > { %v1152_v21 = vpop.f32.mrf.mxu2  ;;  %v745_v23 = vpop.f32.mrf.mxu0 }
 0x10c   : > { %v1153_v22 = vadd.f32 %v5069_v51, %v1152_v21  ;;  %v910_v24 = vpop.f32.mrf.mxu1  ;;  %v746_v36 = vadd.f32 %v5064_v50, %v745_v23 }
 0x10d   : > { %v911_v31 = vadd.f32 %v5059_v49, %v910_v24 }
 0x10e   : > { %v1188_v26 = vmul.f32 0.17677669, %v1153_v22  ;;  %2160 = vrot.lane.b32.xlu2 %v5084_v11, %s4771_s17 }
 0x10f   : > { %v5099_v28 = vld [vmem:[#allocation2] sm:$0xff] }
 0x110   : > { %v1204_v27 = vpack.c.bf16 %v1188_v26, %v1188_v26  ;;  %1727 = vrot.lane.b32.xlu0 %v5099_v28, %s4772_s15 }
 0x112   : > { %v1268_v30 = vunpack.c.l.b16 %v1204_v27 }
 0x113   : > { %v1155_v32 = vpop.f32.mrf.mxu2  ;;  %v747_v34 = vpop.f32.mrf.mxu0 }
 0x114   : > { %v5104_v33 = vpack.c.b16 %v1268_v30, %v1267_v29  ;;  %v912_v35 = vpop.f32.mrf.mxu1  ;;  %v748_v37 = vadd.f32 %v5064_v50, %v747_v34  ;;  %v1156_v41 = vadd.f32 %v5069_v51, %v1155_v32 }
 0x115   : > { %v913_v38 = vadd.f32 %v5059_v49, %v912_v35 }
 0x116   : > { %2629 = vrot.lane.b32.xlu2 %v5099_v28, %s4773_s13  ;;  %2162 = vrot.lane.b32.xlu1 %v5104_v33, %s4771_s17  ;;  %v3941_v39 = vpack.c.bf16 %v748_v37, %v746_v36  ;;  %v1189_v46 = vmul.f32 0.17677669, %v1156_v41 }
 0x117   : > { %v3981_v40 = vpack.c.bf16 %v913_v38, %v911_v31 }
 0x118   : > { %4049 = vst [vmem:[#allocation2 + $0x18] sm:$0xff] %v3941_v39   ;;  %2178 = vrot.lane.b32.xlu0 %v5099_v28, %s4771_s17  ;;  %v1205_v53 = vpack.c.bf16 %v1189_v46, %v1189_v46 }
 0x119   : > { %4056 = vst [vmem:[#allocation3 + $0x10] sm:$0xff] %v3981_v40  }
 0x11a   : > { %v1269_v62 = vunpack.c.l.b16 %v1205_v53 }
 0x11b   : > { %v1157_v42 = vpop.f32.mrf.mxu2  ;;  %v750_v44 = vpop.f32.mrf.mxu0 }
 0x11c   : > { %v1158_v43 = vadd.f32 %v5069_v51, %v1157_v42  ;;  %v915_v45 = vpop.f32.mrf.mxu1  ;;  %v751_v59 = vadd.f32 %v5064_v50, %v750_v44 }
 0x11d   : > { %v916_v54 = vadd.f32 %v5059_v49, %v915_v45 }
 0x11e   : > { %v1190_v47 = vmul.f32 0.17677669, %v1158_v43  ;;  %2613 = vrot.lane.b32.xlu2 %v5104_v33, %s4773_s13 }
 0x11f   : > { %v5119_v52 = vld [vmem:[#allocation2 + $0x18] sm:$0xff] }
 0x120   : > { %v1206_v48 = vpack.c.bf16 %v1190_v47, %v1190_v47  ;;  %1711 = vrot.lane.b32.xlu0 %v5104_v33, %s4772_s15  ;;  %2180 = vrot.lane.b32.xlu1 %v5119_v52, %s4771_s17 }
 0x122   : > { %v1270_v56 = vunpack.c.l.b16 %v1206_v48 }
 0x123   : > { %v1160_v55 = vpop.f32.mrf.mxu2  ;;  %v752_v57 = vpop.f32.mrf.mxu0 }
 0x124   : > { %v917_v58 = vpop.f32.mrf.mxu1  ;;  %v753_v60 = vadd.f32 %v5064_v50, %v752_v57  ;;  %v5131_v1 = vpack.c.b16 %v1270_v56, %v1269_v62  ;;  %v1161_v7 = vadd.f32 %v5069_v51, %v1160_v55 }
 0x125   : > { %v918_v61 = vadd.f32 %v5059_v49, %v917_v58 }
 0x126   : > { %1729 = vrot.lane.b32.xlu2 %v5119_v52, %s4772_s15  ;;  %v3946_v63 = vpack.c.bf16 %v753_v60, %v751_v59  ;;  %v1191_v10 = vmul.f32 0.17677669, %v1161_v7 }
 0x127   : > { %v3986_v0 = vpack.c.bf16 %v918_v61, %v916_v54 }
 0x128   : > { %4050 = vst [vmem:[#allocation2 + $0x10] sm:$0xff] %v3946_v63   ;;  %1713 = vrot.lane.b32.xlu1 %v5131_v1, %s4772_s15  ;;  %v1207_v20 = vpack.c.bf16 %v1191_v10, %v1191_v10 }
 0x129   : > { %4057 = vst [vmem:[#allocation3 + $0x20] sm:$0xff] %v3986_v0  }
 0x12a   : > { %v1271_v24 = vunpack.c.l.b16 %v1207_v20 }
 0x12b   : > { %v1162_v2 = vpop.f32.mrf.mxu2  ;;  %v755_v4 = vpop.f32.mrf.mxu0 }
 0x12c   : > { %v1163_v3 = vadd.f32 %v5069_v51, %v1162_v2  ;;  %v920_v5 = vpop.f32.mrf.mxu1  ;;  %v756_v17 = vadd.f32 %v5064_v50, %v755_v4 }
 0x12d   : > { %v921_v12 = vadd.f32 %v5059_v49, %v920_v5 }
 0x12e   : > { %2631 = vrot.lane.b32.xlu2 %v5119_v52, %s4773_s13  ;;  %v1192_v8 = vmul.f32 0.17677669, %v1163_v3 }
 0x12f   : > { %v5139_v9 = vld [vmem:[#allocation2 + $0x10] sm:$0xff] }
 0x130   : > { %2633 = vrot.lane.b32.xlu0 %v5139_v9, %s4773_s13  ;;  %2182 = vrot.lane.b32.xlu1 %v5139_v9, %s4771_s17  ;;  %v1208_v14 = vpack.c.bf16 %v1192_v8, %v1192_v8 }
 0x132   : > { %v1272_v23 = vunpack.c.l.b16 %v1208_v14 }
 0x133   : > { %v1165_v13 = vpop.f32.mrf.mxu2  ;;  %v757_v15 = vpop.f32.mrf.mxu0 }
 0x134   : > { %v922_v16 = vpop.f32.mrf.mxu1  ;;  %v758_v18 = vadd.f32 %v5064_v50, %v757_v15  ;;  %v1166_v25 = vadd.f32 %v5069_v51, %v1165_v13  ;;  %v5152_v27 = vpack.c.b16 %v1272_v23, %v1271_v24  ;;  %v3886_v15 = vld [vmem:[%s5008_s3 + $0x38] sm:$0xff]  ;;  %s3289_s3 = scalar_lea.hbm %s6445_s0, %s3927_s14 }
 0x135   : > { %v923_v19 = vadd.f32 %v5059_v49, %v922_v16  ;;  %1179 = vmatmul.bf16.gmra.mxu2 %v3886_v15  ;;  %v1355_v15 = vsel %vm1329_vm0, %v5077_v6, 0  ;;  %s3292_s30 = sshll.u32 %s3289_s3, 4  ;;  %s3293_s30 = int_to_ptr.hbm [resolvable:$true] %s3292_s30 }
 0x136   : > { %1731 = vrot.lane.b32.xlu2 %v5139_v9, %s4772_s15  ;;  %v3951_v21 = vpack.c.bf16 %v758_v18, %v756_v17  ;;  %v1193_v32 = vmul.f32 0.17677669, %v1166_v25  ;;  %s4683_s23 = sshra.s32 %s3293_s30, 4  ;;  %s4684_s23 = int_to_ptr.hbm [resolvable:$true] %s4683_s23 }
 0x137   : > { %v3991_v22 = vpack.c.bf16 %v923_v19, %v921_v12  ;;  %s4685_s25 = scalar_lea.hbm %s4684_s23, 64  ;;  %p4690_p8 = scmp.lt.s32.totalorder %s4684_s23, %s6445_s0 }
 0x138   : > { %4051 = vst [vmem:[#allocation2 + $0x8] sm:$0xff] %v3951_v21   ;;  %v1209_v37 = vpack.c.bf16 %v1193_v32, %v1193_v32  ;;  %p4686_p1 = scmp.ne.s32.totalorder %s4684_s23, %s4685_s25  ;;  %p4691_p10 = scmp.lt.s32.totalorder %s4689_s11, %s4685_s25 }
 0x139   : > { %4058 = vst [vmem:[#allocation3 + $0x28] sm:$0xff] %v3991_v22  }
 0x13a   : > { %v1273_v46 = vunpack.c.l.b16 %v1209_v37  ;;  %p4687_p2 = pnand %p4686_p1, %p4924_p7  ;;  %p4692_p11 = por %p4691_p10, %p4690_p8 }
 0x13b   : > { %v1167_v26 = vpop.f32.mrf.mxu2  ;;  %v760_v30 = vpop.f32.mrf.mxu0 }
 0x13c   : > { %v1168_v29 = vadd.f32 %v5069_v51, %v1167_v26  ;;  %v925_v31 = vpop.f32.mrf.mxu1  ;;  %v761_v43 = vadd.f32 %v5064_v50, %v760_v30  ;;  %p4688_p4 = pneg %p4687_p2 }
 0x13d   : > { %v926_v38 = vadd.f32 %v5059_v49, %v925_v31 }
 0x13e   : > { %v1194_v34 = vmul.f32 0.17677669, %v1168_v29  ;;  %1715 = vrot.lane.b32.xlu2 %v5152_v27, %s4772_s15  ;;  %p4693_p12 = pnand %p4692_p11, %p4688_p4 }
 0x13f   : > { %v5157_v36 = vld [vmem:[#allocation2 + $0x8] sm:$0xff] }
 0x140   : > { %v1210_v35 = vpack.c.bf16 %v1194_v34, %v1194_v34  ;;  %2635 = vrot.lane.b32.xlu0 %v5157_v36, %s4773_s13  ;;  %1733 = vrot.lane.b32.xlu1 %v5157_v36, %s4772_s15 }
 0x142   : > { %v1274_v40 = vunpack.c.l.b16 %v1210_v35 }
 0x143   : > { %v1170_v39 = vpop.f32.mrf.mxu2  ;;  %v762_v41 = vpop.f32.mrf.mxu0 }
 0x144   : > { %v927_v42 = vpop.f32.mrf.mxu1  ;;  %v763_v44 = vadd.f32 %v5064_v50, %v762_v41  ;;  %v1171_v47 = vadd.f32 %v5069_v51, %v1170_v39  ;;  %v5170_v54 = vpack.c.b16 %v1274_v40, %v1273_v46 }
 0x145   : > { %v928_v45 = vadd.f32 %v5059_v49, %v927_v42 }
 0x146   : > { %2184 = vrot.lane.b32.xlu2 %v5157_v36, %s4771_s17  ;;  %v3956_v48 = vpack.c.bf16 %v763_v44, %v761_v43  ;;  %v1195_v55 = vmul.f32 0.17677669, %v1171_v47 }
 0x147   : > { %v3996_v53 = vpack.c.bf16 %v928_v45, %v926_v38 }
 0x148   : > { %4052 = vst [vmem:[#allocation2 + $0x20] sm:$0xff] %v3956_v48   ;;  %1717 = vrot.lane.b32.xlu1 %v5170_v54, %s4772_s15  ;;  %v1211_v60 = vpack.c.bf16 %v1195_v55, %v1195_v55  ;;  %v3907_v48 = vld [vmem:[#allocation3 + $0x28] sm:$0xff] }
 0x149   : > { %4059 = vst [vmem:[#allocation3 + $0x8] sm:$0xff] %v3996_v53  }
 0x14a   : > { %v1275_v0 = vunpack.c.l.b16 %v1211_v60 }
 0x14b   : > { %v1172_v56 = vpop.f32.mrf.mxu2  ;;  %v765_v58 = vpop.f32.mrf.mxu0 }
 0x14c   : > { %v1173_v57 = vadd.f32 %v5069_v51, %v1172_v56  ;;  %v930_v59 = vpop.f32.mrf.mxu1  ;;  %v766_v12 = vadd.f32 %v5064_v50, %v765_v58  ;;  %v5237_v56 = vld [vmem:[#allocation3 + $0x20] sm:$0xff]  ;;  %v5245_v58 = vld [vmem:[#allocation3 + $0x10] sm:$0xff] }
 0x14d   : > { %v931_v3 = vadd.f32 %v5059_v49, %v930_v59 }
 0x14e   : > { %v1196_v61 = vmul.f32 0.17677669, %v1173_v57 }
 0x14f   : > { %v5175_v63 = vld [vmem:[#allocation2 + $0x20] sm:$0xff] }
 0x150   : > { %v1212_v62 = vpack.c.bf16 %v1196_v61, %v1196_v61  ;;  %2186 = vrot.lane.b32.xlu2 %v5175_v63, %s4771_s17  ;;  %1735 = vrot.lane.b32.xlu1 %v5175_v63, %s4772_s15  ;;  %v3908_v46 = vld [vmem:[#allocation3 + $0x8] sm:$0xff]  ;;  %v1370_v57 = vsel %vm1329_vm0, %v5175_v63, 0  ;;  %v3904_v61 = vld [vmem:[#allocation3 + $0x18] sm:$0xff] }
 0x152   : > { %v1276_v2 = vunpack.c.l.b16 %v1212_v62  ;;  %v1367_v62 = vsel %vm1329_vm0, %v5157_v36, 0 }
 0x153   : > { %v1175_v4 = vpop.f32.mrf.mxu2  ;;  %v767_v8 = vpop.f32.mrf.mxu0 }
 0x154   : > { %v5182_v5 = vpack.c.b16 %v1276_v2, %v1275_v0  ;;  %v1176_v7 = vadd.f32 %v5069_v51, %v1175_v4  ;;  %v932_v10 = vpop.f32.mrf.mxu1  ;;  %v768_v13 = vadd.f32 %v5064_v50, %v767_v8  ;;  %v3903_v0 = vld [vmem:[#allocation3] sm:$0xff]  ;;  %v1361_v8 = vsel %vm1329_vm0, %v5119_v52, 0 }
 0x155   : > { %v933_v14 = vadd.f32 %v5059_v49, %v932_v10 }
 0x156   : > { %1719 = vrot.lane.b32.xlu0 %v5182_v5, %s4772_s15  ;;  %v3961_v16 = vpack.c.bf16 %v768_v13, %v766_v12  ;;  %v1197_v18 = vmul.f32 0.17677669, %v1176_v7  ;;  %v1358_v13 = vsel %vm1329_vm0, %v5099_v28, 0 }
 0x157   : > { %v4001_v17 = vpack.c.bf16 %v933_v14, %v931_v3  ;;  %v1364_v3 = vsel %vm1329_vm0, %v5139_v9, 0 }
 0x158   : > { %4053 = vst [vmem:[#allocation2 + $0x28] sm:$0xff] %v3961_v16   ;;  %2637 = vrot.lane.b32.xlu1 %v5175_v63, %s4773_s13  ;;  %v1213_v20 = vpack.c.bf16 %v1197_v18, %v1197_v18 }
 0x159   : > { %4060 = vst [vmem:[#allocation3 + $0x30] sm:$0xff] %v4001_v17  }
 0x15a   : > { %v1277_v25 = vunpack.c.l.b16 %v1213_v20 }
 0x15b   : > { %v1177_v19 = vpop.f32.mrf.mxu2  ;;  %v770_v22 = vpop.f32.mrf.mxu0 }
 0x15c   : > { %v1178_v21 = vadd.f32 %v5069_v51, %v1177_v19  ;;  %v935_v23 = vpop.f32.mrf.mxu1  ;;  %v771_v37 = vadd.f32 %v5064_v50, %v770_v22 }
 0x15d   : > { %v936_v31 = vadd.f32 %v5059_v49, %v935_v23 }
 0x15e   : > { %v1198_v24 = vmul.f32 0.17677669, %v1178_v21 }
 0x15f   : > { %v3901_v29 = vld [vmem:[#allocation2 + $0x28] sm:$0xff] }
 0x160   : > { %v1214_v26 = vpack.c.bf16 %v1198_v24, %v1198_v24  ;;  %1737 = vrot.lane.b32.xlu0 %v3901_v29, %s4772_s15  ;;  %2639 = vrot.lane.b32.xlu1 %v3901_v29, %s4773_s13  ;;  %v5207_v42 = vpop.permute.xlu2 %1709  ;;  %v3909_v44 = vld [vmem:[#allocation3 + $0x30] sm:$0xff]  ;;  %v1373_v47 = vsel %vm1329_vm0, %v3901_v29, 0 }
 0x162   : > { %v1278_v30 = vunpack.c.l.b16 %v1214_v26 }
 0x163   : > { %v772_v34 = vpop.f32.mrf.mxu0 }
 0x164   : > { %v5197_v32 = vpack.c.b16 %v1278_v30, %v1277_v25  ;;  %v937_v35 = vpop.f32.mrf.mxu1  ;;  %v773_v38 = vadd.f32 %v5064_v50, %v772_v34 }
 0x165   : > { %v938_v39 = vadd.f32 %v5059_v49, %v937_v35 }
 0x166   : > { %1721 = vrot.lane.b32.xlu2 %v5197_v32, %s4772_s15  ;;  %v3966_v40 = vpack.c.bf16 %v773_v38, %v771_v37 }
 0x167   : > { %v4006_v41 = vpack.c.bf16 %v938_v39, %v936_v31 }
 0x168   : > { %4054 = vst [vmem:[#allocation2 + $0x38] sm:$0xff] %v3966_v40   ;;  %2188 = vrot.lane.b32.xlu0 %v3901_v29, %s4771_s17  ;;  %2615 = vrot.lane.b32.xlu1 %v5131_v1, %s4773_s13  ;;  %v5222_v45 = vpop.permute.xlu2 %2160 }
 0x169   : > { %4061 = vst [vmem:[#allocation3 + $0x38] sm:$0xff] %v4006_v41  }
 0x16e   : > { %2166 = vrot.lane.b32.xlu2 %v5152_v27, %s4771_s17 }
 0x16f   : > { %v5211_v50 = vld [vmem:[#allocation2 + $0x38] sm:$0xff] }
 0x170   : > { %v5213_v49 = vld [vmem:[#allocation3 + $0x38] sm:$0xff]  ;;  %1739 = vrot.lane.b32.xlu0 %v5211_v50, %s4772_s15  ;;  %2168 = vrot.lane.b32.xlu1 %v5170_v54, %s4771_s17  ;;  %v1376_v43 = vsel %vm1329_vm0, %v5211_v50, 0  ;;  %v5235_v55 = vpop.permute.xlu2 %2629 }
 0x171   : > { %1627 = vmatpush.bf16.msrb.mxu0 %v5213_v49  ;;  %1378 = vmatpush.bf16.xpose.msra.mxu3 %v1376_v43 }
 0x172   : > { %v5231_v53 = vpop.permute.xlu1 %1725  ;;  %v5259_v63 = vpop.permute.xlu0 %2176 }
 0x175   : > { %1628 = vmatpush.bf16.msrb.mxu0 %v3909_v44 }
 0x176   : > { %2170 = vrot.lane.b32.xlu2 %v5182_v5, %s4771_s17 }
 0x178   : > { %2164 = vrot.lane.b32.xlu0 %v5131_v1, %s4771_s17  ;;  %2621 = vrot.lane.b32.xlu1 %v5182_v5, %s4773_s13  ;;  %v5252_v60 = vpop.permute.xlu2 %2613 }
 0x179   : > { %1629 = vmatpush.bf16.msrb.mxu0 %v3908_v46  ;;  %1379 = vmatpush.bf16.xpose.msra.mxu3 %v1373_v47 }
 0x17a   : > { %v5250_v59 = vpop.permute.xlu1 %2627  ;;  %v5271_v36 = vpop.permute.xlu0 %2611 }
 0x17d   : > { %1630 = vmatpush.bf16.msrb.mxu0 %v3907_v48 }
 0x17e   : > { %2172 = vrot.lane.b32.xlu2 %v5197_v32, %s4771_s17 }
 0x180   : > { %2617 = vrot.lane.b32.xlu0 %v5152_v27, %s4773_s13  ;;  %2000 = vrot.lane.b32.xlu1 %v3908_v46, %s4772_s15  ;;  %v5269_v4 = vpop.permute.xlu2 %1729 }
 0x181   : > { %1631 = vmatpush.bf16.msrb.mxu0 %v5237_v56  ;;  %1380 = vmatpush.bf16.xpose.msra.mxu3 %v1370_v57 }
 0x182   : > { %v5284_v9 = vpop.permute.xlu0 %1727 }
 0x185   : > { %1632 = vmatpush.bf16.msrb.mxu0 %v5245_v58 }
 0x186   : > { %2623 = vrot.lane.b32.xlu2 %v5197_v32, %s4773_s13 }
 0x188   : > { %2619 = vrot.lane.b32.xlu0 %v5170_v54, %s4773_s13  ;;  %1998 = vrot.lane.b32.xlu1 %v3907_v48, %s4772_s15  ;;  %v5262_v2 = vpop.permute.xlu1 %2162  ;;  %v5281_v10 = vpop.permute.xlu2 %2631 }
 0x189   : > { %1633 = vmatpush.bf16.msrb.mxu0 %v3904_v61  ;;  %1381 = vmatpush.bf16.xpose.msra.mxu3 %v1367_v62 }
 0x18a   : > { %v5297_v14 = vpop.permute.xlu0 %2178 }
 0x18d   : > { %1634 = vmatpush.bf16.msrb.mxu0 %v3903_v0 }
 0x18e   : > { %1990 = vrot.lane.b32.xlu2 %v3903_v0, %s4772_s15 }
 0x190   : > { %2002 = vrot.lane.b32.xlu0 %v3909_v44, %s4772_s15  ;;  %1994 = vrot.lane.b32.xlu1 %v5245_v58, %s4772_s15  ;;  %v5295_v52 = vpop.permute.xlu2 %1731 }
 0x191   : > { %1382 = vmatpush.bf16.xpose.msra.mxu3 %v1364_v3 }
 0x192   : > { %v5274_v7 = vpop.permute.xlu1 %2180  ;;  %v5312_v28 = vpop.permute.xlu0 %1711 }
 0x196   : > { %2904 = vrot.lane.b32.xlu2 %v3909_v44, %s4773_s13 }
 0x198   : > { %1996 = vrot.lane.b32.xlu0 %v5237_v56, %s4772_s15  ;;  %2451 = vrot.lane.b32.xlu1 %v3908_v46, %s4771_s17  ;;  %v5305_v17 = vpop.permute.xlu2 %1715 }
 0x199   : > { %1383 = vmatpush.bf16.xpose.msra.mxu3 %v1361_v8 }
 0x19a   : > { %v5286_v12 = vpop.permute.xlu1 %1713 }
 0x19e   : > { %2453 = vrot.lane.b32.xlu2 %v3909_v44, %s4771_s17 }
 0x1a0   : > { %1992 = vrot.lane.b32.xlu0 %v3904_v61, %s4772_s15  ;;  %2898 = vrot.lane.b32.xlu1 %v5237_v56, %s4773_s13  ;;  %v5316_v6 = vpop.permute.xlu2 %2184 }
 0x1a1   : > { %1384 = vmatpush.bf16.xpose.msra.mxu3 %v1358_v13 }
 0x1a2   : > { %v5303_v16 = vpop.permute.xlu1 %2182  ;;  %v5318_v19 = vpop.permute.xlu0 %2633 }
 0x1a6   : > { %2641 = vrot.lane.b32.xlu2 %v5211_v50, %s4773_s13 }
 0x1a8   : > { %2902 = vrot.lane.b32.xlu0 %v3908_v46, %s4773_s13  ;;  %2449 = vrot.lane.b32.xlu1 %v3907_v48, %s4771_s17 }
 0x1a9   : > { %1385 = vmatpush.bf16.xpose.msra.mxu3 %v1355_v15 }
 0x1aa   : > { %v5324_v21 = vpop.permute.xlu2 %2186 }
 0x1b0   : > { %2900 = vrot.lane.b32.xlu0 %v3907_v48, %s4773_s13  ;;  %2455 = vrot.lane.b32.xlu1 %v5213_v49, %s4771_s17 }
 0x1b1   : > { %3711 = vmatmul.msk.bf16.vlgmr.msra.gmra.mxu3 %vm1329_vm0, %v5084_v11 }
 0x1b2   : > { %v1734_v18 = vpop.permute.xlu1 %1733  ;;  %v5328_v11 = vpop.permute.xlu0 %2635 }
 0x1b8   : > { %2190 = vrot.lane.b32.xlu0 %v5211_v50, %s4771_s17 }
 0x1ba   : > { %v5320_v20 = vpop.permute.xlu1 %1717 }
 0x1c0   : > { %2004 = vrot.lane.b32.xlu0 %v5213_v49, %s4772_s15  ;;  %v5332_v23 = vpop.permute.xlu2 %1721 }
 0x1c1   : > { %3712 = vmatmul.msk.bf16.gmra.mxu3 %vm1329_vm0, %v5104_v33  ;;  %v1180_v33 = vpop.f32.mrf.mxu2 }
 0x1c2   : > { %v1736_v22 = vpop.permute.xlu1 %1735  ;;  %v1181_v31 = vadd.f32 %v5069_v51, %v1180_v33  ;;  %v1778_v33 = vsel %vm1329_vm0, %v1734_v18, 0 }
 0x1c3   : > { %v1781_v8 = vsel %vm1329_vm0, %v1736_v22, 0 }
 0x1c4   : > { %v1199_v38 = vmul.f32 0.17677669, %v1181_v31 }
 0x1c8   : > { %2906 = vrot.lane.b32.xlu0 %v5213_v49, %s4773_s13  ;;  %v5334_v24 = vpop.permute.xlu0 %1719  ;;  %v5342_v30 = vpop.permute.xlu2 %2166 }
 0x1c9   : > { %v1182_v39 = vpop.f32.mrf.mxu2 }
 0x1ca   : > { %v5336_v25 = vpop.permute.xlu1 %2637  ;;  %v1183_v40 = vadd.f32 %v5069_v51, %v1182_v39 }
 0x1cc   : > { %v1200_v43 = vmul.f32 0.17677669, %v1183_v40  ;;  %v1772_v40 = vsel %vm1329_vm0, %v5269_v4, 0 }
 0x1ce   : > { %v1216_v46 = vpack.c.bf16 %v1200_v43, %v1200_v43 }
 0x1d0   : > { %v5349_v37 = vpop.permute.xlu2 %2170  ;;  %v1280_v48 = vunpack.c.l.b16 %v1216_v46  ;;  %v1766_v46 = vsel %vm1329_vm0, %v5231_v53, 0 }
 0x1d1   : > { %3713 = vmatmul.msk.bf16.gmra.mxu3 %vm1329_vm0, %v5131_v1  ;;  %v1215_v1 = vpack.c.bf16 %v1199_v38, %v1199_v38  ;;  %v1775_v38 = vsel %vm1329_vm0, %v5295_v52, 0 }
 0x1d2   : > { %v1738_v26 = vpop.permute.xlu0 %1737  ;;  %v5340_v29 = vpop.permute.xlu1 %2639 }
 0x1d3   : > { %v1279_v44 = vunpack.c.l.b16 %v1215_v1 }
 0x1d5   : > { %v1288_v57 = vpack.c.b16 %v1280_v48, %v1279_v44 }
 0x1d7   : > { %1723 = vrot.lane.b32.xlu1 %v1288_v57, %s4772_s15  ;;  %2174 = vrot.lane.b32.xlu2 %v1288_v57, %s4771_s17 }
 0x1d8   : > { %v5357_v47 = vpop.permute.xlu2 %2172 }
 0x1da   : > { %v5345_v34 = vpop.permute.xlu0 %2188  ;;  %v5347_v35 = vpop.permute.xlu1 %2615 }
 0x1df   : > { %2625 = vrot.lane.b32.xlu1 %v1288_v57, %s4773_s13 }
 0x1e0   : > { %v5366_v51 = vpop.permute.xlu2 %2623 }
 0x1e1   : > { %3714 = vmatmul.msk.bf16.gmra.mxu3 %vm1329_vm0, %v5152_v27  ;;  %v1784_v27 = vsel %vm1329_vm0, %v1738_v26, 0 }
 0x1e2   : > { %v1740_v41 = vpop.permute.xlu0 %1739  ;;  %v5354_v50 = vpop.permute.xlu1 %2168 }
 0x1e3   : > { %v1787_v49 = vsel %vm1329_vm0, %v1740_v41, 0 }
 0x1e4   : > { %1789 = vmatpush.bf16.xpose.msrb.mxu1 %v1787_v49  ;;  %v1769_v49 = vsel %vm1329_vm0, %v5284_v9, 0  ;;  %v2686_v9 = vsel %vm1329_vm0, %v5340_v29, 0 }
 0x1e8   : > { %v5376_v26 = vpop.permute.xlu2 %1990 }
 0x1ea   : > { %v5359_v61 = vpop.permute.xlu0 %2164  ;;  %v5361_v62 = vpop.permute.xlu1 %2621 }
 0x1ec   : > { %1790 = vmatpush.bf16.xpose.msrb.mxu1 %v1784_v27 }
 0x1f0   : > { %v5383_v22 = vpop.permute.xlu2 %2904 }
 0x1f1   : > { %3715 = vmatmul.msk.bf16.gmra.mxu3 %vm1329_vm0, %v5170_v54 }
 0x1f2   : > { %v5370_v0 = vpop.permute.xlu0 %2617  ;;  %v2001_v3 = vpop.permute.xlu1 %2000 }
 0x1f4   : > { %1791 = vmatpush.bf16.xpose.msrb.mxu1 %v1781_v8  ;;  %v2683_v8 = vsel %vm1329_vm0, %v5336_v25, 0  ;;  %v2232_v25 = vsel %vm1329_vm0, %v5324_v21, 0  ;;  %v2674_v21 = vsel %vm1329_vm0, %v5281_v10, 0  ;;  %v2223_v10 = vsel %vm1329_vm0, %v5274_v7, 0 }
 0x1f8   : > { %v2454_v41 = vpop.permute.xlu2 %2453 }
 0x1fa   : > { %v5374_v13 = vpop.permute.xlu0 %2619  ;;  %v1999_v15 = vpop.permute.xlu1 %1998 }
 0x1fc   : > { %1792 = vmatpush.bf16.xpose.msrb.mxu1 %v1778_v33  ;;  %v2680_v33 = vsel %vm1329_vm0, %v5328_v11, 0  ;;  %v2229_v11 = vsel %vm1329_vm0, %v5316_v6, 0 }
 0x200   : > { %v2642_v52 = vpop.permute.xlu2 %2641 }
 0x201   : > { %3716 = vmatmul.msk.bf16.gmra.mxu3 %vm1329_vm0, %v5182_v5  ;;  %v2689_v4 = vsel %vm1329_vm0, %v2642_v52, 0 }
 0x202   : > { %v2003_v54 = vpop.permute.xlu0 %2002  ;;  %v1995_v31 = vpop.permute.xlu1 %1994 }
 0x204   : > { %1793 = vmatpush.bf16.xpose.msrb.mxu1 %v1775_v38 }
 0x20a   : > { %v1997_v39 = vpop.permute.xlu0 %1996  ;;  %v2452_v1 = vpop.permute.xlu1 %2451 }
 0x20c   : > { %1794 = vmatpush.bf16.xpose.msrb.mxu1 %v1772_v40 }
 0x211   : > { %3717 = vmatmul.msk.bf16.gmra.mxu3 %vm1329_vm0, %v5197_v32 }
 0x212   : > { %v1993_v18 = vpop.permute.xlu0 %1992  ;;  %v5389_v5 = vpop.permute.xlu1 %2898 }
 0x214   : > { %1795 = vmatpush.bf16.xpose.msrb.mxu1 %v1769_v49 }
 0x21a   : > { %v5393_v43 = vpop.permute.xlu0 %2902  ;;  %v2450_v44 = vpop.permute.xlu1 %2449 }
 0x21c   : > { %1796 = vmatpush.bf16.xpose.msrb.mxu1 %v1766_v46 }
 0x221   : > { %3718 = vmatmul.msk.bf16.gmra.mxu3 %vm1329_vm0, %v1288_v57 }
 0x222   : > { %v2901_v32 = vpop.permute.xlu0 %2900  ;;  %v2456_v48 = vpop.permute.xlu1 %2455 }
 0x223   : > { %3751 = vmatmul.msk.bf16.vlgmr.msrb.gmra.mxu1 %vm1329_vm0, %v5207_v42  ;;  %2465 = vmatpush.bf16.msra.mxu0 %v2456_v48  ;;  %v2235_v42 = vsel %vm1329_vm0, %v5345_v34, 0 }
 0x224   : > { %2691 = vmatpush.bf16.xpose.msra.mxu1 %v2689_v4 }
 0x227   : > { %2466 = vmatpush.bf16.msra.mxu0 %v2454_v41 }
 0x22a   : > { %v2191_v27 = vpop.permute.xlu0 %2190 }
 0x22b   : > { %2467 = vmatpush.bf16.msra.mxu0 %v2452_v1  ;;  %v2238_v53 = vsel %vm1329_vm0, %v2191_v27, 0 }
 0x22c   : > { %2692 = vmatpush.bf16.xpose.msra.mxu1 %v2686_v9  ;;  %2240 = vmatpush.bf16.xpose.msrb.mxu3 %v2238_v53 }
 0x22f   : > { %2468 = vmatpush.bf16.msra.mxu0 %v2450_v44 }
 0x232   : > { %v2005_v57 = vpop.permute.xlu0 %2004 }
 0x233   : > { %3752 = vmatmul.msk.bf16.gmra.mxu1 %vm1329_vm0, %v5312_v28  ;;  %2014 = vmatpush.bf16.msrb.mxu2 %v2005_v57  ;;  %v2677_v28 = vsel %vm1329_vm0, %v5318_v19, 0  ;;  %v2226_v19 = vsel %vm1329_vm0, %v5303_v16, 0 }
 0x234   : > { %2693 = vmatpush.bf16.xpose.msra.mxu1 %v2683_v8  ;;  %v5410_v29 = vpop.f32.mrf.mxu3  ;;  %2241 = vmatpush.bf16.xpose.msrb.mxu3 %v2235_v42 }
 0x235   : > { %1427 = vmax.xlane.f32.xlu2 %v5410_v29 }
 0x237   : > { %2015 = vmatpush.bf16.msrb.mxu2 %v2003_v54  ;;  %v2175_v54 = vpop.permute.xlu2 %2174 }
 0x23a   : > { %v2907_v6 = vpop.permute.xlu0 %2906 }
 0x23b   : > { %2016 = vmatpush.bf16.msrb.mxu2 %v2001_v3 }
 0x23c   : > { %2694 = vmatpush.bf16.xpose.msra.mxu1 %v2680_v33  ;;  %v5417_v38 = vpop.f32.mrf.mxu3  ;;  %2242 = vmatpush.bf16.xpose.msrb.mxu3 %v2232_v25 }
 0x23d   : > { %1429 = vmax.xlane.f32.xlu1 %v5417_v38 }
 0x23f   : > { %2017 = vmatpush.bf16.msrb.mxu2 %v1999_v15  ;;  %v2220_v15 = vsel %vm1329_vm0, %v5297_v14, 0 }
 0x243   : > { %3753 = vmatmul.msk.bf16.gmra.mxu1 %vm1329_vm0, %v5286_v12  ;;  %2018 = vmatpush.bf16.msrb.mxu2 %v1997_v39  ;;  %v2671_v12 = vsel %vm1329_vm0, %v5235_v55, 0  ;;  %v2668_v55 = vsel %vm1329_vm0, %v5250_v59, 0  ;;  %v2217_v59 = vsel %vm1329_vm0, %v5259_v63, 0 }
 0x244   : > { %2695 = vmatpush.bf16.xpose.msra.mxu1 %v2677_v28  ;;  %v5426_v34 = vpop.f32.mrf.mxu3  ;;  %2243 = vmatpush.bf16.xpose.msrb.mxu3 %v2229_v11 }
 0x245   : > { %1431 = vmax.xlane.f32.xlu0 %v5426_v34 }
 0x247   : > { %2019 = vmatpush.bf16.msrb.mxu2 %v1995_v31 }
 0x24b   : > { %2020 = vmatpush.bf16.msrb.mxu2 %v1993_v18 }
 0x24c   : > { %2696 = vmatpush.bf16.xpose.msra.mxu1 %v2674_v21  ;;  %v5433_v3 = vpop.f32.mrf.mxu3  ;;  %2244 = vmatpush.bf16.xpose.msrb.mxu3 %v2226_v19 }
 0x24d   : > { %1433 = vmax.xlane.f32.xlu1 %v5433_v3 }
 0x24f   : > { %2021 = vmatpush.bf16.msrb.mxu2 %v5376_v26 }
 0x253   : > { %2916 = vmatpush.bf16.msra.mxu2 %v2907_v6  ;;  %3754 = vmatmul.msk.bf16.gmra.mxu1 %vm1329_vm0, %v5305_v17 }
 0x254   : > { %2697 = vmatpush.bf16.xpose.msra.mxu1 %v2671_v12  ;;  %v5443_v16 = vpop.f32.mrf.mxu3  ;;  %2245 = vmatpush.bf16.xpose.msrb.mxu3 %v2223_v10 }
 0x255   : > { %1435 = vmax.xlane.f32.xlu2 %v5443_v16 }
 0x257   : > { %2917 = vmatpush.bf16.msra.mxu2 %v5383_v22 }
 0x25b   : > { %2918 = vmatpush.bf16.msra.mxu2 %v5393_v43 }
 0x25c   : > { %2698 = vmatpush.bf16.xpose.msra.mxu1 %v2668_v55  ;;  %v5452_v17 = vpop.f32.mrf.mxu3  ;;  %2246 = vmatpush.bf16.xpose.msrb.mxu3 %v2220_v15 }
 0x25d   : > { %1437 = vmax.xlane.f32.xlu0 %v5452_v17 }
 0x25f   : > { %2919 = vmatpush.bf16.msra.mxu2 %v2901_v32 }
 0x263   : > { %2920 = vmatpush.bf16.msra.mxu2 %v5389_v5  ;;  %3755 = vmatmul.msk.bf16.gmra.mxu1 %vm1329_vm0, %v5320_v20 }
 0x264   : > { %v5460_v7 = vpop.f32.mrf.mxu3  ;;  %2247 = vmatpush.bf16.xpose.msrb.mxu3 %v2217_v59 }
 0x265   : > { %1439 = vmax.xlane.f32.xlu2 %v5460_v7 }
 0x26b   : > { %3759 = vmatmul.msk.bf16.vlgmr.msrb.gmra.mxu3 %vm1329_vm0, %v5222_v45 }
 0x26c   : > { %v5465_v14 = vpop.f32.mrf.mxu3 }
 0x26d   : > { %1441 = vmax.xlane.f32.xlu1 %v5465_v14 }
 0x273   : > { %3756 = vmatmul.msk.bf16.gmra.mxu1 %vm1329_vm0, %v5334_v24  ;;  %v1724_v24 = vpop.permute.xlu1 %1723 }
 0x274   : > { %v5470_v26 = vpop.f32.mrf.mxu3 }
 0x275   : > { %1443 = vmax.xlane.f32.xlu0 %v5470_v26 }
 0x27b   : > { %3760 = vmatmul.msk.bf16.gmra.mxu3 %vm1329_vm0, %v5262_v2  ;;  %v5505_v22 = vpop.permute.xlu1 %2625 }
 0x27c   : > { %v5475_v63 = vpop.f32.mrf.mxu3 }
 0x27d   : > { %1445 = vmax.xlane.f32.xlu1 %v5475_v63 }
 0x283   : > { %3757 = vmatmul.msk.bf16.gmra.mxu1 %vm1329_vm0, %v5332_v23 }
 0x284   : > { %v5480_v45 = vpop.f32.mrf.mxu3 }
 0x285   : > { %1447 = vmax.xlane.f32.xlu0 %v5480_v45 }
 0x28b   : > { %3761 = vmatmul.msk.bf16.gmra.mxu3 %vm1329_vm0, %v5359_v61 }
 0x28c   : > { %v5485_v20 = vpop.f32.mrf.mxu3 }
 0x28d   : > { %1449 = vmax.xlane.f32.xlu2 %v5485_v20 }
 0x293   : > { %3758 = vmatmul.msk.bf16.gmra.mxu1 %vm1329_vm0, %v1724_v24 }
 0x294   : > { %v5489_v2 = vpop.f32.mrf.mxu3 }
 0x295   : > { %1451 = vmax.xlane.f32.xlu0 %v5489_v2 }
 0x29b   : > { %3762 = vmatmul.msk.bf16.gmra.mxu3 %vm1329_vm0, %v5342_v30 }
 0x29c   : > { %v5494_v23 = vpop.f32.mrf.mxu3 }
 0x29d   : > { %1453 = vmax.xlane.f32.xlu2 %v5494_v23 }
 0x2a0   : > { %v5497_v61 = vpop.f32.mrf.mxu1 }
 0x2a1   : > { %1838 = vmax.xlane.f32.xlu0 %v5497_v61 }
 0x2a3   : > { %3767 = vmatmul.msk.bf16.vlgmr.msra.gmra.mxu1 %vm1329_vm0, %v5271_v36 }
 0x2a4   : > { %v5502_v31 = vpop.f32.mrf.mxu3 }
 0x2a5   : > { %1455 = vmax.xlane.f32.xlu1 %v5502_v31 }
 0x2a8   : > { %v1428_v39 = vpop.xlane.xlu2 %1427  ;;  %v5507_v30 = vpop.f32.mrf.mxu1 }
 0x2a9   : > { %v1459_v1 = vsub.f32 %v5410_v29, %v1428_v39 }
 0x2ab   : > { %v1475_v40 = vmul.f32 1.442695, %v1459_v1  ;;  %3763 = vmatmul.msk.bf16.gmra.mxu3 %vm1329_vm0, %v5354_v50 }
 0x2ac   : > { %v5512_v41 = vpop.f32.mrf.mxu3 }
 0x2ad   : > { %4200 = vpow2.f32 %v1475_v40  ;;  %1840 = vmax.xlane.f32.xlu1 %v5507_v30  ;;  %1457 = vmax.xlane.f32.xlu0 %v5512_v41 }
 0x2b0   : > { %v1430_v36 = vpop.xlane.xlu1 %1429  ;;  %v5516_v18 = vpop.f32.mrf.mxu1 }
 0x2b1   : > { %v1460_v5 = vsub.f32 %v5417_v38, %v1430_v36 }
 0x2b3   : > { %v5519_v49 = vpop.eup %4200  ;;  %v1477_v52 = vmul.f32 1.442695, %v1460_v5  ;;  %3768 = vmatmul.msk.bf16.gmra.mxu1 %vm1329_vm0, %v5252_v60 }
 0x2b5   : > { %4202 = vpow2.f32 %v1477_v52  ;;  %1842 = vmax.xlane.f32.xlu1 %v5516_v18  ;;  %1507 = vadd.xlane.f32.xlu0 %v5519_v49 }
 0x2b8   : > { %v1432_v50 = vpop.xlane.xlu0 %1431  ;;  %v5525_v43 = vpop.f32.mrf.mxu1 }
 0x2b9   : > { %v1461_v44 = vsub.f32 %v5426_v34, %v1432_v50 }
 0x2bb   : > { %v5528_v46 = vpop.eup %4202  ;;  %v1479_v4 = vmul.f32 1.442695, %v1461_v44  ;;  %3764 = vmatmul.msk.bf16.gmra.mxu3 %vm1329_vm0, %v5349_v37 }
 0x2bd   : > { %4204 = vpow2.f32 %v1479_v4  ;;  %1509 = vadd.xlane.f32.xlu0 %v5528_v46 }
 0x2c0   : > { %v5533_v60 = vpop.f32.mrf.mxu1  ;;  %v1434_v42 = vpop.xlane.xlu1 %1433 }
 0x2c3   : > { %v5535_v32 = vpop.eup %4204  ;;  %3769 = vmatmul.msk.bf16.gmra.mxu1 %vm1329_vm0, %v5347_v35 }
 0x2c5   : > { %1511 = vadd.xlane.f32.xlu0 %v5535_v32 }
 0x2c8   : > { %v5540_v48 = vpop.f32.mrf.mxu1 }
 0x2cb   : > { %3765 = vmatmul.msk.bf16.gmra.mxu3 %vm1329_vm0, %v5357_v47  ;;  %v1436_v47 = vpop.xlane.xlu2 %1435 }
 0x2cc   : > { %v1463_v57 = vsub.f32 %v5443_v16, %v1436_v47 }
 0x2ce   : > { %v1483_v29 = vmul.f32 1.442695, %v1463_v57 }
 0x2d0   : > { %v5544_v9 = vpop.f32.mrf.mxu1  ;;  %v1438_v8 = vpop.xlane.xlu0 %1437  ;;  %4206 = vpow2.f32 %v1483_v29 }
 0x2d3   : > { %3770 = vmatmul.msk.bf16.gmra.mxu1 %vm1329_vm0, %v5370_v0 }
 0x2d6   : > { %v5581_v21 = vpop.eup %4206 }
 0x2d8   : > { %v5548_v37 = vpop.f32.mrf.mxu1  ;;  %v1440_v11 = vpop.xlane.xlu2 %1439 }
 0x2d9   : > { %v1465_v19 = vsub.f32 %v5460_v7, %v1440_v11 }
 0x2db   : > { %3766 = vmatmul.msk.bf16.gmra.mxu3 %vm1329_vm0, %v2175_v54  ;;  %v1487_v12 = vmul.f32 1.442695, %v1465_v19  ;;  %v1464_v54 = vsub.f32 %v5452_v17, %v1438_v8 }
 0x2dd   : > { %v1485_v40 = vmul.f32 1.442695, %v1464_v54 }
 0x2e0   : > { %v5553_v35 = vpop.f32.mrf.mxu1  ;;  %v1442_v10 = vpop.xlane.xlu1 %1441 }
 0x2e3   : > { %3771 = vmatmul.msk.bf16.gmra.mxu1 %vm1329_vm0, %v5374_v13 }
 0x2e8   : > { %v5555_v27 = vpop.f32.mrf.mxu1  ;;  %v1444_v25 = vpop.xlane.xlu0 %1443 }
 0x2e9   : > { %v1467_v17 = vsub.f32 %v5470_v26, %v1444_v25 }
 0x2eb   : > { %v1491_v50 = vmul.f32 1.442695, %v1467_v17 }
 0x2ee   : > { %v5557_v53 = vpop.f32.mrf.mxu3 }
 0x2ef   : > { %2289 = vmax.xlane.f32.xlu2 %v5557_v53 }
 0x2f0   : > { %v5566_v13 = vpop.f32.mrf.mxu1  ;;  %v1446_v15 = vpop.xlane.xlu1 %1445 }
 0x2f1   : > { %v1468_v39 = vsub.f32 %v5475_v63, %v1446_v15 }
 0x2f3   : > { %3772 = vmatmul.msk.bf16.gmra.mxu1 %vm1329_vm0, %v5361_v62  ;;  %v1462_v62 = vsub.f32 %v5433_v3, %v1434_v42  ;;  %v1493_v36 = vmul.f32 1.442695, %v1468_v39 }
 0x2f5   : > { %v1481_v28 = vmul.f32 1.442695, %v1462_v62 }
 0x2f6   : > { %v5562_v0 = vpop.f32.mrf.mxu3 }
 0x2f7   : > { %1844 = vmax.xlane.f32.xlu2 %v5525_v43  ;;  %2291 = vmax.xlane.f32.xlu1 %v5562_v0  ;;  %4208 = vpow2.f32 %v1481_v28 }
 0x2f8   : > { %v5575_v38 = vpop.f32.mrf.mxu1  ;;  %v1448_v3 = vpop.xlane.xlu0 %1447  ;;  %4210 = vpow2.f32 %v1487_v12 }
 0x2f9   : > { %4212 = vpow2.f32 %v1485_v40  ;;  %v1469_v4 = vsub.f32 %v5480_v45, %v1448_v3 }
 0x2fa   : > { %4214 = vpow2.f32 %v1493_v36 }
 0x2fb   : > { %v1495_v57 = vmul.f32 1.442695, %v1469_v4 }
 0x2fd   : > { %v5588_v16 = vpop.eup %4208 }
 0x2fe   : > { %v5569_v33 = vpop.f32.mrf.mxu3  ;;  %v5596_v59 = vpop.eup %4210 }
 0x2ff   : > { %1846 = vmax.xlane.f32.xlu2 %v5533_v60  ;;  %1850 = vmax.xlane.f32.xlu1 %v5544_v9  ;;  %v5616_v44 = vpop.eup %4212 }
 0x300   : > { %2293 = vmax.xlane.f32.xlu0 %v5569_v33  ;;  %v5586_v6 = vpop.f32.mrf.mxu1  ;;  %v1450_v25 = vpop.xlane.xlu2 %1449 }
 0x301   : > { %v1470_v45 = vsub.f32 %v5485_v20, %v1450_v25 }
 0x303   : > { %3773 = vmatmul.msk.bf16.gmra.mxu1 %vm1329_vm0, %v5366_v51  ;;  %v1497_v19 = vmul.f32 1.442695, %v1470_v45 }
 0x306   : > { %v5579_v34 = vpop.f32.mrf.mxu3 }
 0x307   : > { %1848 = vmax.xlane.f32.xlu2 %v5540_v48 }
 0x308   : > { %1515 = vadd.xlane.f32.xlu0 %v5581_v21  ;;  %v1452_v55 = vpop.xlane.xlu0 %1451  ;;  %v5598_v7 = vpop.f32.mrf.mxu1 }
 0x309   : > { %v1471_v26 = vsub.f32 %v5489_v2, %v1452_v55 }
 0x30b   : > { %v1499_v62 = vmul.f32 1.442695, %v1471_v26 }
 0x30e   : > { %v5590_v51 = vpop.f32.mrf.mxu3 }
 0x30f   : > { %6438 = vst [vmem:[#allocation31_spill] sm:$0xff] %v5590_v51  ;;  %1513 = vadd.xlane.f32.xlu2 %v5588_v16  ;;  %2297 = vmax.xlane.f32.xlu1 %v5590_v51 }
 0x310   : > { %v5613_v52 = vpop.f32.mrf.mxu1  ;;  %v1454_v15 = vpop.xlane.xlu2 %1453 }
 0x311   : > { %v1472_v40 = vsub.f32 %v5494_v23, %v1454_v15 }
 0x313   : > { %3774 = vmatmul.msk.bf16.gmra.mxu1 %vm1329_vm0, %v5505_v22  ;;  %v1466_v22 = vsub.f32 %v5465_v14, %v1442_v10  ;;  %v5618_v14 = vpop.eup %4214  ;;  %v1501_v17 = vmul.f32 1.442695, %v1472_v40 }
 0x314   : > { %v5606_v1 = vpop.xlane.xlu0 %1838 }
 0x315   : > { %v1489_v5 = vmul.f32 1.442695, %v1466_v22  ;;  %v1870_v23 = vsub.f32 %v5497_v61, %v5606_v1 }
 0x316   : > { %v5600_v24 = vpop.f32.mrf.mxu3 }
 0x317   : > { %2295 = vmax.xlane.f32.xlu2 %v5579_v34  ;;  %1519 = vadd.xlane.f32.xlu1 %v5596_v59  ;;  %4216 = vpow2.f32 %v1489_v5 }
 0x318   : > { %2299 = vmax.xlane.f32.xlu0 %v5600_v24  ;;  %4218 = vpow2.f32 %v1491_v50  ;;  %v5627_v42 = vpop.f32.mrf.mxu1  ;;  %v1456_v29 = vpop.xlane.xlu1 %1455 }
 0x319   : > { %4220 = vpow2.f32 %v1495_v57  ;;  %v1473_v26 = vsub.f32 %v5502_v31, %v1456_v29 }
 0x31d   : > { %v5621_v47 = vpop.eup %4216 }
 0x31e   : > { %v5629_v28 = vpop.eup %4218 }
 0x31f   : > { %1852 = vmax.xlane.f32.xlu2 %v5548_v37  ;;  %1856 = vmax.xlane.f32.xlu1 %v5555_v27  ;;  %v5635_v11 = vpop.eup %4220 }
 0x320   : > { %v1458_v63 = vpop.xlane.xlu0 %1457  ;;  %1854 = vmax.xlane.f32.xlu0 %v5553_v35  ;;  %v5637_v3 = vpop.f32.mrf.mxu1 }
 0x321   : > { %v1841_v10 = vpop.xlane.xlu1 %1840 }
 0x322   : > { %v1871_v20 = vsub.f32 %v5507_v30, %v1841_v10  ;;  %v1474_v30 = vsub.f32 %v5512_v41, %v1458_v63 }
 0x324   : > { %v1888_v5 = vmul.f32 1.442695, %v1871_v20 }
 0x327   : > { %1517 = vadd.xlane.f32.xlu2 %v5616_v44  ;;  %1525 = vadd.xlane.f32.xlu1 %v5618_v14 }
 0x328   : > { %v1508_v8 = vpop.xlane.xlu0 %1507  ;;  %1521 = vadd.xlane.f32.xlu0 %v5621_v47  ;;  %v5650_v4 = vpop.f32.mrf.mxu1 }
 0x329   : > { %4222 = vrcp.f32 %v1508_v8  ;;  %v1886_v8 = vmul.f32 1.442695, %v1870_v23  ;;  %v1843_v57 = vpop.xlane.xlu1 %1842 }
 0x32a   : > { %4224 = vpow2.f32 %v1499_v62  ;;  %v1872_v41 = vsub.f32 %v5516_v18, %v1843_v57 }
 0x32c   : > { %v1890_v61 = vmul.f32 1.442695, %v1872_v41 }
 0x32f   : > { %1523 = vadd.xlane.f32.xlu2 %v5629_v28  ;;  %1862 = vmax.xlane.f32.xlu1 %v5586_v6  ;;  %v4223_v12 = vpop.eup %4222 }
 0x330   : > { %v1510_v2 = vpop.xlane.xlu0 %1509  ;;  %1858 = vmax.xlane.f32.xlu0 %v5566_v13  ;;  %v5639_v55 = vpop.eup %4224  ;;  %v1555_v39 = vmul.f32 %v4223_v12, %v5519_v49  ;;  %v1503_v49 = vmul.f32 1.442695, %v1473_v26 }
 0x331   : > { %4226 = vrcp.f32 %v1510_v2  ;;  %v5666_v63 = vpop.f32.mrf.mxu1 }
 0x332   : > { %4228 = vpow2.f32 %v1497_v19 }
 0x333   : > { %4230 = vpow2.f32 %v1888_v5 }
 0x334   : > { %4232 = vpow2.f32 %v1501_v17 }
 0x335   : > { %4234 = vpow2.f32 %v1503_v49 }
 0x337   : > { %v4227_v54 = vpop.eup %4226  ;;  %1860 = vmax.xlane.f32.xlu2 %v5575_v38  ;;  %1531 = vadd.xlane.f32.xlu1 %v5639_v55 }
 0x338   : > { %1527 = vadd.xlane.f32.xlu0 %v5635_v11  ;;  %v1556_v22 = vmul.f32 %v4227_v54, %v5528_v46  ;;  %v5648_v50 = vpop.eup %4228  ;;  %v1505_v46 = vmul.f32 1.442695, %v1474_v30 }
 0x339   : > { %v5659_v62 = vpop.eup %4230  ;;  %v5678_v18 = vpop.f32.mrf.mxu1 }
 0x33a   : > { %v1571_v36 = vpack.c.bf16 %v1556_v22, %v1555_v39  ;;  %v5661_v31 = vpop.eup %4232  ;;  %4236 = vpow2.f32 %v1505_v46  ;;  %v1512_v39 = vpop.xlane.xlu0 %1511 }
 0x33b   : > { %4238 = vpow2.f32 %v1886_v8  ;;  %v5669_v1 = vpop.eup %4234 }
 0x33c   : > { %1635 = vmatmul.bf16.vlgmr.msrb.gmra.mxu0 %v1571_v36  ;;  %4240 = vpow2.f32 %v1890_v61 }
 0x33f   : > { %1529 = vadd.xlane.f32.xlu2 %v5648_v50  ;;  %1868 = vmax.xlane.f32.xlu1 %v5627_v42 }
 0x340   : > { %1864 = vmax.xlane.f32.xlu0 %v5598_v7  ;;  %v5671_v29 = vpop.eup %4236 }
 0x341   : > { %v5673_v25 = vpop.eup %4238  ;;  %v5685_v2 = vpop.f32.mrf.mxu1 }
 0x342   : > { %v5680_v45 = vpop.eup %4240 }
 0x347   : > { %1866 = vmax.xlane.f32.xlu2 %v5613_v52  ;;  %1920 = vadd.xlane.f32.xlu1 %v5659_v62 }
 0x348   : > { %1533 = vadd.xlane.f32.xlu0 %v5661_v31 }
 0x349   : > { %v5691_v12 = vpop.f32.mrf.mxu1 }
 0x34a   : > { %6439 = vst [vmem:[#allocation32_spill] sm:$0xff] %v5691_v12 }
 0x34f   : > { %1535 = vadd.xlane.f32.xlu2 %v5669_v1  ;;  %1537 = vadd.xlane.f32.xlu1 %v5671_v29 }
 0x350   : > { %1918 = vadd.xlane.f32.xlu0 %v5673_v25 }
 0x357   : > { %2742 = vmax.xlane.f32.xlu2 %v5650_v4  ;;  %1922 = vadd.xlane.f32.xlu1 %v5680_v45 }
 0x358   : > { %2740 = vmax.xlane.f32.xlu0 %v5637_v3 }
 0x35f   : > { %2744 = vmax.xlane.f32.xlu1 %v5666_v63 }
 0x360   : > { %2746 = vmax.xlane.f32.xlu0 %v5678_v18 }
 0x362   : > { %v5689_v19 = vpop.xlane.xlu2 %2289 }
 0x367   : > { %2750 = vmax.xlane.f32.xlu1 %v5691_v12 }
 0x36a   : > { %v1845_v10 = vpop.xlane.xlu2 %1844  ;;  %v2292_v20 = vpop.xlane.xlu1 %2291 }
 0x36b   : > { %v1873_v15 = vsub.f32 %v5525_v43, %v1845_v10  ;;  %v5705_v43 = vpop.f32.mrf.mxu3  ;;  %v2322_v51 = vsub.f32 %v5562_v0, %v2292_v20 }
 0x36d   : > { %v1892_v54 = vmul.f32 1.442695, %v1873_v15 }
 0x36f   : > { %4242 = vpow2.f32 %v1892_v54 }
 0x372   : > { %v1847_v22 = vpop.xlane.xlu2 %1846  ;;  %v5701_v26 = vpop.xlane.xlu1 %1850 }
 0x373   : > { %v1874_v40 = vsub.f32 %v5533_v60, %v1847_v22  ;;  %v5699_v17 = vpop.xlane.xlu0 %2293  ;;  %v5713_v8 = vpop.f32.mrf.mxu3 }
 0x374   : > { %6440 = vst [vmem:[#allocation33_spill] sm:$0xff] %v5713_v8 }
 0x375   : > { %v5696_v36 = vpop.eup %4242  ;;  %v1894_v5 = vmul.f32 1.442695, %v1874_v40 }
 0x376   : > { %1924 = vadd.xlane.f32.xlu2 %v5696_v36 }
 0x377   : > { %4244 = vpow2.f32 %v1894_v5 }
 0x378   : > { %4246 = vrcp.f32 %v1512_v39 }
 0x37a   : > { %v5703_v30 = vpop.xlane.xlu2 %1848 }
 0x37b   : > { %v1516_v46 = vpop.xlane.xlu0 %1515 }
 0x37d   : > { %v5707_v23 = vpop.eup %4244 }
 0x37e   : > { %1926 = vadd.xlane.f32.xlu0 %v5707_v23  ;;  %2301 = vmax.xlane.f32.xlu2 %v5705_v43  ;;  %v4247_v57 = vpop.eup %4246 }
 0x37f   : > { %v1557_v15 = vmul.f32 %v4247_v57, %v5535_v32  ;;  %v2339_v57 = vmul.f32 1.442695, %v2322_v51 }
 0x382   : > { %v1514_v60 = vpop.xlane.xlu2 %1513  ;;  %v5711_v49 = vpop.xlane.xlu1 %2297 }
 0x383   : > { %4248 = vrcp.f32 %v1514_v60 }
 0x386   : > { %2303 = vmax.xlane.f32.xlu2 %v5713_v8 }
 0x389   : > { %v4249_v41 = vpop.eup %4248 }
 0x38a   : > { %v5716_v61 = vpop.xlane.xlu2 %2295  ;;  %v1520_v10 = vpop.xlane.xlu1 %1519  ;;  %v1558_v54 = vmul.f32 %v4249_v41, %v5588_v16 }
 0x38b   : > { %v5720_v22 = vpop.xlane.xlu0 %2299 }
 0x38c   : > { %v1572_v39 = vpack.c.bf16 %v1558_v54, %v1557_v15 }
 0x38e   : > { %1640 = vmatmul.bf16.gmra.mxu0 %v1572_v39 }
 0x392   : > { %v1853_v40 = vpop.xlane.xlu2 %1852  ;;  %v5722_v5 = vpop.xlane.xlu1 %1856  ;;  %2896 = vrot.lane.b32.xlu0 %v5245_v58, %s4773_s13 }
 0x393   : > { %v1877_v60 = vsub.f32 %v5548_v37, %v1853_v40  ;;  %v1855_v8 = vpop.xlane.xlu0 %1854 }
 0x395   : > { %v1900_v12 = vmul.f32 1.442695, %v1877_v60 }
 0x397   : > { %4250 = vpow2.f32 %v1900_v12 }
 0x398   : > { %4252 = vrcp.f32 %v1516_v46 }
 0x39a   : > { %v1518_v32 = vpop.xlane.xlu2 %1517  ;;  %v1526_v16 = vpop.xlane.xlu1 %1525 }
 0x39b   : > { %4254 = vrcp.f32 %v1518_v32  ;;  %v1522_v41 = vpop.xlane.xlu0 %1521 }
 0x39c   : > { %4256 = vpow2.f32 %v2339_v57 }
 0x39d   : > { %v5728_v15 = vpop.eup %4250  ;;  %4258 = vrcp.f32 %v1522_v41 }
 0x39e   : > { %1932 = vadd.xlane.f32.xlu1 %v5728_v15  ;;  %2447 = vrot.lane.b32.xlu2 %v5237_v56, %s4771_s17  ;;  %v4253_v58 = vpop.eup %4252 }
 0x39f   : > { %v1559_v0 = vmul.f32 %v4253_v58, %v5581_v21 }
 0x3a1   : > { %v4255_v37 = vpop.eup %4254 }
 0x3a2   : > { %v5733_v54 = vpop.xlane.xlu1 %1862  ;;  %v1560_v12 = vmul.f32 %v4255_v37, %v5616_v44  ;;  %v5738_v39 = vpop.eup %4256 }
 0x3a3   : > { %v1859_v20 = vpop.xlane.xlu0 %1858  ;;  %v4259_v32 = vpop.eup %4258 }
 0x3a4   : > { %v1880_v51 = vsub.f32 %v5566_v13, %v1859_v20  ;;  %v1573_v46 = vpack.c.bf16 %v1560_v12, %v1559_v0  ;;  %v1524_v57 = vpop.xlane.xlu2 %1523  ;;  %v1562_v13 = vmul.f32 %v4259_v32, %v5621_v47  ;;  %v5752_v32 = vpop.f32.mrf.mxu1 }
 0x3a6   : > { %v1906_v40 = vmul.f32 1.442695, %v1880_v51  ;;  %1645 = vmatmul.bf16.gmra.mxu0 %v1573_v46  ;;  %2371 = vadd.xlane.f32.xlu1 %v5738_v39 }
 0x3a8   : > { %4260 = vpow2.f32 %v1906_v40 }
 0x3a9   : > { %4262 = vrcp.f32 %v1520_v10  ;;  %v1878_v10 = vsub.f32 %v5553_v35, %v1855_v8 }
 0x3aa   : > { %v5741_v60 = vpop.xlane.xlu1 %1531  ;;  %4264 = vrcp.f32 %v1524_v57  ;;  %v1875_v57 = vsub.f32 %v5540_v48, %v5703_v30 }
 0x3ab   : > { %v1528_v56 = vpop.xlane.xlu0 %1527  ;;  %v1902_v51 = vmul.f32 1.442695, %v1878_v10 }
 0x3ac   : > { %v1861_v46 = vpop.xlane.xlu2 %1860 }
 0x3ad   : > { %v1881_v48 = vsub.f32 %v5575_v38, %v1861_v46 }
 0x3ae   : > { %v5743_v21 = vpop.eup %4260 }
 0x3af   : > { %v4263_v44 = vpop.eup %4262  ;;  %1938 = vadd.xlane.f32.xlu1 %v5743_v21  ;;  %v1908_v30 = vmul.f32 1.442695, %v1881_v48 }
 0x3b0   : > { %v1561_v58 = vmul.f32 %v4263_v44, %v5596_v59  ;;  %v4265_v35 = vpop.eup %4264 }
 0x3b2   : > { %v1574_v41 = vpack.c.bf16 %v1562_v13, %v1561_v58  ;;  %v5750_v12 = vpop.xlane.xlu1 %1868  ;;  %v1563_v58 = vmul.f32 %v4265_v35, %v5629_v28 }
 0x3b3   : > { %v1865_v37 = vpop.xlane.xlu0 %1864 }
 0x3b4   : > { %v1883_v0 = vsub.f32 %v5598_v7, %v1865_v37  ;;  %v2321_v7 = vsub.f32 %v5557_v53, %v5689_v19 }
 0x3b6   : > { %v1912_v20 = vmul.f32 1.442695, %v1883_v0  ;;  %1650 = vmatmul.bf16.gmra.mxu0 %v1574_v41  ;;  %v1530_v41 = vpop.xlane.xlu2 %1529 }
 0x3b8   : > { %4266 = vpow2.f32 %v1912_v20  ;;  %v1896_v20 = vmul.f32 1.442695, %v1875_v57  ;;  %v5784_v57 = vpop.f32.mrf.mxu1 }
 0x3b9   : > { %4268 = vrcp.f32 %v1526_v16  ;;  %v1636_v40 = vpop.f32.mrf.mxu0  ;;  %v2337_v16 = vmul.f32 1.442695, %v2321_v7 }
 0x3ba   : > { %v1676_v47 = vpack.c.bf16 %v1636_v40, %v1636_v40  ;;  %4270 = vpow2.f32 %v1902_v51  ;;  %v1921_v13 = vpop.xlane.xlu1 %1920 }
 0x3bb   : > { %v1534_v59 = vpop.xlane.xlu0 %1533  ;;  %4272 = vrcp.f32 %v1921_v13 }
 0x3bc   : > { %1693 = vst.msk [vmem:[#allocation4] sm:$0xf] %vm1692_vm1, %v1676_v47  ;;  %2752 = vmax.xlane.f32.xlu0 %v5752_v32  ;;  %4274 = vpow2.f32 %v2337_v16 }
 0x3be   : > { %v5758_v8 = vpop.eup %4266 }
 0x3bf   : > { %v4269_v44 = vpop.eup %4268  ;;  %1944 = vadd.xlane.f32.xlu1 %v5758_v8 }
 0x3c0   : > { %v1564_v19 = vmul.f32 %v4269_v44, %v5618_v14  ;;  %v5765_v0 = vpop.eup %4270  ;;  %v1876_v14 = vsub.f32 %v5544_v9, %v5701_v26  ;;  %v5778_v44 = vpop.xlane.xlu2 %1866 }
 0x3c1   : > { %v1638_v37 = vpop.f32.mrf.mxu0  ;;  %v4273_v28 = vpop.eup %4272 }
 0x3c2   : > { %v1677_v53 = vpack.c.bf16 %v1638_v37, %v1638_v37  ;;  %v1575_v51 = vpack.c.bf16 %v1564_v19, %v1563_v58  ;;  %v5773_v40 = vpop.eup %4274  ;;  %v1898_v7 = vmul.f32 1.442695, %v1876_v14  ;;  %v1967_v46 = vmul.f32 %v4273_v28, %v5659_v62  ;;  %v1538_v19 = vpop.xlane.xlu1 %1537 }
 0x3c3   : > { %v1919_v10 = vpop.xlane.xlu0 %1918  ;;  %v2323_v28 = vsub.f32 %v5569_v33, %v5699_v17  ;;  %v2324_v17 = vsub.f32 %v5579_v34, %v5716_v61  ;;  %v1885_v34 = vsub.f32 %v5627_v42, %v5750_v12 }
 0x3c4   : > { %1694 = vst.msk [vmem:[#allocation4 + $0x4] sm:$0xf] %vm1692_vm1, %v1677_v53  ;;  %1934 = vadd.xlane.f32.xlu0 %v5765_v0  ;;  %4276 = vrcp.f32 %v1919_v10  ;;  %v1879_v53 = vsub.f32 %v5555_v27, %v5722_v5  ;;  %v1882_v10 = vsub.f32 %v5586_v6, %v5733_v54  ;;  %v5807_v5 = vpop.f32.mrf.mxu3 }
 0x3c5   : > { %4278 = vrcp.f32 %v1530_v41 }
 0x3c6   : > { %1655 = vmatmul.bf16.gmra.mxu0 %v1575_v51  ;;  %4280 = vpow2.f32 %v1896_v20  ;;  %v1904_v41 = vmul.f32 1.442695, %v1879_v53  ;;  %v1910_v51 = vmul.f32 1.442695, %v1882_v10 }
 0x3c7   : > { %2748 = vmax.xlane.f32.xlu2 %v5685_v2  ;;  %4282 = vrcp.f32 %v1528_v56 }
 0x3c8   : > { %4284 = vpow2.f32 %v1908_v30  ;;  %v1536_v37 = vpop.xlane.xlu2 %1535 }
 0x3c9   : > { %4286 = vpow2.f32 %v1898_v7 }
 0x3ca   : > { %v4277_v47 = vpop.eup %4276  ;;  %4288 = vrcp.f32 %v1534_v59  ;;  %v1923_v6 = vpop.xlane.xlu1 %1922 }
 0x3cb   : > { %v1966_v38 = vmul.f32 %v4277_v47, %v5673_v25  ;;  %v4279_v35 = vpop.eup %4278  ;;  %4290 = vrcp.f32 %v5741_v60  ;;  %v2741_v47 = vpop.xlane.xlu0 %2740 }
 0x3cc   : > { %2369 = vadd.xlane.f32.xlu0 %v5773_v40  ;;  %v5780_v16 = vpop.eup %4280  ;;  %v1566_v56 = vmul.f32 %v4279_v35, %v5648_v50  ;;  %v5795_v50 = vld [vmem:[#allocation3 + $0x18] sm:$0xff]  ;;  %4292 = vpow2.f32 %v1904_v41  ;;  %v5818_v7 = vpop.f32.mrf.mxu3 }
 0x3cd   : > { %v1982_v9 = vpack.c.bf16 %v1967_v46, %v1966_v38  ;;  %v4283_v26 = vpop.eup %4282  ;;  %4294 = vpow2.f32 %v1910_v51 }
 0x3ce   : > { %v1565_v25 = vmul.f32 %v4283_v26, %v5635_v11  ;;  %v5787_v13 = vpop.eup %4284  ;;  %v5800_v11 = vpop.f32.mrf.mxu1  ;;  %4296 = vrcp.f32 %v1536_v37 }
 0x3cf   : > { %1928 = vadd.xlane.f32.xlu2 %v5780_v16  ;;  %2022 = vmatmul.bf16.vlgmr.msrb.gmra.mxu2 %v1982_v9  ;;  %v5790_v58 = vpop.eup %4286  ;;  %4298 = vrcp.f32 %v1538_v19 }
 0x3d0   : > { %v1576_v62 = vpack.c.bf16 %v1566_v56, %v1565_v25  ;;  %v4289_v59 = vpop.eup %4288  ;;  %v2743_v60 = vpop.xlane.xlu2 %2742  ;;  %4300 = vrcp.f32 %v1923_v6  ;;  %v2343_v56 = vmul.f32 1.442695, %v2324_v17  ;;  %v4457_v6 = vld [vmem:[#allocation3 + $0x10] sm:$0xff] }
 0x3d1   : > { %v4291_v20 = vpop.eup %4290  ;;  %v1568_v27 = vmul.f32 %v4289_v59, %v5661_v31  ;;  %v2341_v31 = vmul.f32 1.442695, %v2323_v28 }
 0x3d2   : > { %v1567_v48 = vmul.f32 %v4291_v20, %v5639_v55  ;;  %v5813_v54 = vpop.eup %4292 }
 0x3d3   : > { %v5816_v55 = vpop.eup %4294  ;;  %v5834_v19 = vpop.xlane.xlu0 %2746 }
 0x3d4   : > { %1940 = vadd.xlane.f32.xlu0 %v5787_v13  ;;  %v1577_v14 = vpack.c.bf16 %v1568_v27, %v1567_v48  ;;  %v4297_v38 = vpop.eup %4296  ;;  %v2745_v27 = vpop.xlane.xlu1 %2744 }
 0x3d5   : > { %v4299_v33 = vpop.eup %4298  ;;  %v1569_v9 = vmul.f32 %v4297_v38, %v5669_v1 }
 0x3d6   : > { %1660 = vmatmul.bf16.gmra.mxu0 %v1576_v62  ;;  %v4301_v46 = vpop.eup %4300  ;;  %v1570_v26 = vmul.f32 %v4299_v33, %v5671_v29  ;;  %v2773_v29 = vsub.f32 %v5650_v4, %v2743_v60  ;;  %v5838_v41 = vpop.f32.mrf.mxu1  ;;  %v2772_v60 = vsub.f32 %v5637_v3, %v2741_v47 }
 0x3d7   : > { %1930 = vadd.xlane.f32.xlu2 %v5790_v58  ;;  %v1968_v62 = vmul.f32 %v4301_v46, %v5680_v45  ;;  %v1916_v45 = vmul.f32 1.442695, %v1885_v34  ;;  %v5862_v3 = vpop.f32.mrf.mxu3 }
 0x3d8   : > { %2894 = vrot.lane.b32.xlu1 %v5795_v50, %s4773_s13  ;;  %v1578_v1 = vpack.c.bf16 %v1570_v26, %v1569_v9  ;;  %v2788_v28 = vmul.f32 1.442695, %v2772_v60  ;;  %v2326_v9 = vsub.f32 %v5600_v24, %v5720_v22  ;;  %v1884_v60 = vsub.f32 %v5613_v52, %v5778_v44 }
 0x3dc   : > { %2756 = vmax.xlane.f32.xlu0 %v5800_v11 }
 0x3de   : > { %v5849_v20 = vpop.f32.mrf.mxu1 }
 0x3df   : > { %2754 = vmax.xlane.f32.xlu2 %v5784_v57  ;;  %v5878_v26 = vpop.f32.mrf.mxu3 }
 0x3e4   : > { %2305 = vmax.xlane.f32.xlu0 %v5807_v5 }
 0x3e6   : > { %1665 = vmatmul.bf16.gmra.mxu0 %v1577_v14  ;;  %v2774_v14 = vsub.f32 %v5666_v63, %v2745_v27  ;;  %v5865_v63 = vld [vmem:[#allocation3] sm:$0xff] }
 0x3e7   : > { %1936 = vadd.xlane.f32.xlu2 %v5813_v54 }
 0x3e9   : > { %v1925_v30 = vpop.xlane.xlu2 %1924 }
 0x3ea   : > { %4302 = vrcp.f32 %v1925_v30  ;;  %v5859_v30 = vpop.f32.mrf.mxu1 }
 0x3eb   : > { %4304 = vpow2.f32 %v2341_v31  ;;  %v2792_v31 = vmul.f32 1.442695, %v2774_v14 }
 0x3ec   : > { %2307 = vmax.xlane.f32.xlu0 %v5818_v7  ;;  %4306 = vpow2.f32 %v2343_v56  ;;  %v2347_v56 = vmul.f32 1.442695, %v2326_v9 }
 0x3ed   : > { %4308 = vpow2.f32 %v1916_v45 }
 0x3ef   : > { %1942 = vadd.xlane.f32.xlu2 %v5816_v55 }
 0x3f0   : > { %v4303_v35 = vpop.eup %4302 }
 0x3f1   : > { %v5826_v25 = vpop.xlane.xlu2 %2301  ;;  %v1969_v37 = vmul.f32 %v4303_v35, %v5696_v36  ;;  %v5830_v53 = vpop.eup %4304  ;;  %v2790_v36 = vmul.f32 1.442695, %v2773_v29 }
 0x3f2   : > { %v5842_v10 = vpop.eup %4306  ;;  %v5844_v42 = vpop.xlane.xlu0 %1926 }
 0x3f3   : > { %v1983_v61 = vpack.c.bf16 %v1969_v37, %v1968_v62  ;;  %4310 = vpow2.f32 %v2790_v36  ;;  %v5847_v12 = vpop.eup %4308  ;;  %v5884_v62 = vpop.xlane.xlu1 %2750 }
 0x3f4   : > { %2373 = vadd.xlane.f32.xlu0 %v5830_v53  ;;  %4312 = vpow2.f32 %v2788_v28  ;;  %v5886_v37 = vpop.f32.mrf.mxu3 }
 0x3f5   : > { %2027 = vmatmul.bf16.gmra.mxu2 %v1983_v61  ;;  %4314 = vpow2.f32 %v2792_v31 }
 0x3f6   : > { %1670 = vmatmul.bf16.gmra.mxu0 %v1578_v1  ;;  %4316 = vpow2.f32 %v2347_v56 }
 0x3f9   : > { %v5840_v59 = vpop.xlane.xlu2 %2303  ;;  %v5852_v51 = vpop.eup %4310 }
 0x3fa   : > { %v5869_v47 = vpop.eup %4312 }
 0x3fb   : > { %v5872_v17 = vpop.eup %4314 }
 0x3fc   : > { %2375 = vadd.xlane.f32.xlu0 %v5842_v10  ;;  %v5889_v24 = vpop.eup %4316  ;;  %v5898_v1 = vpop.f32.mrf.mxu3 }
 0x401   : > { %v2448_v4 = vpop.permute.xlu2 %2447 }
 0x402   : > { %1948 = vadd.xlane.f32.xlu1 %v5847_v12  ;;  %2469 = vmatpush.bf16.msra.mxu0 %v2448_v4 }
 0x404   : > { %v2897_v48 = vpop.permute.xlu0 %2896  ;;  %2822 = vadd.xlane.f32.xlu0 %v5852_v51 }
 0x405   : > { %2921 = vmatpush.bf16.msra.mxu2 %v2897_v48 }
 0x407   : > { %2445 = vrot.lane.b32.xlu2 %v4457_v6, %s4771_s17  ;;  %v1914_v6 = vmul.f32 1.442695, %v1884_v60 }
 0x40a   : > { %2758 = vmax.xlane.f32.xlu1 %v5838_v41 }
 0x40b   : > { %v1641_v38 = vpop.f32.mrf.mxu0 }
 0x40c   : > { %v1678_v33 = vpack.c.bf16 %v1641_v38, %v1641_v38  ;;  %2762 = vmax.xlane.f32.xlu0 %v5859_v30 }
 0x40e   : > { %1695 = vst.msk [vmem:[#allocation4 + $0x8] sm:$0xf] %vm1692_vm1, %v1678_v33 }
 0x40f   : > { %2892 = vrot.lane.b32.xlu2 %v5865_v63, %s4773_s13 }
 0x411   : > { %v5892_v61 = vpop.xlane.xlu1 %1932 }
 0x412   : > { %2820 = vadd.xlane.f32.xlu1 %v5869_v47 }
 0x413   : > { %v1643_v46 = vpop.f32.mrf.mxu0 }
 0x414   : > { %v1679_v35 = vpack.c.bf16 %v1643_v46, %v1643_v46  ;;  %2824 = vadd.xlane.f32.xlu0 %v5872_v17 }
 0x416   : > { %1696 = vst.msk [vmem:[#allocation4 + $0xc] sm:$0xf] %vm1692_vm1, %v1679_v35 }
 0x417   : > { %2443 = vrot.lane.b32.xlu2 %v5795_v50, %s4771_s17  ;;  %v5895_v50 = vpop.f32.mrf.mxu1 }
 0x419   : > { %v2372_v4 = vpop.xlane.xlu1 %2371 }
 0x41a   : > { %2760 = vmax.xlane.f32.xlu1 %v5849_v20 }
 0x41c   : > { %2309 = vmax.xlane.f32.xlu0 %v5862_v3 }
 0x41f   : > { %v5906_v31 = vpop.f32.mrf.mxu1 }
 0x422   : > { %2311 = vmax.xlane.f32.xlu1 %v5878_v26  ;;  %v5912_v46 = vpop.xlane.xlu1 %1938 }
 0x423   : > { %v1646_v22 = vpop.f32.mrf.mxu0 }
 0x424   : > { %v1680_v34 = vpack.c.bf16 %v1646_v22, %v1646_v22  ;;  %2379 = vadd.xlane.f32.xlu0 %v5889_v24  ;;  %v2327_v22 = vsub.f32 %v5705_v43, %v5826_v25 }
 0x426   : > { %1697 = vst.msk [vmem:[#allocation4 + $0x10] sm:$0xf] %vm1692_vm1, %v1680_v34 }
 0x42a   : > { %2764 = vmax.xlane.f32.xlu1 %v5895_v50 }
 0x42b   : > { %v1648_v29 = vpop.f32.mrf.mxu0 }
 0x42c   : > { %v1681_v45 = vpack.c.bf16 %v1648_v29, %v1648_v29  ;;  %2315 = vmax.xlane.f32.xlu0 %v5898_v1  ;;  %v5922_v29 = vpop.f32.mrf.mxu1 }
 0x42e   : > { %1698 = vst.msk [vmem:[#allocation4 + $0x14] sm:$0xf] %vm1692_vm1, %v1681_v45 }
 0x42f   : > { %v2753_v36 = vpop.xlane.xlu0 %2752 }
 0x430   : > { %v2778_v27 = vsub.f32 %v5752_v32, %v2753_v36  ;;  %v2349_v36 = vmul.f32 1.442695, %v2327_v22 }
 0x432   : > { %v2800_v48 = vmul.f32 1.442695, %v2778_v27 }
 0x433   : > { %v1651_v14 = vpop.f32.mrf.mxu0 }
 0x434   : > { %4318 = vpow2.f32 %v2800_v48  ;;  %v1682_v28 = vpack.c.bf16 %v1651_v14, %v1651_v14 }
 0x435   : > { %4320 = vpow2.f32 %v1914_v6 }
 0x436   : > { %1699 = vst.msk [vmem:[#allocation4 + $0x18] sm:$0xf] %vm1692_vm1, %v1682_v28  ;;  %4322 = vrcp.f32 %v2372_v4 }
 0x437   : > { %v5908_v38 = vpop.xlane.xlu0 %1934 }
 0x43a   : > { %v5910_v33 = vpop.eup %4318  ;;  %v2749_v32 = vpop.xlane.xlu2 %2748 }
 0x43b   : > { %v2776_v35 = vsub.f32 %v5685_v2, %v2749_v32  ;;  %v1653_v52 = vpop.f32.mrf.mxu0  ;;  %2832 = vadd.xlane.f32.xlu0 %v5910_v33  ;;  %v5917_v56 = vpop.eup %4320 }
 0x43c   : > { %v1683_v44 = vpack.c.bf16 %v1653_v52, %v1653_v52  ;;  %v5925_v2 = vpop.xlane.xlu1 %1944  ;;  %v4323_v27 = vpop.eup %4322 }
 0x43d   : > { %v2796_v9 = vmul.f32 1.442695, %v2776_v35 }
 0x43e   : > { %1700 = vst.msk [vmem:[#allocation4 + $0x1c] sm:$0xf] %vm1692_vm1, %v1683_v44 }
 0x43f   : > { %4324 = vpow2.f32 %v2796_v9  ;;  %v2370_v34 = vpop.xlane.xlu0 %2369 }
 0x440   : > { %4326 = vrcp.f32 %v2370_v34  ;;  %1946 = vadd.xlane.f32.xlu2 %v5917_v56 }
 0x441   : > { %4328 = vrcp.f32 %v5844_v42  ;;  %v5933_v42 = vmul.f32 %v4323_v27, %v5738_v39 }
 0x442   : > { %v1929_v45 = vpop.xlane.xlu2 %1928 }
 0x443   : > { %4330 = vrcp.f32 %v1929_v45  ;;  %v1656_v4 = vpop.f32.mrf.mxu0  ;;  %2768 = vmax.xlane.f32.xlu0 %v5922_v29 }
 0x444   : > { %v1684_v60 = vpack.c.bf16 %v1656_v4, %v1656_v4  ;;  %4332 = vpow2.f32 %v2349_v36 }
 0x445   : > { %v5928_v43 = vpop.eup %4324 }
 0x446   : > { %v4327_v25 = vpop.eup %4326  ;;  %1701 = vst.msk [vmem:[#allocation4 + $0x20] sm:$0xf] %vm1692_vm1, %v1684_v60  ;;  %2828 = vadd.xlane.f32.xlu1 %v5928_v43 }
 0x447   : > { %v4329_v48 = vpop.eup %4328  ;;  %v5936_v14 = vmul.f32 %v4327_v25, %v5773_v40  ;;  %v1941_v28 = vpop.xlane.xlu0 %1940 }
 0x448   : > { %v1970_v44 = vmul.f32 %v4329_v48, %v5707_v23 }
 0x449   : > { %v4331_v6 = vpop.eup %4330  ;;  %v2433_v32 = vpack.c.bf16 %v5933_v42, %v5936_v14 }
 0x44a   : > { %v2895_v35 = vpop.permute.xlu1 %2894  ;;  %v1931_v52 = vpop.xlane.xlu2 %1930  ;;  %v1971_v9 = vmul.f32 %v4331_v6, %v5780_v16 }
 0x44b   : > { %2922 = vmatpush.bf16.msra.mxu2 %v2895_v35  ;;  %v1658_v22 = vpop.f32.mrf.mxu0  ;;  %v5942_v39 = vpop.eup %4332  ;;  %4334 = vrcp.f32 %v1931_v52 }
 0x44c   : > { %v1685_v34 = vpack.c.bf16 %v1658_v22, %v1658_v22  ;;  %v1984_v45 = vpack.c.bf16 %v1971_v9, %v1970_v44  ;;  %4336 = vrcp.f32 %v5892_v61 }
 0x44e   : > { %1702 = vst.msk [vmem:[#allocation4 + $0x24] sm:$0xf] %vm1692_vm1, %v1685_v34  ;;  %2032 = vmatmul.bf16.gmra.mxu2 %v1984_v45  ;;  %2381 = vadd.xlane.f32.xlu1 %v5942_v39 }
 0x44f   : > { %v5946_v40 = vpop.xlane.xlu0 %2756 }
 0x451   : > { %v4335_v27 = vpop.eup %4334 }
 0x452   : > { %v2755_v36 = vpop.xlane.xlu2 %2754  ;;  %v4337_v25 = vpop.eup %4336  ;;  %v1972_v6 = vmul.f32 %v4335_v27, %v5790_v58 }
 0x453   : > { %v2779_v23 = vsub.f32 %v5784_v57, %v2755_v36  ;;  %v1661_v16 = vpop.f32.mrf.mxu0  ;;  %v1973_v61 = vmul.f32 %v4337_v25, %v5728_v15  ;;  %v5962_v36 = vpop.f32.mrf.mxu1 }
 0x454   : > { %v1686_v4 = vpack.c.bf16 %v1661_v16, %v1661_v16 }
 0x455   : > { %v2802_v60 = vmul.f32 1.442695, %v2779_v23  ;;  %v1985_v44 = vpack.c.bf16 %v1973_v61, %v1972_v6  ;;  %v5969_v61 = vpop.f32.mrf.mxu3 }
 0x456   : > { %1703 = vst.msk [vmem:[#allocation4 + $0x28] sm:$0xf] %vm1692_vm1, %v1686_v4 }
 0x457   : > { %4338 = vpow2.f32 %v2802_v60  ;;  %v5951_v48 = vpop.xlane.xlu0 %2305 }
 0x458   : > { %2441 = vrot.lane.b32.xlu2 %v5865_v63, %s4771_s17 }
 0x45a   : > { %v1937_v35 = vpop.xlane.xlu2 %1936 }
 0x45b   : > { %v1663_v52 = vpop.f32.mrf.mxu0  ;;  %4340 = vrcp.f32 %v1937_v35 }
 0x45c   : > { %v1687_v57 = vpack.c.bf16 %v1663_v52, %v1663_v52  ;;  %4342 = vrcp.f32 %v5908_v38 }
 0x45d   : > { %v5957_v9 = vpop.eup %4338  ;;  %4344 = vrcp.f32 %v1941_v28 }
 0x45e   : > { %1704 = vst.msk [vmem:[#allocation4 + $0x2c] sm:$0xf] %vm1692_vm1, %v1687_v57  ;;  %2037 = vmatmul.bf16.gmra.mxu2 %v1985_v44  ;;  %2834 = vadd.xlane.f32.xlu1 %v5957_v9 }
 0x45f   : > { %v2308_v22 = vpop.xlane.xlu0 %2307 }
 0x460   : > { %v2330_v23 = vsub.f32 %v5818_v7, %v2308_v22 }
 0x461   : > { %v4341_v45 = vpop.eup %4340 }
 0x462   : > { %v1943_v63 = vpop.xlane.xlu2 %1942  ;;  %v4343_v15 = vpop.eup %4342  ;;  %v1975_v4 = vmul.f32 %v4341_v45, %v5813_v54  ;;  %v2355_v38 = vmul.f32 1.442695, %v2330_v23  ;;  %v6441_v23 = vld [vmem:[#allocation31_spill] sm:$0xff] }
 0x463   : > { %v1666_v34 = vpop.f32.mrf.mxu0  ;;  %v1974_v60 = vmul.f32 %v4343_v15, %v5765_v0  ;;  %v2775_v0 = vsub.f32 %v5678_v18, %v5834_v19  ;;  %v4345_v52 = vpop.eup %4344 }
 0x464   : > { %v1688_v58 = vpack.c.bf16 %v1666_v34, %v1666_v34 }
 0x465   : > { %v1986_v35 = vpack.c.bf16 %v1975_v4, %v1974_v60  ;;  %v2794_v45 = vmul.f32 1.442695, %v2775_v0  ;;  %v1977_v4 = vmul.f32 %v4345_v52, %v5787_v13  ;;  %v2329_v52 = vsub.f32 %v5807_v5, %v5951_v48 }
 0x466   : > { %1705 = vst.msk [vmem:[#allocation4 + $0x30] sm:$0xf] %vm1692_vm1, %v1688_v58  ;;  %2770 = vmax.xlane.f32.xlu1 %v5962_v36 }
 0x467   : > { %v2374_v16 = vpop.xlane.xlu0 %2373 }
 0x468   : > { %4346 = vrcp.f32 %v2374_v16  ;;  %v2325_v16 = vsub.f32 %v6441_v23, %v5711_v49 }
 0x469   : > { %4348 = vpow2.f32 %v2355_v38 }
 0x46a   : > { %v2446_v27 = vpop.permute.xlu2 %2445 }
 0x46b   : > { %v1668_v25 = vpop.f32.mrf.mxu0  ;;  %2470 = vmatpush.bf16.msra.mxu0 %v2446_v27 }
 0x46c   : > { %v1689_v6 = vpack.c.bf16 %v1668_v25, %v1668_v25 }
 0x46e   : > { %1706 = vst.msk [vmem:[#allocation4 + $0x34] sm:$0xf] %vm1692_vm1, %v1689_v6  ;;  %2042 = vmatmul.bf16.gmra.mxu2 %v1986_v35  ;;  %2317 = vmax.xlane.f32.xlu1 %v5969_v61  ;;  %v4347_v44 = vpop.eup %4346  ;;  %v2345_v6 = vmul.f32 1.442695, %v2325_v16 }
 0x46f   : > { %v2376_v7 = vpop.xlane.xlu0 %2375  ;;  %v5976_v22 = vpop.eup %4348  ;;  %v5985_v18 = vmul.f32 %v4347_v44, %v5830_v53 }
 0x470   : > { %4350 = vrcp.f32 %v2376_v7 }
 0x471   : > { %4352 = vrcp.f32 %v5912_v46 }
 0x472   : > { %v2893_v54 = vpop.permute.xlu2 %2892  ;;  %4354 = vpow2.f32 %v2794_v45 }
 0x473   : > { %v1671_v57 = vpop.f32.mrf.mxu0  ;;  %2923 = vmatpush.bf16.msra.mxu2 %v2893_v54  ;;  %4356 = vrcp.f32 %v1943_v63  ;;  %v6442_v54 = vld [vmem:[#allocation32_spill] sm:$0xff] }
 0x474   : > { %v1690_v28 = vpack.c.bf16 %v1671_v57, %v1671_v57  ;;  %4358 = vpow2.f32 %v2345_v6 }
 0x475   : > { %v5978_v34 = vpop.xlane.xlu1 %1948  ;;  %4360 = vrcp.f32 %v5925_v2 }
 0x476   : > { %v4351_v58 = vpop.eup %4350  ;;  %1707 = vst.msk [vmem:[#allocation4 + $0x38] sm:$0xf] %vm1692_vm1, %v1690_v28  ;;  %2387 = vadd.xlane.f32.xlu1 %v5976_v22  ;;  %v2353_v28 = vmul.f32 1.442695, %v2329_v52 }
 0x477   : > { %v4353_v46 = vpop.eup %4352  ;;  %v5982_v15 = vpop.xlane.xlu0 %2822  ;;  %v5988_v19 = vmul.f32 %v4351_v58, %v5842_v10 }
 0x478   : > { %v1976_v38 = vmul.f32 %v4353_v46, %v5743_v21  ;;  %v5998_v13 = vpop.eup %4354  ;;  %v2777_v21 = vsub.f32 %v6442_v54, %v5884_v62 }
 0x479   : > { %v2434_v27 = vpack.c.bf16 %v5988_v19, %v5985_v18  ;;  %v4357_v57 = vpop.eup %4356 }
 0x47a   : > { %v2444_v60 = vpop.permute.xlu2 %2443  ;;  %v1987_v35 = vpack.c.bf16 %v1977_v4, %v1976_v38  ;;  %v6008_v63 = vpop.eup %4358  ;;  %v1978_v62 = vmul.f32 %v4357_v57, %v5816_v55 }
 0x47b   : > { %v1673_v25 = vpop.f32.mrf.mxu0  ;;  %2471 = vmatpush.bf16.msra.mxu0 %v2444_v60  ;;  %v4361_v58 = vpop.eup %4360 }
 0x47c   : > { %v1691_v53 = vpack.c.bf16 %v1673_v25, %v1673_v25  ;;  %v1979_v2 = vmul.f32 %v4361_v58, %v5758_v8 }
 0x47d   : > { %v2759_v7 = vpop.xlane.xlu1 %2758 }
 0x47e   : > { %1708 = vst.msk [vmem:[#allocation4 + $0x3c] sm:$0xf] %vm1692_vm1, %v1691_v53  ;;  %v2781_v10 = vsub.f32 %v5838_v41, %v2759_v7  ;;  %2047 = vmatmul.bf16.gmra.mxu2 %v1987_v35  ;;  %v2798_v41 = vmul.f32 1.442695, %v2777_v21  ;;  %v1988_v48 = vpack.c.bf16 %v1979_v2, %v1978_v62  ;;  %v6443_v53 = vld [vmem:[#allocation33_spill] sm:$0xff]  ;;  %v2780_v21 = vsub.f32 %v5800_v11, %v5946_v40 }
 0x47f   : > { %v2763_v49 = vpop.xlane.xlu0 %2762  ;;  %v2328_v35 = vsub.f32 %v6443_v53, %v5840_v59 }
 0x480   : > { %v2806_v0 = vmul.f32 1.442695, %v2781_v10  ;;  %v2783_v5 = vsub.f32 %v5859_v30, %v2763_v49  ;;  %v2804_v52 = vmul.f32 1.442695, %v2780_v21 }
 0x481   : > { %2826 = vadd.xlane.f32.xlu2 %v5998_v13  ;;  %v2351_v7 = vmul.f32 1.442695, %v2328_v35 }
 0x482   : > { %4362 = vpow2.f32 %v2806_v0  ;;  %v2810_v16 = vmul.f32 1.442695, %v2783_v5  ;;  %v6056_v5 = vpop.f32.mrf.mxu3 }
 0x483   : > { %4364 = vpow2.f32 %v2798_v41 }
 0x484   : > { %4366 = vpow2.f32 %v2353_v28 }
 0x485   : > { %v6006_v44 = vpop.xlane.xlu1 %2820  ;;  %4368 = vpow2.f32 %v2810_v16 }
 0x487   : > { %v6010_v45 = vpop.xlane.xlu0 %2824 }
 0x488   : > { %v6012_v46 = vpop.eup %4362 }
 0x489   : > { %2838 = vadd.xlane.f32.xlu0 %v6012_v46  ;;  %2377 = vadd.xlane.f32.xlu2 %v6008_v63  ;;  %v6019_v4 = vpop.eup %4364 }
 0x48a   : > { %v6021_v38 = vpop.eup %4366 }
 0x48b   : > { %v6028_v6 = vpop.eup %4368 }
 0x48d   : > { %v2761_v23 = vpop.xlane.xlu1 %2760 }
 0x48e   : > { %2052 = vmatmul.bf16.gmra.mxu2 %v1988_v48 }
 0x48f   : > { %v2310_v60 = vpop.xlane.xlu0 %2309 }
 0x490   : > { %v2331_v55 = vsub.f32 %v5862_v3, %v2310_v60 }
 0x491   : > { %2385 = vadd.xlane.f32.xlu0 %v6021_v38  ;;  %2830 = vadd.xlane.f32.xlu2 %v6019_v4 }
 0x492   : > { %v2357_v25 = vmul.f32 1.442695, %v2331_v55 }
 0x494   : > { %4370 = vpow2.f32 %v2357_v25 }
 0x495   : > { %v2312_v30 = vpop.xlane.xlu1 %2311  ;;  %4372 = vpow2.f32 %v2351_v7 }
 0x496   : > { %v2332_v48 = vsub.f32 %v5878_v26, %v2312_v30 }
 0x497   : > { %v6026_v8 = vpop.xlane.xlu0 %2379 }
 0x499   : > { %2842 = vadd.xlane.f32.xlu0 %v6028_v6  ;;  %2766 = vmax.xlane.f32.xlu2 %v5906_v31 }
 0x49a   : > { %v6034_v3 = vpop.eup %4370 }
 0x49b   : > { %2389 = vadd.xlane.f32.xlu1 %v6034_v3  ;;  %v6042_v41 = vpop.eup %4372 }
 0x49d   : > { %v2765_v10 = vpop.xlane.xlu1 %2764 }
 0x49e   : > { %v2784_v49 = vsub.f32 %v5895_v50, %v2765_v10 }
 0x49f   : > { %v2316_v0 = vpop.xlane.xlu0 %2315 }
 0x4a0   : > { %v2812_v54 = vmul.f32 1.442695, %v2784_v49  ;;  %v2334_v59 = vsub.f32 %v5898_v1, %v2316_v0  ;;  %v2782_v1 = vsub.f32 %v5849_v20, %v2761_v23  ;;  %v2359_v20 = vmul.f32 1.442695, %v2332_v48 }
 0x4a1   : > { %2313 = vmax.xlane.f32.xlu2 %v5886_v37 }
 0x4a2   : > { %4374 = vpow2.f32 %v2812_v54  ;;  %v2363_v57 = vmul.f32 1.442695, %v2334_v59  ;;  %v2808_v58 = vmul.f32 1.442695, %v2782_v1 }
 0x4a3   : > { %4376 = vpow2.f32 %v2804_v52 }
 0x4a4   : > { %4378 = vpow2.f32 %v2363_v57 }
 0x4a5   : > { %4380 = vrcp.f32 %v5978_v34 }
 0x4a8   : > { %v6044_v28 = vpop.eup %4374 }
 0x4a9   : > { %2844 = vadd.xlane.f32.xlu0 %v6044_v28  ;;  %2383 = vadd.xlane.f32.xlu2 %v6042_v41  ;;  %v6048_v50 = vpop.eup %4376 }
 0x4aa   : > { %v6050_v11 = vpop.eup %4378 }
 0x4ab   : > { %v4381_v62 = vpop.eup %4380 }
 0x4ac   : > { %v1981_v55 = vmul.f32 %v4381_v62, %v5847_v12 }
 0x4ae   : > { %v2833_v1 = vpop.xlane.xlu0 %2832 }
 0x4b1   : > { %2395 = vadd.xlane.f32.xlu0 %v6050_v11  ;;  %2836 = vadd.xlane.f32.xlu2 %v6048_v50 }
 0x4b3   : > { %v1947_v40 = vpop.xlane.xlu2 %1946 }
 0x4b4   : > { %4382 = vrcp.f32 %v1947_v40 }
 0x4b5   : > { %4384 = vpow2.f32 %v2808_v58 }
 0x4b6   : > { %4386 = vrcp.f32 %v6006_v44 }
 0x4b7   : > { %4388 = vrcp.f32 %v5982_v15  ;;  %v6080_v15 = vpop.f32.mrf.mxu2 }
 0x4b8   : > { %4390 = vpow2.f32 %v2359_v20 }
 0x4b9   : > { %2319 = vmax.xlane.f32.xlu2 %v6056_v5  ;;  %v2829_v23 = vpop.xlane.xlu1 %2828 }
 0x4ba   : > { %v4383_v2 = vpop.eup %4382 }
 0x4bb   : > { %v2442_v16 = vpop.permute.xlu2 %2441  ;;  %v1980_v60 = vmul.f32 %v4383_v2, %v5917_v56  ;;  %v6065_v25 = vpop.eup %4384 }
 0x4bc   : > { %2472 = vmatpush.bf16.msra.mxu0 %v2442_v16  ;;  %v4387_v26 = vpop.eup %4386 }
 0x4bd   : > { %v1989_v34 = vpack.c.bf16 %v1981_v55, %v1980_v60  ;;  %v4389_v12 = vpop.eup %4388  ;;  %v2868_v30 = vmul.f32 %v4387_v26, %v5869_v47  ;;  %v2769_v60 = vpop.xlane.xlu0 %2768 }
 0x4be   : > { %v6070_v56 = vpop.eup %4390  ;;  %v2869_v42 = vmul.f32 %v4389_v12, %v5852_v51 }
 0x4bf   : > { %2057 = vmatmul.bf16.gmra.mxu2 %v1989_v34  ;;  %2473 = vmatmul.bf16.vlgmr.msra.gmra.mxu0 %v2433_v32  ;;  %v6084_v35 = vpop.f32.mrf.mxu2 }
 0x4c0   : > { %v2884_v14 = vpack.c.bf16 %v2869_v42, %v2868_v30 }
 0x4c1   : > { %2840 = vadd.xlane.f32.xlu2 %v6065_v25  ;;  %v6073_v53 = vpop.xlane.xlu1 %2381 }
 0x4c7   : > { %v6087_v49 = vpop.f32.mrf.mxu2 }
 0x4c9   : > { %2391 = vadd.xlane.f32.xlu2 %v6070_v56 }
 0x4cf   : > { %2478 = vmatmul.bf16.gmra.mxu0 %v2434_v27  ;;  %2924 = vmatmul.bf16.vlgmr.msra.gmra.mxu2 %v2884_v14  ;;  %v2030_v18 = vpop.f32.mrf.mxu2 }
 0x4d0   : > { %v2066_v57 = vpack.c.bf16 %v2030_v18, %v2030_v18 }
 0x4d1   : > { %v2835_v32 = vpop.xlane.xlu1 %2834 }
 0x4d7   : > { %v6093_v54 = vpop.f32.mrf.mxu2 }
 0x4d9   : > { %v6082_v44 = vpop.xlane.xlu1 %2770 }
 0x4df   : > { %v6099_v62 = vpop.f32.mrf.mxu2 }
 0x4e1   : > { %v2318_v47 = vpop.xlane.xlu1 %2317 }
 0x4e2   : > { %v2335_v7 = vsub.f32 %v5969_v61, %v2318_v47 }
 0x4e4   : > { %v2365_v10 = vmul.f32 1.442695, %v2335_v7 }
 0x4e6   : > { %4392 = vpow2.f32 %v2365_v10 }
 0x4e7   : > { %4394 = vrcp.f32 %v6010_v45 }
 0x4ec   : > { %v6089_v51 = vpop.eup %4392 }
 0x4ed   : > { %2397 = vadd.xlane.f32.xlu0 %v6089_v51  ;;  %v4395_v27 = vpop.eup %4394 }
 0x4ee   : > { %v2870_v21 = vmul.f32 %v4395_v27, %v5872_v17 }
 0x4f4   : > { %v2827_v19 = vpop.xlane.xlu2 %2826 }
 0x4f5   : > { %4396 = vrcp.f32 %v2827_v19 }
 0x4f6   : > { %4398 = vrcp.f32 %v6026_v8 }
 0x4fb   : > { %v4397_v0 = vpop.eup %4396 }
 0x4fc   : > { %v2378_v61 = vpop.xlane.xlu2 %2377  ;;  %v2871_v59 = vmul.f32 %v4397_v0, %v5998_v13  ;;  %v4399_v45 = vpop.eup %4398 }
 0x4fd   : > { %4400 = vrcp.f32 %v2378_v61  ;;  %v2422_v2 = vmul.f32 %v4399_v45, %v5889_v24  ;;  %v2839_v7 = vpop.xlane.xlu0 %2838 }
 0x4fe   : > { %v2885_v52 = vpack.c.bf16 %v2871_v59, %v2870_v21  ;;  %4402 = vrcp.f32 %v2829_v23  ;;  %v6106_v23 = vpop.f32.mrf.mxu2 }
 0x500   : > { %2929 = vmatmul.bf16.gmra.mxu2 %v2885_v52 }
 0x501   : > { %2101 = vrot.lane.b32.xlu0 %v2066_v57, %s4773_s13  ;;  %v2388_v57 = vpop.xlane.xlu1 %2387 }
 0x503   : > { %v4401_v40 = vpop.eup %4400 }
 0x504   : > { %v2831_v58 = vpop.xlane.xlu2 %2830  ;;  %v2421_v8 = vmul.f32 %v4401_v40, %v6008_v63  ;;  %v4403_v13 = vpop.eup %4402  ;;  %v2786_v63 = vsub.f32 %v5922_v29, %v2769_v60 }
 0x505   : > { %4404 = vrcp.f32 %v2831_v58  ;;  %v2872_v34 = vmul.f32 %v4403_v13, %v5928_v43  ;;  %v2386_v21 = vpop.xlane.xlu0 %2385 }
 0x506   : > { %v2435_v17 = vpack.c.bf16 %v2422_v2, %v2421_v8  ;;  %v2816_v24 = vmul.f32 1.442695, %v2786_v63  ;;  %v6115_v47 = vpop.f32.mrf.mxu2 }
 0x508   : > { %2483 = vmatmul.bf16.gmra.mxu0 %v2435_v17 }
 0x50b   : > { %v4405_v48 = vpop.eup %4404 }
 0x50c   : > { %v2767_v16 = vpop.xlane.xlu2 %2766  ;;  %v2873_v20 = vmul.f32 %v4405_v48, %v6019_v4  ;;  %v2787_v4 = vsub.f32 %v5962_v36, %v6082_v44 }
 0x50d   : > { %v2785_v55 = vsub.f32 %v5906_v31, %v2767_v16  ;;  %v2843_v48 = vpop.xlane.xlu0 %2842 }
 0x50e   : > { %v2886_v12 = vpack.c.bf16 %v2873_v20, %v2872_v34  ;;  %v2818_v10 = vmul.f32 1.442695, %v2787_v4  ;;  %v6126_v36 = vpop.f32.mrf.mxu2 }
 0x50f   : > { %v2814_v26 = vmul.f32 1.442695, %v2785_v55 }
 0x510   : > { %2934 = vmatmul.bf16.gmra.mxu2 %v2886_v12 }
 0x511   : > { %4406 = vpow2.f32 %v2814_v26 }
 0x512   : > { %4408 = vrcp.f32 %v2835_v32 }
 0x513   : > { %4410 = vrcp.f32 %v2833_v1 }
 0x514   : > { %v2314_v30 = vpop.xlane.xlu2 %2313  ;;  %4412 = vpow2.f32 %v2816_v24 }
 0x515   : > { %v2333_v42 = vsub.f32 %v5886_v37, %v2314_v30 }
 0x516   : > { %v6133_v58 = vpop.f32.mrf.mxu2 }
 0x517   : > { %v6110_v14 = vpop.eup %4406  ;;  %v2361_v31 = vmul.f32 1.442695, %v2333_v42 }
 0x518   : > { %v4409_v43 = vpop.eup %4408  ;;  %2846 = vadd.xlane.f32.xlu1 %v6110_v14 }
 0x519   : > { %4414 = vpow2.f32 %v2361_v31  ;;  %v4411_v29 = vpop.eup %4410  ;;  %v2875_v32 = vmul.f32 %v4409_v43, %v5957_v9 }
 0x51a   : > { %4416 = vrcp.f32 %v6073_v53  ;;  %v2874_v18 = vmul.f32 %v4411_v29, %v5910_v33  ;;  %v6120_v19 = vpop.eup %4412 }
 0x51c   : > { %v2384_v37 = vpop.xlane.xlu2 %2383  ;;  %v2887_v0 = vpack.c.bf16 %v2875_v32, %v2874_v18 }
 0x51d   : > { %4418 = vrcp.f32 %v2384_v37 }
 0x51e   : > { %4420 = vpow2.f32 %v2818_v10 }
 0x51f   : > { %v6122_v27 = vpop.eup %4414  ;;  %4422 = vrcp.f32 %v2839_v7 }
 0x520   : > { %2848 = vadd.xlane.f32.xlu1 %v6120_v19  ;;  %2393 = vadd.xlane.f32.xlu2 %v6122_v27  ;;  %v4417_v9 = vpop.eup %4416 }
 0x521   : > { %2939 = vmatmul.bf16.gmra.mxu2 %v2887_v0  ;;  %v2423_v33 = vmul.f32 %v4417_v9, %v5942_v39 }
 0x523   : > { %v4419_v53 = vpop.eup %4418 }
 0x524   : > { %v2837_v44 = vpop.xlane.xlu2 %2836  ;;  %v2424_v61 = vmul.f32 %v4419_v53, %v6042_v41  ;;  %v6130_v59 = vpop.eup %4420  ;;  %v2069_v53 = vpack.c.bf16 %v6106_v23, %v6106_v23 }
 0x525   : > { %4424 = vrcp.f32 %v2837_v44  ;;  %v4423_v45 = vpop.eup %4422 }
 0x526   : > { %v2436_v52 = vpack.c.bf16 %v2424_v61, %v2423_v33  ;;  %4426 = vrcp.f32 %v2386_v21  ;;  %v2877_v8 = vmul.f32 %v4423_v45, %v6012_v46  ;;  %v2390_v46 = vpop.xlane.xlu1 %2389 }
 0x527   : > { %4428 = vrcp.f32 %v2388_v57 }
 0x528   : > { %2850 = vadd.xlane.f32.xlu2 %v6130_v59  ;;  %2488 = vmatmul.bf16.gmra.mxu0 %v2436_v52 }
 0x52b   : > { %v4425_v1 = vpop.eup %4424 }
 0x52c   : > { %v2320_v40 = vpop.xlane.xlu2 %2319  ;;  %v2876_v41 = vmul.f32 %v4425_v1, %v6048_v50  ;;  %v4427_v13 = vpop.eup %4426 }
 0x52d   : > { %v2336_v39 = vsub.f32 %v6056_v5, %v2320_v40  ;;  %v4429_v16 = vpop.eup %4428  ;;  %v2425_v60 = vmul.f32 %v4427_v13, %v6021_v38  ;;  %v6142_v5 = vpop.f32.mrf.mxu2 }
 0x52e   : > { %v2888_v17 = vpack.c.bf16 %v2877_v8, %v2876_v41  ;;  %v2426_v34 = vmul.f32 %v4429_v16, %v5976_v22  ;;  %v2065_v22 = vpack.c.bf16 %v6087_v49, %v6087_v49  ;;  %v2070_v41 = vpack.c.bf16 %v6115_v47, %v6115_v47 }
 0x52f   : > { %v2367_v2 = vmul.f32 1.442695, %v2336_v39 }
 0x530   : > { %v2437_v50 = vpack.c.bf16 %v2426_v34, %v2425_v60 }
 0x531   : > { %4430 = vpow2.f32 %v2367_v2  ;;  %2944 = vmatmul.bf16.gmra.mxu2 %v2888_v17 }
 0x532   : > { %4432 = vrcp.f32 %v2843_v48 }
 0x534   : > { %v2841_v55 = vpop.xlane.xlu2 %2840 }
 0x535   : > { %4434 = vrcp.f32 %v2841_v55  ;;  %v6152_v43 = vpop.f32.mrf.mxu2 }
 0x536   : > { %4436 = vrcp.f32 %v2390_v46 }
 0x537   : > { %v6140_v20 = vpop.eup %4430 }
 0x538   : > { %2399 = vadd.xlane.f32.xlu1 %v6140_v20  ;;  %v4433_v26 = vpop.eup %4432  ;;  %2493 = vmatmul.bf16.gmra.mxu0 %v2437_v50 }
 0x539   : > { %v2879_v30 = vmul.f32 %v4433_v26, %v6028_v6  ;;  %v2068_v6 = vpack.c.bf16 %v6099_v62, %v6099_v62 }
 0x53b   : > { %v4435_v12 = vpop.eup %4434 }
 0x53c   : > { %v6145_v63 = vpop.f32.mrf.mxu0  ;;  %v2392_v24 = vpop.xlane.xlu2 %2391  ;;  %v2878_v38 = vmul.f32 %v4435_v12, %v6065_v25 }
 0x53d   : > { %4438 = vrcp.f32 %v2392_v24  ;;  %v4437_v31 = vpop.eup %4436  ;;  %v6161_v49 = vpop.f32.mrf.mxu2 }
 0x53e   : > { %v2889_v42 = vpack.c.bf16 %v2879_v30, %v2878_v38  ;;  %v2427_v32 = vmul.f32 %v4437_v31, %v6034_v3  ;;  %v2067_v3 = vpack.c.bf16 %v6093_v54, %v6093_v54 }
 0x540   : > { %2099 = vrot.lane.b32.xlu2 %v2065_v22, %s4773_s13 }
 0x541   : > { %2949 = vmatmul.bf16.gmra.mxu2 %v2889_v42 }
 0x543   : > { %v4439_v4 = vpop.eup %4438 }
 0x544   : > { %v6154_v29 = vpop.f32.mrf.mxu0  ;;  %v2428_v25 = vmul.f32 %v4439_v4, %v6070_v56  ;;  %v2845_v56 = vpop.xlane.xlu0 %2844 }
 0x545   : > { %v6164_v0 = vpop.f32.mrf.mxu2  ;;  %4440 = vrcp.f32 %v2845_v56 }
 0x546   : > { %v2438_v7 = vpack.c.bf16 %v2428_v25, %v2427_v32 }
 0x548   : > { %2105 = vrot.lane.b32.xlu2 %v2068_v6, %s4773_s13  ;;  %2498 = vmatmul.bf16.gmra.mxu0 %v2438_v7 }
 0x54b   : > { %v4441_v13 = vpop.eup %4440 }
 0x54c   : > { %v2479_v37 = vpop.f32.mrf.mxu0  ;;  %v2396_v44 = vpop.xlane.xlu0 %2395  ;;  %v2880_v60 = vmul.f32 %v4441_v13, %v6044_v28  ;;  %v2073_v13 = vpack.c.bf16 %v6142_v5, %v6142_v5 }
 0x54d   : > { %v2516_v10 = vpack.c.bf16 %v2479_v37, %v2479_v37  ;;  %v6170_v62 = vpop.f32.mrf.mxu2 }
 0x551   : > { %2550 = vrot.lane.b32.xlu1 %v2516_v10, %s4771_s17 }
 0x554   : > { %v2481_v18 = vpop.f32.mrf.mxu0 }
 0x555   : > { %v2517_v9 = vpack.c.bf16 %v2481_v18, %v2481_v18  ;;  %v6175_v33 = vpop.f32.mrf.mxu2 }
 0x557   : > { %2552 = vrot.lane.b32.xlu0 %v2517_v9, %s4771_s17 }
 0x559   : > { %2103 = vrot.lane.b32.xlu1 %v2067_v3, %s4773_s13 }
 0x55d   : > { %v6177_v21 = vpop.f32.mrf.mxu2 }
 0x560   : > { %v2398_v61 = vpop.xlane.xlu0 %2397 }
 0x561   : > { %2107 = vrot.lane.b32.xlu1 %v2069_v53, %s4773_s13 }
 0x565   : > { %v6180_v52 = vpop.f32.mrf.mxu2 }
 0x573   : > { %v2102_v54 = vpop.permute.xlu0 %2101 }
 0x574   : > { %2147 = vst.msk [vmem:[#allocation4 + $0xc] sm:$0xf] %vm2143_vm2, %v2102_v54 }
 0x583   : > { %v2930_v57 = vpop.f32.mrf.mxu2 }
 0x584   : > { %v2967_v45 = vpack.c.bf16 %v2930_v57, %v2930_v57 }
 0x585   : > { %v2484_v1 = vpop.f32.mrf.mxu0 }
 0x586   : > { %3001 = vrot.lane.b32.xlu2 %v2967_v45, %s4772_s15  ;;  %v2518_v23 = vpack.c.bf16 %v2484_v1, %v2484_v1 }
 0x588   : > { %2554 = vrot.lane.b32.xlu0 %v2518_v23, %s4771_s17 }
 0x58b   : > { %v2932_v40 = vpop.f32.mrf.mxu2  ;;  %v2847_v39 = vpop.xlane.xlu1 %2846 }
 0x58c   : > { %4442 = vrcp.f32 %v2847_v39  ;;  %v2968_v2 = vpack.c.bf16 %v2932_v40, %v2932_v40 }
 0x58d   : > { %v2486_v8 = vpop.f32.mrf.mxu0  ;;  %4444 = vrcp.f32 %v2396_v44 }
 0x58e   : > { %2109 = vrot.lane.b32.xlu2 %v2070_v41, %s4773_s13  ;;  %v2519_v17 = vpack.c.bf16 %v2486_v8, %v2486_v8 }
 0x590   : > { %3003 = vrot.lane.b32.xlu0 %v2968_v2, %s4772_s15  ;;  %2556 = vrot.lane.b32.xlu1 %v2519_v17, %s4771_s17 }
 0x592   : > { %v4443_v48 = vpop.eup %4442 }
 0x593   : > { %v2394_v16 = vpop.xlane.xlu2 %2393  ;;  %v2881_v55 = vmul.f32 %v4443_v48, %v6110_v14  ;;  %v2935_v34 = vpop.f32.mrf.mxu2  ;;  %v2072_v14 = vpack.c.bf16 %v6133_v58, %v6133_v58 }
 0x594   : > { %v2969_v47 = vpack.c.bf16 %v2935_v34, %v2935_v34  ;;  %4446 = vrcp.f32 %v2394_v16  ;;  %v2849_v46 = vpop.xlane.xlu1 %2848  ;;  %v4445_v26 = vpop.eup %4444  ;;  %v3926_v16 = vld [vmem:[#allocation16 + $0x38] sm:$0xff] }
 0x595   : > { %v2890_v50 = vpack.c.bf16 %v2881_v55, %v2880_v60  ;;  %4448 = vrcp.f32 %v2849_v46  ;;  %v2430_v28 = vmul.f32 %v4445_v26, %v6050_v11  ;;  %4069 = vmatpush.bf16.msra.mxu3 %v3926_v16  ;;  %3194 = vmatpush.bf16.msrb.mxu0 %v3926_v16  ;;  %v2078_v55 = vpack.c.bf16 %v6175_v33, %v6175_v33  ;;  %v3924_v26 = vld [vmem:[#allocation16 + $0x28] sm:$0xff]  ;;  %v3923_v33 = vld [vmem:[#allocation16 + $0x20] sm:$0xff] }
 0x596   : > { %3005 = vrot.lane.b32.xlu2 %v2969_v47, %s4772_s15 }
 0x597   : > { %2954 = vmatmul.bf16.gmra.mxu2 %v2890_v50  ;;  %v3925_v50 = vld [vmem:[#allocation16 + $0x30] sm:$0xff] }
 0x599   : > { %4070 = vmatpush.bf16.msra.mxu3 %v3925_v50  ;;  %3195 = vmatpush.bf16.msrb.mxu0 %v3925_v50  ;;  %v2515_v50 = vpack.c.bf16 %v6154_v29, %v6154_v29  ;;  %v6298_v29 = vld [vmem:[%s6391_s10] ss:$0 sm:$0xff] }
 0x59a   : > { %v4447_v12 = vpop.eup %4446 }
 0x59b   : > { %v2851_v24 = vpop.xlane.xlu2 %2850  ;;  %v2937_v38 = vpop.f32.mrf.mxu2  ;;  %v2429_v30 = vmul.f32 %v4447_v12, %v6122_v27  ;;  %v2075_v12 = vpack.c.bf16 %v6161_v49, %v6161_v49 }
 0x59c   : > { %4450 = vrcp.f32 %v2851_v24  ;;  %v4449_v42 = vpop.eup %4448  ;;  %v2970_v9 = vpack.c.bf16 %v2937_v38, %v2937_v38  ;;  %v3922_v24 = vld [vmem:[#allocation16 + $0x18] sm:$0xff] }
 0x59d   : > { %v2439_v22 = vpack.c.bf16 %v2430_v28, %v2429_v30  ;;  %v2882_v32 = vmul.f32 %v4449_v42, %v6120_v19  ;;  %4452 = vrcp.f32 %v2398_v61  ;;  %v2074_v19 = vpack.c.bf16 %v6152_v43, %v6152_v43  ;;  %4071 = vmatpush.bf16.msra.mxu3 %v3924_v26  ;;  %3196 = vmatpush.bf16.msrb.mxu0 %v3924_v26  ;;  %v3921_v30 = vld [vmem:[#allocation16 + $0x10] sm:$0xff]  ;;  %v3920_v28 = vld [vmem:[#allocation16 + $0x8] sm:$0xff] }
 0x59e   : > { %2113 = vrot.lane.b32.xlu2 %v2072_v14, %s4773_s13  ;;  %v2071_v43 = vpack.c.bf16 %v6126_v36, %v6126_v36  ;;  %v3919_v14 = vld [vmem:[#allocation16] sm:$0xff] }
 0x59f   : > { %2503 = vmatmul.bf16.gmra.mxu0 %v2439_v22 }
 0x5a1   : > { %4072 = vmatpush.bf16.msra.mxu3 %v3923_v33  ;;  %3197 = vmatpush.bf16.msrb.mxu0 %v3923_v33 }
 0x5a2   : > { %v4451_v31 = vpop.eup %4450 }
 0x5a3   : > { %v2100_v4 = vpop.permute.xlu2 %2099  ;;  %v2883_v25 = vmul.f32 %v4451_v31, %v6130_v59  ;;  %v4453_v56 = vpop.eup %4452 }
 0x5a4   : > { %v2940_v6 = vpop.f32.mrf.mxu2  ;;  %2146 = vst.msk [vmem:[#allocation4 + $0x8] sm:$0xf] %vm2143_vm2, %v2100_v4  ;;  %v2431_v44 = vmul.f32 %v4453_v56, %v6089_v51  ;;  %v2076_v51 = vpack.c.bf16 %v6164_v0, %v6164_v0  ;;  %v2064_v56 = vpack.c.bf16 %v6084_v35, %v6084_v35 }
 0x5a5   : > { %v2971_v27 = vpack.c.bf16 %v2940_v6, %v2940_v6  ;;  %v2891_v7 = vpack.c.bf16 %v2883_v25, %v2882_v32  ;;  %v2489_v11 = vpop.f32.mrf.mxu0  ;;  %4073 = vmatpush.bf16.msra.mxu3 %v3922_v24  ;;  %3198 = vmatpush.bf16.msrb.mxu0 %v3922_v24 }
 0x5a6   : > { %v2520_v37 = vpack.c.bf16 %v2489_v11, %v2489_v11 }
 0x5a7   : > { %3009 = vrot.lane.b32.xlu2 %v2971_v27, %s4772_s15  ;;  %2959 = vmatmul.bf16.gmra.mxu2 %v2891_v7 }
 0x5a8   : > { %2558 = vrot.lane.b32.xlu0 %v2520_v37, %s4771_s17 }
 0x5a9   : > { %4074 = vmatpush.bf16.msra.mxu3 %v3921_v30  ;;  %3199 = vmatpush.bf16.msrb.mxu0 %v3921_v30 }
 0x5ab   : > { %v2400_v58 = vpop.xlane.xlu1 %2399  ;;  %v2106_v10 = vpop.permute.xlu2 %2105 }
 0x5ac   : > { %v2942_v18 = vpop.f32.mrf.mxu2  ;;  %4454 = vrcp.f32 %v2400_v58  ;;  %2149 = vst.msk [vmem:[#allocation4 + $0x14] sm:$0xf] %vm2143_vm2, %v2106_v10 }
 0x5ad   : > { %v2491_v59 = vpop.f32.mrf.mxu0  ;;  %v2972_v39 = vpack.c.bf16 %v2942_v18, %v2942_v18  ;;  %4075 = vmatpush.bf16.msra.mxu3 %v3920_v28  ;;  %3200 = vmatpush.bf16.msrb.mxu0 %v3920_v28 }
 0x5ae   : > { %v2521_v3 = vpack.c.bf16 %v2491_v59, %v2491_v59 }
 0x5af   : > { %2117 = vrot.lane.b32.xlu2 %v2074_v19, %s4773_s13 }
 0x5b0   : > { %3007 = vrot.lane.b32.xlu0 %v2970_v9, %s4772_s15  ;;  %2560 = vrot.lane.b32.xlu1 %v2521_v3, %s4771_s17 }
 0x5b1   : > { %4076 = vmatpush.bf16.msra.mxu3 %v3919_v14  ;;  %3201 = vmatpush.bf16.msrb.mxu0 %v3919_v14 }
 0x5b2   : > { %v4455_v53 = vpop.eup %4454 }
 0x5b3   : > { %v2432_v61 = vmul.f32 %v4455_v53, %v6140_v20 }
 0x5b4   : > { %v2945_v54 = vpop.f32.mrf.mxu2 }
 0x5b5   : > { %v2973_v57 = vpack.c.bf16 %v2945_v54, %v2945_v54  ;;  %v2440_v45 = vpack.c.bf16 %v2432_v61, %v2431_v44  ;;  %v2494_v1 = vpop.f32.mrf.mxu0 }
 0x5b6   : > { %v2522_v23 = vpack.c.bf16 %v2494_v1, %v2494_v1 }
 0x5b7   : > { %3013 = vrot.lane.b32.xlu2 %v2973_v57, %s4772_s15  ;;  %2508 = vmatmul.bf16.gmra.mxu0 %v2440_v45 }
 0x5b8   : > { %2562 = vrot.lane.b32.xlu0 %v2522_v23, %s4771_s17  ;;  %2111 = vrot.lane.b32.xlu1 %v2071_v43, %s4773_s13 }
 0x5bc   : > { %v2947_v40 = vpop.f32.mrf.mxu2 }
 0x5bd   : > { %v2496_v20 = vpop.f32.mrf.mxu0  ;;  %v2974_v34 = vpack.c.bf16 %v2947_v40, %v2947_v40 }
 0x5be   : > { %v2523_v41 = vpack.c.bf16 %v2496_v20, %v2496_v20  ;;  %v2965_v20 = vpack.c.bf16 %v6177_v21, %v6177_v21 }
 0x5bf   : > { %2121 = vrot.lane.b32.xlu2 %v2076_v51, %s4773_s13  ;;  %v2077_v51 = vpack.c.bf16 %v6170_v62, %v6170_v62 }
 0x5c0   : > { %3011 = vrot.lane.b32.xlu0 %v2972_v39, %s4772_s15  ;;  %2564 = vrot.lane.b32.xlu1 %v2523_v41, %s4771_s17 }
 0x5c3   : > { %v2551_v36 = vpop.permute.xlu1 %2550 }
 0x5c4   : > { %2597 = vst.msk [vmem:[#allocation4 + $0x8] sm:$0xf] %vm2594_vm3, %v2551_v36  ;;  %v2950_v8 = vpop.f32.mrf.mxu2 }
 0x5c5   : > { %v2975_v2 = vpack.c.bf16 %v2950_v8, %v2950_v8  ;;  %v2499_v17 = vpop.f32.mrf.mxu0 }
 0x5c6   : > { %v2524_v0 = vpack.c.bf16 %v2499_v17, %v2499_v17 }
 0x5c7   : > { %3017 = vrot.lane.b32.xlu2 %v2975_v2, %s4772_s15 }
 0x5c8   : > { %2115 = vrot.lane.b32.xlu1 %v2073_v13, %s4773_s13  ;;  %2566 = vrot.lane.b32.xlu0 %v2524_v0, %s4771_s17 }
 0x5c9   : > { %v2553_v48 = vpop.permute.xlu0 %2552 }
 0x5ca   : > { %2598 = vst.msk [vmem:[#allocation4 + $0xc] sm:$0xf] %vm2594_vm3, %v2553_v48 }
 0x5cb   : > { %v2104_v60 = vpop.permute.xlu1 %2103 }
 0x5cc   : > { %2148 = vst.msk [vmem:[#allocation4 + $0x10] sm:$0xf] %vm2143_vm2, %v2104_v60  ;;  %v2952_v11 = vpop.f32.mrf.mxu2  ;;  %v2063_v60 = vpack.c.bf16 %v6080_v15, %v6080_v15  ;;  %v2966_v15 = vpack.c.bf16 %v6180_v52, %v6180_v52 }
 0x5cd   : > { %v2501_v5 = vpop.f32.mrf.mxu0  ;;  %v2976_v54 = vpack.c.bf16 %v2952_v11, %v2952_v11 }
 0x5ce   : > { %v2525_v47 = vpack.c.bf16 %v2501_v5, %v2501_v5 }
 0x5cf   : > { %2125 = vrot.lane.b32.xlu2 %v2078_v55, %s4773_s13  ;;  %v2514_v55 = vpack.c.bf16 %v6145_v63, %v6145_v63 }
 0x5d0   : > { %3015 = vrot.lane.b32.xlu0 %v2974_v34, %s4772_s15  ;;  %2568 = vrot.lane.b32.xlu1 %v2525_v47, %s4771_s17 }
 0x5d3   : > { %v2108_v46 = vpop.permute.xlu1 %2107 }
 0x5d4   : > { %2150 = vst.msk [vmem:[#allocation4 + $0x18] sm:$0xf] %vm2143_vm2, %v2108_v46 }
 0x5d8   : > { %2119 = vrot.lane.b32.xlu1 %v2075_v12, %s4773_s13 }
 0x5e0   : > { %v3002_v38 = vpop.permute.xlu2 %3001 }
 0x5e1   : > { %3048 = vst.msk [vmem:[#allocation4 + $0x8] sm:$0xf] %vm3045_vm4, %v3002_v38 }
 0x5e8   : > { %v2110_v49 = vpop.permute.xlu2 %2109 }
 0x5e9   : > { %2151 = vst.msk [vmem:[#allocation4 + $0x1c] sm:$0xf] %vm2143_vm2, %v2110_v49 }
 0x5f0   : > { %v3006_v22 = vpop.permute.xlu2 %3005 }
 0x5f8   : > { %v2114_v42 = vpop.permute.xlu2 %2113 }
 0x5f9   : > { %2153 = vst.msk [vmem:[#allocation4 + $0x24] sm:$0xf] %vm2143_vm2, %v2114_v42 }
 0x5fa   : > { %v2555_v31 = vpop.permute.xlu0 %2554 }
 0x5fb   : > { %2599 = vst.msk [vmem:[#allocation4 + $0x10] sm:$0xf] %vm2594_vm3, %v2555_v31 }
 0x5fc   : > { %3050 = vst.msk [vmem:[#allocation4 + $0x10] sm:$0xf] %vm3045_vm4, %v3006_v22 }
 0x601   : > { %v3010_v4 = vpop.permute.xlu2 %3009 }
 0x602   : > { %v3004_v32 = vpop.permute.xlu0 %3003  ;;  %v2557_v25 = vpop.permute.xlu1 %2556 }
 0x603   : > { %3049 = vst.msk [vmem:[#allocation4 + $0xc] sm:$0xf] %vm3045_vm4, %v3004_v32 }
 0x604   : > { %2600 = vst.msk [vmem:[#allocation4 + $0x14] sm:$0xf] %vm2594_vm3, %v2557_v25 }
 0x609   : > { %v2118_v6 = vpop.permute.xlu2 %2117 }
 0x60a   : > { %2155 = vst.msk [vmem:[#allocation4 + $0x2c] sm:$0xf] %vm2143_vm2, %v2118_v6  ;;  %v3912_v27 = vld [vmem:[#allocation4 + $0x8] sm:$0xff] }
 0x60b   : > { %3207 = vmatmul.bf16.vlgmr.msra.gmra.mxu3 %v3912_v27 }
 0x611   : > { %v3014_v7 = vpop.permute.xlu2 %3013 }
 0x619   : > { %v2122_v37 = vpop.permute.xlu2 %2121 }
 0x61a   : > { %2157 = vst.msk [vmem:[#allocation4 + $0x34] sm:$0xf] %vm2143_vm2, %v2122_v37  ;;  %v2955_v58 = vpop.f32.mrf.mxu2  ;;  %v2559_v10 = vpop.permute.xlu0 %2558 }
 0x61b   : > { %v2977_v18 = vpack.c.bf16 %v2955_v58, %v2955_v58  ;;  %2601 = vst.msk [vmem:[#allocation4 + $0x18] sm:$0xf] %vm2594_vm3, %v2559_v10 }
 0x61c   : > { %3052 = vst.msk [vmem:[#allocation4 + $0x18] sm:$0xf] %vm3045_vm4, %v3010_v4  ;;  %v2504_v19 = vpop.f32.mrf.mxu0 }
 0x61d   : > { %3021 = vrot.lane.b32.xlu2 %v2977_v18, %s4772_s15  ;;  %v2526_v59 = vpack.c.bf16 %v2504_v19, %v2504_v19 }
 0x61f   : > { %2570 = vrot.lane.b32.xlu0 %v2526_v59, %s4771_s17 }
 0x621   : > { %v3018_v9 = vpop.permute.xlu2 %3017 }
 0x622   : > { %v2957_v3 = vpop.f32.mrf.mxu2  ;;  %v3008_v53 = vpop.permute.xlu0 %3007 }
 0x623   : > { %v2561_v44 = vpop.permute.xlu1 %2560  ;;  %3051 = vst.msk [vmem:[#allocation4 + $0x14] sm:$0xf] %vm3045_vm4, %v3008_v53  ;;  %v2978_v0 = vpack.c.bf16 %v2957_v3, %v2957_v3 }
 0x624   : > { %2602 = vst.msk [vmem:[#allocation4 + $0x1c] sm:$0xf] %vm2594_vm3, %v2561_v44  ;;  %v2506_v61 = vpop.f32.mrf.mxu0 }
 0x625   : > { %2097 = vrot.lane.b32.xlu2 %v2064_v56, %s4773_s13  ;;  %v2527_v57 = vpack.c.bf16 %v2506_v61, %v2506_v61 }
 0x627   : > { %3019 = vrot.lane.b32.xlu0 %v2976_v54, %s4772_s15  ;;  %2572 = vrot.lane.b32.xlu1 %v2527_v57, %s4771_s17 }
 0x629   : > { %v2126_v45 = vpop.permute.xlu2 %2125 }
 0x62a   : > { %2159 = vst.msk [vmem:[#allocation4 + $0x3c] sm:$0xf] %vm2143_vm2, %v2126_v45  ;;  %v2960_v1 = vpop.f32.mrf.mxu2  ;;  %v2563_v35 = vpop.permute.xlu0 %2562  ;;  %v3913_v40 = vld [vmem:[#allocation4 + $0x10] sm:$0xff] }
 0x62b   : > { %v2112_v43 = vpop.permute.xlu1 %2111  ;;  %v2979_v23 = vpack.c.bf16 %v2960_v1, %v2960_v1  ;;  %3212 = vmatmul.bf16.gmra.mxu3 %v3913_v40 }
 0x62c   : > { %2152 = vst.msk [vmem:[#allocation4 + $0x20] sm:$0xf] %vm2143_vm2, %v2112_v43 }
 0x62d   : > { %2603 = vst.msk [vmem:[#allocation4 + $0x20] sm:$0xf] %vm2594_vm3, %v2563_v35  ;;  %3025 = vrot.lane.b32.xlu2 %v2979_v23, %s4772_s15 }
 0x62e   : > { %3054 = vst.msk [vmem:[#allocation4 + $0x20] sm:$0xf] %vm3045_vm4, %v3014_v7 }
 0x62f   : > { %2123 = vrot.lane.b32.xlu1 %v2077_v51, %s4773_s13 }
 0x632   : > { %v3012_v39 = vpop.permute.xlu0 %3011  ;;  %v2962_v5 = vpop.f32.mrf.mxu2 }
 0x633   : > { %v2565_v41 = vpop.permute.xlu1 %2564  ;;  %3053 = vst.msk [vmem:[#allocation4 + $0x1c] sm:$0xf] %vm3045_vm4, %v3012_v39  ;;  %v2980_v46 = vpack.c.bf16 %v2962_v5, %v2962_v5 }
 0x634   : > { %v2509_v36 = vpop.f32.mrf.mxu0  ;;  %2604 = vst.msk [vmem:[#allocation4 + $0x24] sm:$0xf] %vm2594_vm3, %v2565_v41 }
 0x635   : > { %v2528_v8 = vpack.c.bf16 %v2509_v36, %v2509_v36  ;;  %2997 = vrot.lane.b32.xlu2 %v2965_v20, %s4772_s15 }
 0x637   : > { %2574 = vrot.lane.b32.xlu0 %v2528_v8, %s4771_s17 }
 0x63a   : > { %v2567_v2 = vpop.permute.xlu0 %2566  ;;  %v3914_v17 = vld [vmem:[#allocation4 + $0x18] sm:$0xff] }
 0x63b   : > { %v2116_v62 = vpop.permute.xlu1 %2115  ;;  %3217 = vmatmul.bf16.gmra.mxu3 %v3914_v17 }
 0x63c   : > { %2154 = vst.msk [vmem:[#allocation4 + $0x28] sm:$0xf] %vm2143_vm2, %v2116_v62  ;;  %v2511_v13 = vpop.f32.mrf.mxu0 }
 0x63d   : > { %2605 = vst.msk [vmem:[#allocation4 + $0x28] sm:$0xf] %vm2594_vm3, %v2567_v2  ;;  %v2529_v21 = vpack.c.bf16 %v2511_v13, %v2511_v13 }
 0x63e   : > { %3056 = vst.msk [vmem:[#allocation4 + $0x28] sm:$0xf] %vm3045_vm4, %v3018_v9 }
 0x63f   : > { %3023 = vrot.lane.b32.xlu0 %v2978_v0, %s4772_s15  ;;  %2576 = vrot.lane.b32.xlu1 %v2529_v21, %s4771_s17 }
 0x642   : > { %v3016_v48 = vpop.permute.xlu0 %3015 }
 0x643   : > { %v2569_v16 = vpop.permute.xlu1 %2568  ;;  %3055 = vst.msk [vmem:[#allocation4 + $0x24] sm:$0xf] %vm3045_vm4, %v3016_v48 }
 0x644   : > { %2606 = vst.msk [vmem:[#allocation4 + $0x2c] sm:$0xf] %vm2594_vm3, %v2569_v16 }
 0x647   : > { %2546 = vrot.lane.b32.xlu0 %v2514_v55, %s4771_s17  ;;  %2095 = vrot.lane.b32.xlu1 %v2063_v60, %s4773_s13 }
 0x64a   : > { %v3915_v47 = vld [vmem:[#allocation4 + $0x20] sm:$0xff] }
 0x64b   : > { %v2120_v34 = vpop.permute.xlu1 %2119  ;;  %3222 = vmatmul.bf16.gmra.mxu3 %v3915_v47 }
 0x64c   : > { %2156 = vst.msk [vmem:[#allocation4 + $0x30] sm:$0xf] %vm2143_vm2, %v2120_v34 }
 0x64f   : > { %2548 = vrot.lane.b32.xlu1 %v2515_v50, %s4771_s17  ;;  %3027 = vrot.lane.b32.xlu0 %v2980_v46, %s4772_s15 }
 0x657   : > { %2999 = vrot.lane.b32.xlu0 %v2966_v15, %s4772_s15 }
 0x677   : > { %v3022_v63 = vpop.permute.xlu2 %3021 }
 0x67f   : > { %v2098_v26 = vpop.permute.xlu2 %2097 }
 0x680   : > { %2145 = vst.msk [vmem:[#allocation4 + $0x4] sm:$0xf] %vm2143_vm2, %v2098_v26 }
 0x687   : > { %v3026_v31 = vpop.permute.xlu2 %3025 }
 0x68e   : > { %v3208_v12 = vpop.f32.mrf.mxu3 }
 0x68f   : > { %v3209_v52 = vadd.f32 %v6298_v29, %v3208_v12  ;;  %v2998_v10 = vpop.permute.xlu2 %2997 }
 0x691   : > { %v2571_v33 = vpop.permute.xlu0 %2570 }
 0x692   : > { %2607 = vst.msk [vmem:[#allocation4 + $0x30] sm:$0xf] %vm2594_vm3, %v2571_v33 }
 0x693   : > { %3058 = vst.msk [vmem:[#allocation4 + $0x30] sm:$0xf] %vm3045_vm4, %v3022_v63 }
 0x696   : > { %v3210_v24 = vpop.f32.mrf.mxu3 }
 0x697   : > { %v3211_v38 = vadd.f32 %v6298_v29, %v3210_v24 }
 0x699   : > { %v3020_v30 = vpop.permute.xlu0 %3019  ;;  %v2573_v28 = vpop.permute.xlu1 %2572  ;;  %v4016_v49 = vpack.c.bf16 %v3211_v38, %v3209_v52 }
 0x69a   : > { %3057 = vst.msk [vmem:[#allocation4 + $0x2c] sm:$0xf] %vm3045_vm4, %v3020_v30 }
 0x69b   : > { %2608 = vst.msk [vmem:[#allocation4 + $0x34] sm:$0xf] %vm2594_vm3, %v2573_v28 }
 0x69c   : > { %4062 = vst [vmem:[%s6305_s7 + $0x8] sm:$0xff] %v4016_v49  }
 0x6a1   : > { %v2124_v14 = vpop.permute.xlu1 %2123  ;;  %v3916_v22 = vld [vmem:[#allocation4 + $0x28] sm:$0xff] }
 0x6a2   : > { %2158 = vst.msk [vmem:[#allocation4 + $0x38] sm:$0xf] %vm2143_vm2, %v2124_v14  ;;  %3227 = vmatmul.bf16.gmra.mxu3 %v3916_v22 }
 0x6a9   : > { %v2575_v42 = vpop.permute.xlu0 %2574 }
 0x6aa   : > { %2609 = vst.msk [vmem:[#allocation4 + $0x38] sm:$0xf] %vm2594_vm3, %v2575_v42 }
 0x6ab   : > { %3060 = vst.msk [vmem:[#allocation4 + $0x38] sm:$0xf] %vm3045_vm4, %v3026_v31 }
 0x6ae   : > { %v3213_v4 = vpop.f32.mrf.mxu3 }
 0x6af   : > { %v3214_v27 = vadd.f32 %v6298_v29, %v3213_v4 }
 0x6b1   : > { %v3024_v32 = vpop.permute.xlu0 %3023  ;;  %v2577_v25 = vpop.permute.xlu1 %2576 }
 0x6b2   : > { %3059 = vst.msk [vmem:[#allocation4 + $0x34] sm:$0xf] %vm3045_vm4, %v3024_v32 }
 0x6b3   : > { %2610 = vst.msk [vmem:[#allocation4 + $0x3c] sm:$0xf] %vm2594_vm3, %v2577_v25 }
 0x6b6   : > { %v3215_v6 = vpop.f32.mrf.mxu3 }
 0x6b7   : > { %v3216_v7 = vadd.f32 %v6298_v29, %v3215_v6 }
 0x6b9   : > { %v2547_v11 = vpop.permute.xlu0 %2546  ;;  %v2096_v37 = vpop.permute.xlu1 %2095  ;;  %v3917_v58 = vld [vmem:[#allocation4 + $0x30] sm:$0xff]  ;;  %v4021_v18 = vpack.c.bf16 %v3216_v7, %v3214_v27 }
 0x6ba   : > { %2144 = vst.msk [vmem:[#allocation4] sm:$0xf] %vm2143_vm2, %v2096_v37  ;;  %3232 = vmatmul.bf16.gmra.mxu3 %v3917_v58 }
 0x6bb   : > { %2595 = vst.msk [vmem:[#allocation4] sm:$0xf] %vm2594_vm3, %v2547_v11 }
 0x6bc   : > { %3046 = vst.msk [vmem:[#allocation4] sm:$0xf] %vm3045_vm4, %v2998_v10 }
 0x6bd   : > { %4063 = vst [vmem:[%s6305_s7 + $0x10] sm:$0xff] %v4021_v18  }
 0x6be   : > { %v3218_v19 = vpop.f32.mrf.mxu3 }
 0x6bf   : > { %v3219_v56 = vadd.f32 %v6298_v29, %v3218_v19 }
 0x6c1   : > { %v2549_v59 = vpop.permute.xlu1 %2548  ;;  %v3028_v9 = vpop.permute.xlu0 %3027 }
 0x6c2   : > { %2596 = vst.msk [vmem:[#allocation4 + $0x4] sm:$0xf] %vm2594_vm3, %v2549_v59 }
 0x6c3   : > { %3061 = vst.msk [vmem:[#allocation4 + $0x3c] sm:$0xf] %vm3045_vm4, %v3028_v9 }
 0x6c6   : > { %v3220_v3 = vpop.f32.mrf.mxu3 }
 0x6c7   : > { %v3221_v53 = vadd.f32 %v6298_v29, %v3220_v3 }
 0x6c9   : > { %v3000_v44 = vpop.permute.xlu0 %2999  ;;  %v4026_v54 = vpack.c.bf16 %v3221_v53, %v3219_v56 }
 0x6ca   : > { %3047 = vst.msk [vmem:[#allocation4 + $0x4] sm:$0xf] %vm3045_vm4, %v3000_v44  ;;  %v3918_v61 = vld [vmem:[#allocation4 + $0x38] sm:$0xff] }
 0x6cb   : > { %3237 = vmatmul.bf16.gmra.mxu3 %v3918_v61  ;;  %4064 = vst [vmem:[%s6305_s7 + $0x18] sm:$0xff] %v4026_v54  }
 0x6ce   : > { %v3223_v57 = vpop.f32.mrf.mxu3 }
 0x6cf   : > { %v3224_v35 = vadd.f32 %v6298_v29, %v3223_v57 }
 0x6d1   : > { %v3911_v45 = vld [vmem:[#allocation4] sm:$0xff] }
 0x6d2   : > { %3202 = vmatmul.bf16.vlgmr.msrb.gmra.mxu0 %v3911_v45 }
 0x6d6   : > { %v3225_v1 = vpop.f32.mrf.mxu3 }
 0x6d7   : > { %v3226_v43 = vadd.f32 %v6298_v29, %v3225_v1 }
 0x6d9   : > { %v4031_v23 = vpack.c.bf16 %v3226_v43, %v3224_v35 }
 0x6db   : > { %4065 = vst [vmem:[%s6305_s7 + $0x20] sm:$0xff] %v4031_v23  }
 0x725   : > { %v3228_v40 = vpop.f32.mrf.mxu3 }
 0x726   : > { %v3229_v20 = vadd.f32 %v6298_v29, %v3228_v40 }
 0x72d   : > { %v3230_v51 = vpop.f32.mrf.mxu3 }
 0x72e   : > { %v3231_v39 = vadd.f32 %v6298_v29, %v3230_v51 }
 0x730   : > { %v4036_v41 = vpack.c.bf16 %v3231_v39, %v3229_v20 }
 0x732   : > { %4066 = vst [vmem:[%s6305_s7 + $0x28] sm:$0xff] %v4036_v41  }
 0x73d   : > { %v3233_v36 = vpop.f32.mrf.mxu3 }
 0x73e   : > { %v3234_v62 = vadd.f32 %v6298_v29, %v3233_v36 }
 0x745   : > { %v3235_v8 = vpop.f32.mrf.mxu3 }
 0x746   : > { %v3236_v2 = vadd.f32 %v6298_v29, %v3235_v8 }
 0x748   : > { %v4041_v17 = vpack.c.bf16 %v3236_v2, %v3234_v62 }
 0x74a   : > { %4067 = vst [vmem:[%s6305_s7 + $0x30] sm:$0xff] %v4041_v17  }
 0x74e   : > { %v3238_v13 = vpop.f32.mrf.mxu3 }
 0x74f   : > { %v3203_v0 = vpop.f32.mrf.mxu0  ;;  %v3239_v48 = vadd.f32 %v6298_v29, %v3238_v13 }
 0x750   : > { %v3204_v55 = vadd.f32 %v6298_v29, %v3203_v0 }
 0x756   : > { %v3240_v21 = vpop.f32.mrf.mxu3 }
 0x757   : > { %v3241_v16 = vadd.f32 %v6298_v29, %v3240_v21  ;;  %v3205_v60 = vpop.f32.mrf.mxu0 }
 0x758   : > { %v3206_v5 = vadd.f32 %v6298_v29, %v3205_v60 }
 0x759   : > { %v4046_v34 = vpack.c.bf16 %v3241_v16, %v3239_v48 }
 0x75a   : > { %v4011_v47 = vpack.c.bf16 %v3206_v5, %v3204_v55 }
 0x75b   : > { %4068 = vst [vmem:[%s6305_s7 + $0x38] sm:$0xff] %v4046_v34  }
 0x75c   : > { %4012 = vst [vmem:[%s6305_s7] sm:$0xff] %v4011_v47  }
 0x75d   : > { %4696 = shalt.err (!%p4693_p12)
}
 0x75e   : > { %s4774_s1 = smov 4  }
 0x75f   : > { %4099 = dma.vmem_to_hbm [thread:$0]  (%p4924_p7), %s3291_s5, 1024, %s3293_s30, %s3276_s27, %s4771_s17, %s4771_s17, %s4774_s1  }
 0x760 PF: > { %s6447_s13 = sld [smem:[#allocation23_spill]] }
 0x761   : > { %s6449_s26 = sld [smem:[#allocation26_spill]] }
 0x766   : > { %s3307_s7 = sand.u32 1, %s6447_s13  }
 0x767   : > { %p6450_p13 = scmp.ge.s32.totalorder %s6449_s26, 2  ;;  %s3308_s21 = scalar_lea.sflag [#allocation7], %s3307_s7 }
 0x769   : > { %p4125_p0 = pnand %p6450_p13, %p4880_p6 }
 0x76b   : > { %p4126_p3 = pneg %p4125_p0 }
 0x76d   : > { %4738 = dma.done.wait (%p4126_p3), %s3308_s21, 1024  }
 0x76e   : > { %4740 = vsyncadd (%p4126_p3), %s3308_s21, 4294966272  ;;  %s32_s22 = sadd.s32 1, %s6449_s26   ;;  %s6451_s14 = sld [smem:[#allocation30_spill]] }
 0x76f   : > { %p29_p5 = scmp.ge.s32.totalorder %s32_s22, 4   ;;  %s6452_s20 = sld [smem:[#allocation25_spill]] }
 0x770   : > { %s6453_s21 = sld [smem:[#allocation28_spill]]  ;;  %s6454_s17 = smov %s4747_s18 }
 0x771   : > { %s6455_s18 = smov %s4751_s19  ;;  %31 = sbr.rel (!%p29_p5) target bundleno = 17 (0x11), region = 153 }
 0x774   : > { %s6456_s19 = smov %s6451_s14 }
 0x776   :  { %3314 = vsyncpa [#allocation6], 1 }
 0x777   :  { %3316 = vsyncpa [#allocation6 + $0x1], 1 }
 0x778   :  { %3317 = vsyncpa [#allocation9], 1 }
 0x779   :  { %3319 = vsyncpa [#allocation9 + $0x1], 1 }
 0x77a   :  { %3320 = vsyncpa [#allocation12], 1 }
 0x77b   :  { %3321 = vsyncpa [#allocation15], 1 }
 0x77c   :  { %3322 = vsyncpa [#allocation7], 1 }
 0x77d   :  { %3324 = vsyncpa [#allocation7 + $0x1], 1 }

</bundles_post_ra>
